<compile_context>
chip_gen: v7x
topology: tpu7x:2x2x1
jax: 0.10.0
libtpu: 0.0.40
codegen_flags: <defaults>
</compile_context>

<pallas_src>
import jax
import jax.numpy as jnp
from jax import lax
from jax.experimental import pallas as pl
from jax.experimental.pallas import tpu as pltpu


# --------------------------------------------------------------------------- #
# Kernel
# --------------------------------------------------------------------------- #
def _dwconv_kernel(x_ref, top_ref, bot_ref, w_ref, b_ref, o_ref):
    # x_ref:   (BN, TH, W, CB)  unpadded row band for BN images
    # top_ref: (BN, 1,  W, CB)  row just above the band (clamped at the border)
    # bot_ref: (BN, 1,  W, CB)  row just below the band (clamped at the border)
    # w_ref:   (3, 3, CB)       per-channel taps
    # b_ref:   (1, 1, CB)       per-channel bias
    # o_ref:   (BN, TH, W, CB)
    BN, TH, W, CB = x_ref.shape
    f32 = jnp.float32
    hb = pl.program_id(2)
    nb = pl.num_programs(2)

    # --- hoisted parameter loads / broadcasts (once per grid step) -----------
    w = w_ref[...].astype(f32)                                      # (3, 3, CB)
    wb = [[jnp.broadcast_to(w[kh, kw], (W, CB)) for kw in range(3)]
          for kh in range(3)]
    bias = jnp.broadcast_to(b_ref[0, 0, :].astype(f32), (W, CB))
    zcol = jnp.zeros((1, CB), f32)

    at_top = hb == 0
    at_bot = hb == nb - 1

    # Short bands unroll fully (LLO scheduler visibility); long bands loop.
    unroll_rows = (TH * BN) <= 64

    for b in range(BN):
        t_row = top_ref[b, 0].astype(f32)
        b_row = bot_ref[b, 0].astype(f32)
        # Fused pad=1 along H: zero the halo at the image border.
        top = jnp.where(at_top, jnp.zeros_like(t_row), t_row)       # (W, CB)
        bot = jnp.where(at_bot, jnp.zeros_like(b_row), b_row)       # (W, CB)

        def row(i, b=b):
            return x_ref[b, i].astype(f32)                          # (W, CB)

        def emit(h, x_up, x_mid, x_dn, b=b):
            # Vertical taps first: s_kw[w] = sum_kh wgt[kh,kw] * in[h+kh-1, w].
            s0 = x_up * wb[0][0] + x_mid * wb[1][0] + x_dn * wb[2][0]
            s1 = x_up * wb[0][1] + x_mid * wb[1][1] + x_dn * wb[2][1]
            s2 = x_up * wb[0][2] + x_mid * wb[1][2] + x_dn * wb[2][2]
            out = bias + s1
            if W > 1:
                # Fused pad=1 along W: out[w] += s0[w-1] + s2[w+1], zero at the
                # borders.  Row-scale (vreg-scale) shifts — no band temporaries.
                out = out + jnp.concatenate([zcol, s0[:W - 1]], axis=0)
                out = out + jnp.concatenate([s2[1:], zcol], axis=0)
            o_ref[b, h] = out.astype(o_ref.dtype)

        if TH == 1:
            emit(0, top, row(0), bot)
            continue

        emit(0, top, row(0), row(1))
        if unroll_rows:
            for h in range(1, TH - 1):
                emit(h, row(h - 1), row(h), row(h + 1))
        elif TH > 2:
            def body(h, carry):
                emit(h, row(h - 1), row(h), row(h + 1))
                return carry
            lax.fori_loop(1, TH - 1, body, 0)
        emit(TH - 1, row(TH - 2), row(TH - 1), bot)


# --------------------------------------------------------------------------- #
# Block / band selection (generation-aware VMEM budget)
# --------------------------------------------------------------------------- #
def _vmem_limit_bytes():
    """Scoped-VMEM limit: half the physical VMEM when detectable, else 32 MiB
    (safe on v5e/v6e/v7x)."""
    try:
        info = pltpu.get_tpu_info()
        cap = getattr(info, "vmem_capacity_bytes", None)
        if cap:
            return int(cap) // 2
    except Exception:
        pass
    return 32 << 20


def _pick_band_rows(H, row_bytes, budget_bytes):
    """Largest divisor of H (preferring multiples of 8) whose band fits budget."""
    max_rows = max(int(budget_bytes // max(row_bytes, 1)), 1)
    if H <= max_rows:
        return H
    divs = [d for d in range(1, H + 1) if H % d == 0 and d <= max_rows]
    mult8 = [d for d in divs if d % 8 == 0]
    if mult8:
        return max(mult8)
    # TODO(synk): mask a ragged last band instead of tiny divisors for awkward
    # (e.g. prime) H; current fallback keeps correctness but not efficiency.
    return max(divs) if divs else 1


def _choose_blocks(N, H, W, C, itemsize, band_budget):
    """Pick (batch_block, band_rows, channel_block).

    Prefers the widest channel block (multiple of 128 dividing C) that still
    allows a >=8-row band within the budget (longer contiguous NHWC DMA
    chunks); tiny feature maps additionally block the batch dimension.
    """
    if C % 128 == 0:
        cands = sorted({c for c in (C, 512, 384, 256, 128) if C % c == 0},
                       reverse=True)
    else:
        cands = [C]

    cb = cands[-1]
    th = _pick_band_rows(H, W * cb * itemsize, band_budget)
    for c in cands:
        t = _pick_band_rows(H, W * c * itemsize, band_budget)
        if t >= min(H, 8):
            cb, th = c, t
            break

    bn = 1
    if th == H:
        img_bytes = H * W * cb * itemsize
        while (bn * 2 <= min(N, 8) and N % (bn * 2) == 0
               and bn * 2 * img_bytes <= band_budget):
            bn *= 2
    return bn, th, cb


# --------------------------------------------------------------------------- #
# Wrappers
# --------------------------------------------------------------------------- #
def dwconv_nhwc(x, weight, bias, band_rows=None, channel_block=None,
                batch_block=None):
    """Depthwise 3x3 conv (stride 1, pad 1, groups=C, bias) on NHWC input.

    x:      (N, H, W, C)
    weight: (C, 1, 3, 3)   PyTorch depthwise layout
    bias:   (C,)
    """
    N, H, W, C = x.shape
    itemsize = x.dtype.itemsize

    vmem_limit = _vmem_limit_bytes()
    # Real per-step footprint ~ 2x in band + 2x out band + params/halos.
    band_budget = vmem_limit // 6

    bn, th, cb = _choose_blocks(N, H, W, C, itemsize, band_budget)
    if band_rows is not None:
        th = band_rows
    if channel_block is not None:
        cb = channel_block
    if batch_block is not None:
        bn = batch_block
    assert H % th == 0, "band_rows must divide H"
    assert C % cb == 0, "channel_block must divide C"
    assert N % bn == 0, "batch_block must divide N"

    # Tiny parameter-layout glue (C*9 elements, negligible HBM traffic).
    w = jnp.transpose(weight.reshape(C, 3, 3), (1, 2, 0))    # (3, 3, C)
    b = bias.reshape(1, 1, C)

    grid = (N // bn, C // cb, H // th)

    return pl.pallas_call(
        _dwconv_kernel,
        out_shape=jax.ShapeDtypeStruct((N, H, W, C), x.dtype),
        grid=grid,
        in_specs=[
            # main row band
            pl.BlockSpec((bn, th, W, cb), lambda n, ci, hb: (n, hb, 0, ci)),
            # 1-row halos; H-block size is 1 so the block index IS the row index
            # (clamped at the image border; the kernel zeroes it there).
            pl.BlockSpec((bn, 1, W, cb),
                         lambda n, ci, hb: (n, jnp.maximum(hb * th - 1, 0), 0, ci)),
            pl.BlockSpec((bn, 1, W, cb),
                         lambda n, ci, hb: (n, jnp.minimum((hb + 1) * th, H - 1), 0, ci)),
            pl.BlockSpec((3, 3, cb), lambda n, ci, hb: (0, 0, ci)),
            pl.BlockSpec((1, 1, cb), lambda n, ci, hb: (0, 0, ci)),
        ],
        out_specs=pl.BlockSpec((bn, th, W, cb), lambda n, ci, hb: (n, hb, 0, ci)),
        compiler_params=pltpu.CompilerParams(
            dimension_semantics=("parallel", "parallel", "parallel"),
            vmem_limit_bytes=vmem_limit),
    )(x, x, x, w, b)


def dwconv(x_nchw, weight, bias, **kwargs):
    """PyTorch-facing NCHW wrapper.

    NOTE: each transpose below is a full HBM read+write of the tensor (~2x the
    conv's own traffic per direction); NHWC-native callers should call
    dwconv_nhwc directly and skip both.
    """
    x = jnp.transpose(x_nchw, (0, 2, 3, 1))                  # NHWC
    out = dwconv_nhwc(x, weight, bias, **kwargs)
    return jnp.transpose(out, (0, 3, 1, 2))                  # back to NCHW


def _reference_dwconv(x_nchw, weight, bias):
    # Pure-JAX reference (feature_group_count = C depthwise conv) for validation.
    C = x_nchw.shape[1]
    out = lax.conv_general_dilated(
        x_nchw, weight,
        window_strides=(1, 1), padding=((1, 1), (1, 1)),
        dimension_numbers=("NCHW", "OIHW", "NCHW"),
        feature_group_count=C,
    )
    return out + bias.reshape(1, C, 1, 1)


# --------------------------------------------------------------------------- #
# Self-test
# --------------------------------------------------------------------------- #
if __name__ == "__main__":
    bound = 1.0 / jnp.sqrt(9.0)   # nn.Conv2d-style init bound, fan_in = 9

    # --- Test 1: small NCHW shapes matching the module interface -------------
    # (ragged C < 128, full-height band, batch blocking bn=2, unrolled rows)
    key = jax.random.PRNGKey(0)
    kx, kw_, kb = jax.random.split(key, 3)
    N, C, H, W = 2, 4, 16, 16
    x = jax.random.normal(kx, (N, C, H, W), dtype=jnp.float32)
    weight = jax.random.uniform(kw_, (C, 1, 3, 3), jnp.float32, -bound, bound)
    bias = jax.random.uniform(kb, (C,), jnp.float32, -bound, bound)

    out = jax.block_until_ready(dwconv(x, weight, bias))
    ref = _reference_dwconv(x, weight, bias)
    assert out.shape == (N, C, H, W)
    assert jnp.allclose(out, ref, atol=1e-5, rtol=1e-5), "mismatch (test 1)"

    # --- Test 2: lane-aligned channels + multi-band rows (exercises halos) ---
    k2x, k2w, k2b = jax.random.split(jax.random.PRNGKey(1), 3)
    N2, C2, H2, W2 = 1, 256, 32, 16
    x2 = jax.random.normal(k2x, (N2, C2, H2, W2), dtype=jnp.float32)
    w2 = jax.random.uniform(k2w, (C2, 1, 3, 3), jnp.float32, -bound, bound)
    b2 = jax.random.uniform(k2b, (C2,), jnp.float32, -bound, bound)

    out2 = jax.block_until_ready(dwconv(x2, w2, b2, band_rows=8))
    ref2 = _reference_dwconv(x2, w2, b2)
    assert jnp.allclose(out2, ref2, atol=1e-5, rtol=1e-5), "mismatch (test 2)"

    # --- Test 3: tall band -> exercises the non-unrolled fori_loop row path --
    k3x, k3w, k3b = jax.random.split(jax.random.PRNGKey(2), 3)
    N3, C3, H3, W3 = 1, 4, 128, 8
    x3 = jax.random.normal(k3x, (N3, C3, H3, W3), dtype=jnp.float32)
    w3 = jax.random.uniform(k3w, (C3, 1, 3, 3), jnp.float32, -bound, bound)
    b3 = jax.random.uniform(k3b, (C3,), jnp.float32, -bound, bound)

    out3 = jax.block_until_ready(dwconv(x3, w3, b3))
    ref3 = _reference_dwconv(x3, w3, b3)
    assert jnp.allclose(out3, ref3, atol=1e-5, rtol=1e-5), "mismatch (test 3)"

    print("KERNEL_OK")
</pallas_src>

<mosaic_0001>
module attributes {stable_mosaic.version = 11 : i64} {
  func.func @_dwconv_kernel(%arg0: i32, %arg1: i32, %arg2: i32, %arg3: memref<2x16x16x4xf32, #tpu.memory_space<vmem>>, %arg4: memref<2x1x16x4xf32, #tpu.memory_space<vmem>>, %arg5: memref<2x1x16x4xf32, #tpu.memory_space<vmem>>, %arg6: memref<3x3x4xf32, #tpu.memory_space<vmem>>, %arg7: memref<1x1x4xf32, #tpu.memory_space<vmem>>, %arg8: memref<2x16x16x4xf32, #tpu.memory_space<vmem>>) attributes {dimension_semantics = [#tpu.dimension_semantics<parallel>, #tpu.dimension_semantics<parallel>, #tpu.dimension_semantics<parallel>], iteration_bounds = array<i64: 1, 1, 1>, scalar_prefetch = 0 : i64, scratch_operands = 0 : i64, tpu.core_type = #tpu.core_type<tc>, window_params = [{transform_indices = @transform_0, window_bounds = array<i64: 2, 16, 16, 4>}, {transform_indices = @transform_1, window_bounds = array<i64: 2, 1, 16, 4>}, {transform_indices = @transform_2, window_bounds = array<i64: 2, 1, 16, 4>}, {transform_indices = @transform_3, window_bounds = array<i64: 3, 3, 4>}, {transform_indices = @transform_4, window_bounds = array<i64: 1, 1, 4>}, {transform_indices = @transform_5, window_bounds = array<i64: 2, 16, 16, 4>}]} {
    %c0 = arith.constant 0 : index
    %c0_0 = arith.constant 0 : index
    %c0_1 = arith.constant 0 : index
    %0 = vector.load %arg6[%c0, %c0_0, %c0_1] : memref<3x3x4xf32, #tpu.memory_space<vmem>>, vector<3x3x4xf32>
    %1 = vector.extract_strided_slice %0 {offsets = [0, 0, 0], sizes = [1, 1, 4], strides = [1, 1, 1]} : vector<3x3x4xf32> to vector<1x1x4xf32>
    %2 = vector.shape_cast %1 : vector<1x1x4xf32> to vector<4xf32>
    %3 = vector.shape_cast %2 : vector<4xf32> to vector<1x4xf32>
    %4 = vector.broadcast %3 : vector<1x4xf32> to vector<16x4xf32>
    %5 = vector.extract_strided_slice %0 {offsets = [0, 1, 0], sizes = [1, 1, 4], strides = [1, 1, 1]} : vector<3x3x4xf32> to vector<1x1x4xf32>
    %6 = vector.shape_cast %5 : vector<1x1x4xf32> to vector<4xf32>
    %7 = vector.shape_cast %6 : vector<4xf32> to vector<1x4xf32>
    %8 = vector.broadcast %7 : vector<1x4xf32> to vector<16x4xf32>
    %9 = vector.extract_strided_slice %0 {offsets = [0, 2, 0], sizes = [1, 1, 4], strides = [1, 1, 1]} : vector<3x3x4xf32> to vector<1x1x4xf32>
    %10 = vector.shape_cast %9 : vector<1x1x4xf32> to vector<4xf32>
    %11 = vector.shape_cast %10 : vector<4xf32> to vector<1x4xf32>
    %12 = vector.broadcast %11 : vector<1x4xf32> to vector<16x4xf32>
    %13 = vector.extract_strided_slice %0 {offsets = [1, 0, 0], sizes = [1, 1, 4], strides = [1, 1, 1]} : vector<3x3x4xf32> to vector<1x1x4xf32>
    %14 = vector.shape_cast %13 : vector<1x1x4xf32> to vector<4xf32>
    %15 = vector.shape_cast %14 : vector<4xf32> to vector<1x4xf32>
    %16 = vector.broadcast %15 : vector<1x4xf32> to vector<16x4xf32>
    %17 = vector.extract_strided_slice %0 {offsets = [1, 1, 0], sizes = [1, 1, 4], strides = [1, 1, 1]} : vector<3x3x4xf32> to vector<1x1x4xf32>
    %18 = vector.shape_cast %17 : vector<1x1x4xf32> to vector<4xf32>
    %19 = vector.shape_cast %18 : vector<4xf32> to vector<1x4xf32>
    %20 = vector.broadcast %19 : vector<1x4xf32> to vector<16x4xf32>
    %21 = vector.extract_strided_slice %0 {offsets = [1, 2, 0], sizes = [1, 1, 4], strides = [1, 1, 1]} : vector<3x3x4xf32> to vector<1x1x4xf32>
    %22 = vector.shape_cast %21 : vector<1x1x4xf32> to vector<4xf32>
    %23 = vector.shape_cast %22 : vector<4xf32> to vector<1x4xf32>
    %24 = vector.broadcast %23 : vector<1x4xf32> to vector<16x4xf32>
    %25 = vector.extract_strided_slice %0 {offsets = [2, 0, 0], sizes = [1, 1, 4], strides = [1, 1, 1]} : vector<3x3x4xf32> to vector<1x1x4xf32>
    %26 = vector.shape_cast %25 : vector<1x1x4xf32> to vector<4xf32>
    %27 = vector.shape_cast %26 : vector<4xf32> to vector<1x4xf32>
    %28 = vector.broadcast %27 : vector<1x4xf32> to vector<16x4xf32>
    %29 = vector.extract_strided_slice %0 {offsets = [2, 1, 0], sizes = [1, 1, 4], strides = [1, 1, 1]} : vector<3x3x4xf32> to vector<1x1x4xf32>
    %30 = vector.shape_cast %29 : vector<1x1x4xf32> to vector<4xf32>
    %31 = vector.shape_cast %30 : vector<4xf32> to vector<1x4xf32>
    %32 = vector.broadcast %31 : vector<1x4xf32> to vector<16x4xf32>
    %33 = vector.extract_strided_slice %0 {offsets = [2, 2, 0], sizes = [1, 1, 4], strides = [1, 1, 1]} : vector<3x3x4xf32> to vector<1x1x4xf32>
    %34 = vector.shape_cast %33 : vector<1x1x4xf32> to vector<4xf32>
    %35 = vector.shape_cast %34 : vector<4xf32> to vector<1x4xf32>
    %36 = vector.broadcast %35 : vector<1x4xf32> to vector<16x4xf32>
    %c0_2 = arith.constant 0 : index
    %c0_3 = arith.constant 0 : index
    %c0_4 = arith.constant 0 : index
    %37 = vector.load %arg7[%c0_2, %c0_3, %c0_4] : memref<1x1x4xf32, #tpu.memory_space<vmem>>, vector<1x1x4xf32>
    %38 = vector.shape_cast %37 : vector<1x1x4xf32> to vector<4xf32>
    %39 = vector.shape_cast %38 : vector<4xf32> to vector<1x4xf32>
    %40 = vector.broadcast %39 : vector<1x4xf32> to vector<16x4xf32>
    %cst = arith.constant 0.000000e+00 : f32
    %41 = vector.broadcast %cst : f32 to vector<1x4xf32>
    %c0_i32 = arith.constant 0 : i32
    %42 = arith.cmpi eq, %arg2, %c0_i32 : i32
    %c0_i32_5 = arith.constant 0 : i32
    %43 = arith.cmpi eq, %arg2, %c0_i32_5 : i32
    %c0_6 = arith.constant 0 : index
    %c0_7 = arith.constant 0 : index
    %c0_8 = arith.constant 0 : index
    %c0_9 = arith.constant 0 : index
    %44 = vector.load %arg4[%c0_6, %c0_7, %c0_8, %c0_9] : memref<2x1x16x4xf32, #tpu.memory_space<vmem>>, vector<1x1x16x4xf32>
    %45 = vector.shape_cast %44 : vector<1x1x16x4xf32> to vector<16x4xf32>
    %c0_10 = arith.constant 0 : index
    %c0_11 = arith.constant 0 : index
    %c0_12 = arith.constant 0 : index
    %c0_13 = arith.constant 0 : index
    %46 = vector.load %arg5[%c0_10, %c0_11, %c0_12, %c0_13] : memref<2x1x16x4xf32, #tpu.memory_space<vmem>>, vector<1x1x16x4xf32>
    %47 = vector.shape_cast %46 : vector<1x1x16x4xf32> to vector<16x4xf32>
    %cst_14 = arith.constant 0.000000e+00 : f32
    %48 = vector.broadcast %cst_14 : f32 to vector<16x4xf32>
    %49 = arith.select %42, %48, %45 : vector<16x4xf32>
    %cst_15 = arith.constant 0.000000e+00 : f32
    %50 = vector.broadcast %cst_15 : f32 to vector<16x4xf32>
    %51 = arith.select %43, %50, %47 : vector<16x4xf32>
    %c0_16 = arith.constant 0 : index
    %c0_17 = arith.constant 0 : index
    %c0_18 = arith.constant 0 : index
    %c0_19 = arith.constant 0 : index
    %52 = vector.load %arg3[%c0_16, %c0_17, %c0_18, %c0_19] : memref<2x16x16x4xf32, #tpu.memory_space<vmem>>, vector<1x1x16x4xf32>
    %53 = vector.shape_cast %52 : vector<1x1x16x4xf32> to vector<16x4xf32>
    %c0_20 = arith.constant 0 : index
    %c1 = arith.constant 1 : index
    %c0_21 = arith.constant 0 : index
    %c0_22 = arith.constant 0 : index
    %54 = vector.load %arg3[%c0_20, %c1, %c0_21, %c0_22] : memref<2x16x16x4xf32, #tpu.memory_space<vmem>>, vector<1x1x16x4xf32>
    %55 = vector.shape_cast %54 : vector<1x1x16x4xf32> to vector<16x4xf32>
    %56 = arith.mulf %49, %4 : vector<16x4xf32>
    %57 = arith.mulf %53, %16 : vector<16x4xf32>
    %58 = arith.addf %56, %57 : vector<16x4xf32>
    %59 = arith.mulf %55, %28 : vector<16x4xf32>
    %60 = arith.addf %58, %59 : vector<16x4xf32>
    %61 = arith.mulf %49, %8 : vector<16x4xf32>
    %62 = arith.mulf %53, %20 : vector<16x4xf32>
    %63 = arith.addf %61, %62 : vector<16x4xf32>
    %64 = arith.mulf %55, %32 : vector<16x4xf32>
    %65 = arith.addf %63, %64 : vector<16x4xf32>
    %66 = arith.mulf %49, %12 : vector<16x4xf32>
    %67 = arith.mulf %53, %24 : vector<16x4xf32>
    %68 = arith.addf %66, %67 : vector<16x4xf32>
    %69 = arith.mulf %55, %36 : vector<16x4xf32>
    %70 = arith.addf %68, %69 : vector<16x4xf32>
    %71 = arith.addf %40, %65 : vector<16x4xf32>
    %72 = vector.extract_strided_slice %60 {offsets = [0, 0], sizes = [15, 4], strides = [1, 1]} : vector<16x4xf32> to vector<15x4xf32>
    %73 = tpu.concatenate %41, %72 in 0 : vector<1x4xf32>, vector<15x4xf32> -> vector<16x4xf32>
    %74 = arith.addf %71, %73 : vector<16x4xf32>
    %75 = vector.extract_strided_slice %70 {offsets = [1, 0], sizes = [15, 4], strides = [1, 1]} : vector<16x4xf32> to vector<15x4xf32>
    %76 = tpu.concatenate %75, %41 in 0 : vector<15x4xf32>, vector<1x4xf32> -> vector<16x4xf32>
    %77 = arith.addf %74, %76 : vector<16x4xf32>
    %c0_23 = arith.constant 0 : index
    %c0_24 = arith.constant 0 : index
    %c0_25 = arith.constant 0 : index
    %c0_26 = arith.constant 0 : index
    %78 = vector.load %arg8[%c0_23, %c0_24, %c0_25, %c0_26] : memref<2x16x16x4xf32, #tpu.memory_space<vmem>>, vector<1x1x16x4xf32>
    %79 = vector.shape_cast %78 : vector<1x1x16x4xf32> to vector<16x4xf32>
    %80 = vector.shape_cast %77 : vector<16x4xf32> to vector<1x1x16x4xf32>
    tpu.vector_store %arg8[%c0_23, %c0_24, %c0_25, %c0_26], %80 {strides = array<i32>} : memref<2x16x16x4xf32, #tpu.memory_space<vmem>>, vector<1x1x16x4xf32>,
    %c0_27 = arith.constant 0 : index
    %c0_28 = arith.constant 0 : index
    %c0_29 = arith.constant 0 : index
    %c0_30 = arith.constant 0 : index
    %81 = vector.load %arg3[%c0_27, %c0_28, %c0_29, %c0_30] : memref<2x16x16x4xf32, #tpu.memory_space<vmem>>, vector<1x1x16x4xf32>
    %82 = vector.shape_cast %81 : vector<1x1x16x4xf32> to vector<16x4xf32>
    %c0_31 = arith.constant 0 : index
    %c1_32 = arith.constant 1 : index
    %c0_33 = arith.constant 0 : index
    %c0_34 = arith.constant 0 : index
    %83 = vector.load %arg3[%c0_31, %c1_32, %c0_33, %c0_34] : memref<2x16x16x4xf32, #tpu.memory_space<vmem>>, vector<1x1x16x4xf32>
    %84 = vector.shape_cast %83 : vector<1x1x16x4xf32> to vector<16x4xf32>
    %c0_35 = arith.constant 0 : index
    %c2 = arith.constant 2 : index
    %c0_36 = arith.constant 0 : index
    %c0_37 = arith.constant 0 : index
    %85 = vector.load %arg3[%c0_35, %c2, %c0_36, %c0_37] : memref<2x16x16x4xf32, #tpu.memory_space<vmem>>, vector<1x1x16x4xf32>
    %86 = vector.shape_cast %85 : vector<1x1x16x4xf32> to vector<16x4xf32>
    %87 = arith.mulf %82, %4 : vector<16x4xf32>
    %88 = arith.mulf %84, %16 : vector<16x4xf32>
    %89 = arith.addf %87, %88 : vector<16x4xf32>
    %90 = arith.mulf %86, %28 : vector<16x4xf32>
    %91 = arith.addf %89, %90 : vector<16x4xf32>
    %92 = arith.mulf %82, %8 : vector<16x4xf32>
    %93 = arith.mulf %84, %20 : vector<16x4xf32>
    %94 = arith.addf %92, %93 : vector<16x4xf32>
    %95 = arith.mulf %86, %32 : vector<16x4xf32>
    %96 = arith.addf %94, %95 : vector<16x4xf32>
    %97 = arith.mulf %82, %12 : vector<16x4xf32>
    %98 = arith.mulf %84, %24 : vector<16x4xf32>
    %99 = arith.addf %97, %98 : vector<16x4xf32>
    %100 = arith.mulf %86, %36 : vector<16x4xf32>
    %101 = arith.addf %99, %100 : vector<16x4xf32>
    %102 = arith.addf %40, %96 : vector<16x4xf32>
    %103 = vector.extract_strided_slice %91 {offsets = [0, 0], sizes = [15, 4], strides = [1, 1]} : vector<16x4xf32> to vector<15x4xf32>
    %104 = tpu.concatenate %41, %103 in 0 : vector<1x4xf32>, vector<15x4xf32> -> vector<16x4xf32>
    %105 = arith.addf %102, %104 : vector<16x4xf32>
    %106 = vector.extract_strided_slice %101 {offsets = [1, 0], sizes = [15, 4], strides = [1, 1]} : vector<16x4xf32> to vector<15x4xf32>
    %107 = tpu.concatenate %106, %41 in 0 : vector<15x4xf32>, vector<1x4xf32> -> vector<16x4xf32>
    %108 = arith.addf %105, %107 : vector<16x4xf32>
    %c0_38 = arith.constant 0 : index
    %c1_39 = arith.constant 1 : index
    %c0_40 = arith.constant 0 : index
    %c0_41 = arith.constant 0 : index
    %109 = vector.load %arg8[%c0_38, %c1_39, %c0_40, %c0_41] : memref<2x16x16x4xf32, #tpu.memory_space<vmem>>, vector<1x1x16x4xf32>
    %110 = vector.shape_cast %109 : vector<1x1x16x4xf32> to vector<16x4xf32>
    %111 = vector.shape_cast %108 : vector<16x4xf32> to vector<1x1x16x4xf32>
    tpu.vector_store %arg8[%c0_38, %c1_39, %c0_40, %c0_41], %111 {strides = array<i32>} : memref<2x16x16x4xf32, #tpu.memory_space<vmem>>, vector<1x1x16x4xf32>,
    %c0_42 = arith.constant 0 : index
    %c1_43 = arith.constant 1 : index
    %c0_44 = arith.constant 0 : index
    %c0_45 = arith.constant 0 : index
    %112 = vector.load %arg3[%c0_42, %c1_43, %c0_44, %c0_45] : memref<2x16x16x4xf32, #tpu.memory_space<vmem>>, vector<1x1x16x4xf32>
    %113 = vector.shape_cast %112 : vector<1x1x16x4xf32> to vector<16x4xf32>
    %c0_46 = arith.constant 0 : index
    %c2_47 = arith.constant 2 : index
    %c0_48 = arith.constant 0 : index
    %c0_49 = arith.constant 0 : index
    %114 = vector.load %arg3[%c0_46, %c2_47, %c0_48, %c0_49] : memref<2x16x16x4xf32, #tpu.memory_space<vmem>>, vector<1x1x16x4xf32>
    %115 = vector.shape_cast %114 : vector<1x1x16x4xf32> to vector<16x4xf32>
    %c0_50 = arith.constant 0 : index
    %c3 = arith.constant 3 : index
    %c0_51 = arith.constant 0 : index
    %c0_52 = arith.constant 0 : index
    %116 = vector.load %arg3[%c0_50, %c3, %c0_51, %c0_52] : memref<2x16x16x4xf32, #tpu.memory_space<vmem>>, vector<1x1x16x4xf32>
    %117 = vector.shape_cast %116 : vector<1x1x16x4xf32> to vector<16x4xf32>
    %118 = arith.mulf %113, %4 : vector<16x4xf32>
    %119 = arith.mulf %115, %16 : vector<16x4xf32>
    %120 = arith.addf %118, %119 : vector<16x4xf32>
    %121 = arith.mulf %117, %28 : vector<16x4xf32>
    %122 = arith.addf %120, %121 : vector<16x4xf32>
    %123 = arith.mulf %113, %8 : vector<16x4xf32>
    %124 = arith.mulf %115, %20 : vector<16x4xf32>
    %125 = arith.addf %123, %124 : vector<16x4xf32>
    %126 = arith.mulf %117, %32 : vector<16x4xf32>
    %127 = arith.addf %125, %126 : vector<16x4xf32>
    %128 = arith.mulf %113, %12 : vector<16x4xf32>
    %129 = arith.mulf %115, %24 : vector<16x4xf32>
    %130 = arith.addf %128, %129 : vector<16x4xf32>
    %131 = arith.mulf %117, %36 : vector<16x4xf32>
    %132 = arith.addf %130, %131 : vector<16x4xf32>
    %133 = arith.addf %40, %127 : vector<16x4xf32>
    %134 = vector.extract_strided_slice %122 {offsets = [0, 0], sizes = [15, 4], strides = [1, 1]} : vector<16x4xf32> to vector<15x4xf32>
    %135 = tpu.concatenate %41, %134 in 0 : vector<1x4xf32>, vector<15x4xf32> -> vector<16x4xf32>
    %136 = arith.addf %133, %135 : vector<16x4xf32>
    %137 = vector.extract_strided_slice %132 {offsets = [1, 0], sizes = [15, 4], strides = [1, 1]} : vector<16x4xf32> to vector<15x4xf32>
    %138 = tpu.concatenate %137, %41 in 0 : vector<15x4xf32>, vector<1x4xf32> -> vector<16x4xf32>
    %139 = arith.addf %136, %138 : vector<16x4xf32>
    %c0_53 = arith.constant 0 : index
    %c2_54 = arith.constant 2 : index
    %c0_55 = arith.constant 0 : index
    %c0_56 = arith.constant 0 : index
    %140 = vector.load %arg8[%c0_53, %c2_54, %c0_55, %c0_56] : memref<2x16x16x4xf32, #tpu.memory_space<vmem>>, vector<1x1x16x4xf32>
    %141 = vector.shape_cast %140 : vector<1x1x16x4xf32> to vector<16x4xf32>
    %142 = vector.shape_cast %139 : vector<16x4xf32> to vector<1x1x16x4xf32>
    tpu.vector_store %arg8[%c0_53, %c2_54, %c0_55, %c0_56], %142 {strides = array<i32>} : memref<2x16x16x4xf32, #tpu.memory_space<vmem>>, vector<1x1x16x4xf32>,
    %c0_57 = arith.constant 0 : index
    %c2_58 = arith.constant 2 : index
    %c0_59 = arith.constant 0 : index
    %c0_60 = arith.constant 0 : index
    %143 = vector.load %arg3[%c0_57, %c2_58, %c0_59, %c0_60] : memref<2x16x16x4xf32, #tpu.memory_space<vmem>>, vector<1x1x16x4xf32>
    %144 = vector.shape_cast %143 : vector<1x1x16x4xf32> to vector<16x4xf32>
    %c0_61 = arith.constant 0 : index
    %c3_62 = arith.constant 3 : index
    %c0_63 = arith.constant 0 : index
    %c0_64 = arith.constant 0 : index
    %145 = vector.load %arg3[%c0_61, %c3_62, %c0_63, %c0_64] : memref<2x16x16x4xf32, #tpu.memory_space<vmem>>, vector<1x1x16x4xf32>
    %146 = vector.shape_cast %145 : vector<1x1x16x4xf32> to vector<16x4xf32>
    %c0_65 = arith.constant 0 : index
    %c4 = arith.constant 4 : index
    %c0_66 = arith.constant 0 : index
    %c0_67 = arith.constant 0 : index
    %147 = vector.load %arg3[%c0_65, %c4, %c0_66, %c0_67] : memref<2x16x16x4xf32, #tpu.memory_space<vmem>>, vector<1x1x16x4xf32>
    %148 = vector.shape_cast %147 : vector<1x1x16x4xf32> to vector<16x4xf32>
    %149 = arith.mulf %144, %4 : vector<16x4xf32>
    %150 = arith.mulf %146, %16 : vector<16x4xf32>
    %151 = arith.addf %149, %150 : vector<16x4xf32>
    %152 = arith.mulf %148, %28 : vector<16x4xf32>
    %153 = arith.addf %151, %152 : vector<16x4xf32>
    %154 = arith.mulf %144, %8 : vector<16x4xf32>
    %155 = arith.mulf %146, %20 : vector<16x4xf32>
    %156 = arith.addf %154, %155 : vector<16x4xf32>
    %157 = arith.mulf %148, %32 : vector<16x4xf32>
    %158 = arith.addf %156, %157 : vector<16x4xf32>
    %159 = arith.mulf %144, %12 : vector<16x4xf32>
    %160 = arith.mulf %146, %24 : vector<16x4xf32>
    %161 = arith.addf %159, %160 : vector<16x4xf32>
    %162 = arith.mulf %148, %36 : vector<16x4xf32>
    %163 = arith.addf %161, %162 : vector<16x4xf32>
    %164 = arith.addf %40, %158 : vector<16x4xf32>
    %165 = vector.extract_strided_slice %153 {offsets = [0, 0], sizes = [15, 4], strides = [1, 1]} : vector<16x4xf32> to vector<15x4xf32>
    %166 = tpu.concatenate %41, %165 in 0 : vector<1x4xf32>, vector<15x4xf32> -> vector<16x4xf32>
    %167 = arith.addf %164, %166 : vector<16x4xf32>
    %168 = vector.extract_strided_slice %163 {offsets = [1, 0], sizes = [15, 4], strides = [1, 1]} : vector<16x4xf32> to vector<15x4xf32>
    %169 = tpu.concatenate %168, %41 in 0 : vector<15x4xf32>, vector<1x4xf32> -> vector<16x4xf32>
    %170 = arith.addf %167, %169 : vector<16x4xf32>
    %c0_68 = arith.constant 0 : index
    %c3_69 = arith.constant 3 : index
    %c0_70 = arith.constant 0 : index
    %c0_71 = arith.constant 0 : index
    %171 = vector.load %arg8[%c0_68, %c3_69, %c0_70, %c0_71] : memref<2x16x16x4xf32, #tpu.memory_space<vmem>>, vector<1x1x16x4xf32>
    %172 = vector.shape_cast %171 : vector<1x1x16x4xf32> to vector<16x4xf32>
    %173 = vector.shape_cast %170 : vector<16x4xf32> to vector<1x1x16x4xf32>
    tpu.vector_store %arg8[%c0_68, %c3_69, %c0_70, %c0_71], %173 {strides = array<i32>} : memref<2x16x16x4xf32, #tpu.memory_space<vmem>>, vector<1x1x16x4xf32>,
    %c0_72 = arith.constant 0 : index
    %c3_73 = arith.constant 3 : index
    %c0_74 = arith.constant 0 : index
    %c0_75 = arith.constant 0 : index
    %174 = vector.load %arg3[%c0_72, %c3_73, %c0_74, %c0_75] : memref<2x16x16x4xf32, #tpu.memory_space<vmem>>, vector<1x1x16x4xf32>
    %175 = vector.shape_cast %174 : vector<1x1x16x4xf32> to vector<16x4xf32>
    %c0_76 = arith.constant 0 : index
    %c4_77 = arith.constant 4 : index
    %c0_78 = arith.constant 0 : index
    %c0_79 = arith.constant 0 : index
    %176 = vector.load %arg3[%c0_76, %c4_77, %c0_78, %c0_79] : memref<2x16x16x4xf32, #tpu.memory_space<vmem>>, vector<1x1x16x4xf32>
    %177 = vector.shape_cast %176 : vector<1x1x16x4xf32> to vector<16x4xf32>
    %c0_80 = arith.constant 0 : index
    %c5 = arith.constant 5 : index
    %c0_81 = arith.constant 0 : index
    %c0_82 = arith.constant 0 : index
    %178 = vector.load %arg3[%c0_80, %c5, %c0_81, %c0_82] : memref<2x16x16x4xf32, #tpu.memory_space<vmem>>, vector<1x1x16x4xf32>
    %179 = vector.shape_cast %178 : vector<1x1x16x4xf32> to vector<16x4xf32>
    %180 = arith.mulf %175, %4 : vector<16x4xf32>
    %181 = arith.mulf %177, %16 : vector<16x4xf32>
    %182 = arith.addf %180, %181 : vector<16x4xf32>
    %183 = arith.mulf %179, %28 : vector<16x4xf32>
    %184 = arith.addf %182, %183 : vector<16x4xf32>
    %185 = arith.mulf %175, %8 : vector<16x4xf32>
    %186 = arith.mulf %177, %20 : vector<16x4xf32>
    %187 = arith.addf %185, %186 : vector<16x4xf32>
    %188 = arith.mulf %179, %32 : vector<16x4xf32>
    %189 = arith.addf %187, %188 : vector<16x4xf32>
    %190 = arith.mulf %175, %12 : vector<16x4xf32>
    %191 = arith.mulf %177, %24 : vector<16x4xf32>
    %192 = arith.addf %190, %191 : vector<16x4xf32>
    %193 = arith.mulf %179, %36 : vector<16x4xf32>
    %194 = arith.addf %192, %193 : vector<16x4xf32>
    %195 = arith.addf %40, %189 : vector<16x4xf32>
    %196 = vector.extract_strided_slice %184 {offsets = [0, 0], sizes = [15, 4], strides = [1, 1]} : vector<16x4xf32> to vector<15x4xf32>
    %197 = tpu.concatenate %41, %196 in 0 : vector<1x4xf32>, vector<15x4xf32> -> vector<16x4xf32>
    %198 = arith.addf %195, %197 : vector<16x4xf32>
    %199 = vector.extract_strided_slice %194 {offsets = [1, 0], sizes = [15, 4], strides = [1, 1]} : vector<16x4xf32> to vector<15x4xf32>
    %200 = tpu.concatenate %199, %41 in 0 : vector<15x4xf32>, vector<1x4xf32> -> vector<16x4xf32>
    %201 = arith.addf %198, %200 : vector<16x4xf32>
    %c0_83 = arith.constant 0 : index
    %c4_84 = arith.constant 4 : index
    %c0_85 = arith.constant 0 : index
    %c0_86 = arith.constant 0 : index
    %202 = vector.load %arg8[%c0_83, %c4_84, %c0_85, %c0_86] : memref<2x16x16x4xf32, #tpu.memory_space<vmem>>, vector<1x1x16x4xf32>
    %203 = vector.shape_cast %202 : vector<1x1x16x4xf32> to vector<16x4xf32>
    %204 = vector.shape_cast %201 : vector<16x4xf32> to vector<1x1x16x4xf32>
    tpu.vector_store %arg8[%c0_83, %c4_84, %c0_85, %c0_86], %204 {strides = array<i32>} : memref<2x16x16x4xf32, #tpu.memory_space<vmem>>, vector<1x1x16x4xf32>,
    %c0_87 = arith.constant 0 : index
    %c4_88 = arith.constant 4 : index
    %c0_89 = arith.constant 0 : index
    %c0_90 = arith.constant 0 : index
    %205 = vector.load %arg3[%c0_87, %c4_88, %c0_89, %c0_90] : memref<2x16x16x4xf32, #tpu.memory_space<vmem>>, vector<1x1x16x4xf32>
    %206 = vector.shape_cast %205 : vector<1x1x16x4xf32> to vector<16x4xf32>
    %c0_91 = arith.constant 0 : index
    %c5_92 = arith.constant 5 : index
    %c0_93 = arith.constant 0 : index
    %c0_94 = arith.constant 0 : index
    %207 = vector.load %arg3[%c0_91, %c5_92, %c0_93, %c0_94] : memref<2x16x16x4xf32, #tpu.memory_space<vmem>>, vector<1x1x16x4xf32>
    %208 = vector.shape_cast %207 : vector<1x1x16x4xf32> to vector<16x4xf32>
    %c0_95 = arith.constant 0 : index
    %c6 = arith.constant 6 : index
    %c0_96 = arith.constant 0 : index
    %c0_97 = arith.constant 0 : index
    %209 = vector.load %arg3[%c0_95, %c6, %c0_96, %c0_97] : memref<2x16x16x4xf32, #tpu.memory_space<vmem>>, vector<1x1x16x4xf32>
    %210 = vector.shape_cast %209 : vector<1x1x16x4xf32> to vector<16x4xf32>
    %211 = arith.mulf %206, %4 : vector<16x4xf32>
    %212 = arith.mulf %208, %16 : vector<16x4xf32>
    %213 = arith.addf %211, %212 : vector<16x4xf32>
    %214 = arith.mulf %210, %28 : vector<16x4xf32>
    %215 = arith.addf %213, %214 : vector<16x4xf32>
    %216 = arith.mulf %206, %8 : vector<16x4xf32>
    %217 = arith.mulf %208, %20 : vector<16x4xf32>
    %218 = arith.addf %216, %217 : vector<16x4xf32>
    %219 = arith.mulf %210, %32 : vector<16x4xf32>
    %220 = arith.addf %218, %219 : vector<16x4xf32>
    %221 = arith.mulf %206, %12 : vector<16x4xf32>
    %222 = arith.mulf %208, %24 : vector<16x4xf32>
    %223 = arith.addf %221, %222 : vector<16x4xf32>
    %224 = arith.mulf %210, %36 : vector<16x4xf32>
    %225 = arith.addf %223, %224 : vector<16x4xf32>
    %226 = arith.addf %40, %220 : vector<16x4xf32>
    %227 = vector.extract_strided_slice %215 {offsets = [0, 0], sizes = [15, 4], strides = [1, 1]} : vector<16x4xf32> to vector<15x4xf32>
    %228 = tpu.concatenate %41, %227 in 0 : vector<1x4xf32>, vector<15x4xf32> -> vector<16x4xf32>
    %229 = arith.addf %226, %228 : vector<16x4xf32>
    %230 = vector.extract_strided_slice %225 {offsets = [1, 0], sizes = [15, 4], strides = [1, 1]} : vector<16x4xf32> to vector<15x4xf32>
    %231 = tpu.concatenate %230, %41 in 0 : vector<15x4xf32>, vector<1x4xf32> -> vector<16x4xf32>
    %232 = arith.addf %229, %231 : vector<16x4xf32>
    %c0_98 = arith.constant 0 : index
    %c5_99 = arith.constant 5 : index
    %c0_100 = arith.constant 0 : index
    %c0_101 = arith.constant 0 : index
    %233 = vector.load %arg8[%c0_98, %c5_99, %c0_100, %c0_101] : memref<2x16x16x4xf32, #tpu.memory_space<vmem>>, vector<1x1x16x4xf32>
    %234 = vector.shape_cast %233 : vector<1x1x16x4xf32> to vector<16x4xf32>
    %235 = vector.shape_cast %232 : vector<16x4xf32> to vector<1x1x16x4xf32>
    tpu.vector_store %arg8[%c0_98, %c5_99, %c0_100, %c0_101], %235 {strides = array<i32>} : memref<2x16x16x4xf32, #tpu.memory_space<vmem>>, vector<1x1x16x4xf32>,
    %c0_102 = arith.constant 0 : index
    %c5_103 = arith.constant 5 : index
    %c0_104 = arith.constant 0 : index
    %c0_105 = arith.constant 0 : index
    %236 = vector.load %arg3[%c0_102, %c5_103, %c0_104, %c0_105] : memref<2x16x16x4xf32, #tpu.memory_space<vmem>>, vector<1x1x16x4xf32>
    %237 = vector.shape_cast %236 : vector<1x1x16x4xf32> to vector<16x4xf32>
    %c0_106 = arith.constant 0 : index
    %c6_107 = arith.constant 6 : index
    %c0_108 = arith.constant 0 : index
    %c0_109 = arith.constant 0 : index
    %238 = vector.load %arg3[%c0_106, %c6_107, %c0_108, %c0_109] : memref<2x16x16x4xf32, #tpu.memory_space<vmem>>, vector<1x1x16x4xf32>
    %239 = vector.shape_cast %238 : vector<1x1x16x4xf32> to vector<16x4xf32>
    %c0_110 = arith.constant 0 : index
    %c7 = arith.constant 7 : index
    %c0_111 = arith.constant 0 : index
    %c0_112 = arith.constant 0 : index
    %240 = vector.load %arg3[%c0_110, %c7, %c0_111, %c0_112] : memref<2x16x16x4xf32, #tpu.memory_space<vmem>>, vector<1x1x16x4xf32>
    %241 = vector.shape_cast %240 : vector<1x1x16x4xf32> to vector<16x4xf32>
    %242 = arith.mulf %237, %4 : vector<16x4xf32>
    %243 = arith.mulf %239, %16 : vector<16x4xf32>
    %244 = arith.addf %242, %243 : vector<16x4xf32>
    %245 = arith.mulf %241, %28 : vector<16x4xf32>
    %246 = arith.addf %244, %245 : vector<16x4xf32>
    %247 = arith.mulf %237, %8 : vector<16x4xf32>
    %248 = arith.mulf %239, %20 : vector<16x4xf32>
    %249 = arith.addf %247, %248 : vector<16x4xf32>
    %250 = arith.mulf %241, %32 : vector<16x4xf32>
    %251 = arith.addf %249, %250 : vector<16x4xf32>
    %252 = arith.mulf %237, %12 : vector<16x4xf32>
    %253 = arith.mulf %239, %24 : vector<16x4xf32>
    %254 = arith.addf %252, %253 : vector<16x4xf32>
    %255 = arith.mulf %241, %36 : vector<16x4xf32>
    %256 = arith.addf %254, %255 : vector<16x4xf32>
    %257 = arith.addf %40, %251 : vector<16x4xf32>
    %258 = vector.extract_strided_slice %246 {offsets = [0, 0], sizes = [15, 4], strides = [1, 1]} : vector<16x4xf32> to vector<15x4xf32>
    %259 = tpu.concatenate %41, %258 in 0 : vector<1x4xf32>, vector<15x4xf32> -> vector<16x4xf32>
    %260 = arith.addf %257, %259 : vector<16x4xf32>
    %261 = vector.extract_strided_slice %256 {offsets = [1, 0], sizes = [15, 4], strides = [1, 1]} : vector<16x4xf32> to vector<15x4xf32>
    %262 = tpu.concatenate %261, %41 in 0 : vector<15x4xf32>, vector<1x4xf32> -> vector<16x4xf32>
    %263 = arith.addf %260, %262 : vector<16x4xf32>
    %c0_113 = arith.constant 0 : index
    %c6_114 = arith.constant 6 : index
    %c0_115 = arith.constant 0 : index
    %c0_116 = arith.constant 0 : index
    %264 = vector.load %arg8[%c0_113, %c6_114, %c0_115, %c0_116] : memref<2x16x16x4xf32, #tpu.memory_space<vmem>>, vector<1x1x16x4xf32>
    %265 = vector.shape_cast %264 : vector<1x1x16x4xf32> to vector<16x4xf32>
    %266 = vector.shape_cast %263 : vector<16x4xf32> to vector<1x1x16x4xf32>
    tpu.vector_store %arg8[%c0_113, %c6_114, %c0_115, %c0_116], %266 {strides = array<i32>} : memref<2x16x16x4xf32, #tpu.memory_space<vmem>>, vector<1x1x16x4xf32>,
    %c0_117 = arith.constant 0 : index
    %c6_118 = arith.constant 6 : index
    %c0_119 = arith.constant 0 : index
    %c0_120 = arith.constant 0 : index
    %267 = vector.load %arg3[%c0_117, %c6_118, %c0_119, %c0_120] : memref<2x16x16x4xf32, #tpu.memory_space<vmem>>, vector<1x1x16x4xf32>
    %268 = vector.shape_cast %267 : vector<1x1x16x4xf32> to vector<16x4xf32>
    %c0_121 = arith.constant 0 : index
    %c7_122 = arith.constant 7 : index
    %c0_123 = arith.constant 0 : index
    %c0_124 = arith.constant 0 : index
    %269 = vector.load %arg3[%c0_121, %c7_122, %c0_123, %c0_124] : memref<2x16x16x4xf32, #tpu.memory_space<vmem>>, vector<1x1x16x4xf32>
    %270 = vector.shape_cast %269 : vector<1x1x16x4xf32> to vector<16x4xf32>
    %c0_125 = arith.constant 0 : index
    %c8 = arith.constant 8 : index
    %c0_126 = arith.constant 0 : index
    %c0_127 = arith.constant 0 : index
    %271 = vector.load %arg3[%c0_125, %c8, %c0_126, %c0_127] : memref<2x16x16x4xf32, #tpu.memory_space<vmem>>, vector<1x1x16x4xf32>
    %272 = vector.shape_cast %271 : vector<1x1x16x4xf32> to vector<16x4xf32>
    %273 = arith.mulf %268, %4 : vector<16x4xf32>
    %274 = arith.mulf %270, %16 : vector<16x4xf32>
    %275 = arith.addf %273, %274 : vector<16x4xf32>
    %276 = arith.mulf %272, %28 : vector<16x4xf32>
    %277 = arith.addf %275, %276 : vector<16x4xf32>
    %278 = arith.mulf %268, %8 : vector<16x4xf32>
    %279 = arith.mulf %270, %20 : vector<16x4xf32>
    %280 = arith.addf %278, %279 : vector<16x4xf32>
    %281 = arith.mulf %272, %32 : vector<16x4xf32>
    %282 = arith.addf %280, %281 : vector<16x4xf32>
    %283 = arith.mulf %268, %12 : vector<16x4xf32>
    %284 = arith.mulf %270, %24 : vector<16x4xf32>
    %285 = arith.addf %283, %284 : vector<16x4xf32>
    %286 = arith.mulf %272, %36 : vector<16x4xf32>
    %287 = arith.addf %285, %286 : vector<16x4xf32>
    %288 = arith.addf %40, %282 : vector<16x4xf32>
    %289 = vector.extract_strided_slice %277 {offsets = [0, 0], sizes = [15, 4], strides = [1, 1]} : vector<16x4xf32> to vector<15x4xf32>
    %290 = tpu.concatenate %41, %289 in 0 : vector<1x4xf32>, vector<15x4xf32> -> vector<16x4xf32>
    %291 = arith.addf %288, %290 : vector<16x4xf32>
    %292 = vector.extract_strided_slice %287 {offsets = [1, 0], sizes = [15, 4], strides = [1, 1]} : vector<16x4xf32> to vector<15x4xf32>
    %293 = tpu.concatenate %292, %41 in 0 : vector<15x4xf32>, vector<1x4xf32> -> vector<16x4xf32>
    %294 = arith.addf %291, %293 : vector<16x4xf32>
    %c0_128 = arith.constant 0 : index
    %c7_129 = arith.constant 7 : index
    %c0_130 = arith.constant 0 : index
    %c0_131 = arith.constant 0 : index
    %295 = vector.load %arg8[%c0_128, %c7_129, %c0_130, %c0_131] : memref<2x16x16x4xf32, #tpu.memory_space<vmem>>, vector<1x1x16x4xf32>
    %296 = vector.shape_cast %295 : vector<1x1x16x4xf32> to vector<16x4xf32>
    %297 = vector.shape_cast %294 : vector<16x4xf32> to vector<1x1x16x4xf32>
    tpu.vector_store %arg8[%c0_128, %c7_129, %c0_130, %c0_131], %297 {strides = array<i32>} : memref<2x16x16x4xf32, #tpu.memory_space<vmem>>, vector<1x1x16x4xf32>,
    %c0_132 = arith.constant 0 : index
    %c7_133 = arith.constant 7 : index
    %c0_134 = arith.constant 0 : index
    %c0_135 = arith.constant 0 : index
    %298 = vector.load %arg3[%c0_132, %c7_133, %c0_134, %c0_135] : memref<2x16x16x4xf32, #tpu.memory_space<vmem>>, vector<1x1x16x4xf32>
    %299 = vector.shape_cast %298 : vector<1x1x16x4xf32> to vector<16x4xf32>
    %c0_136 = arith.constant 0 : index
    %c8_137 = arith.constant 8 : index
    %c0_138 = arith.constant 0 : index
    %c0_139 = arith.constant 0 : index
    %300 = vector.load %arg3[%c0_136, %c8_137, %c0_138, %c0_139] : memref<2x16x16x4xf32, #tpu.memory_space<vmem>>, vector<1x1x16x4xf32>
    %301 = vector.shape_cast %300 : vector<1x1x16x4xf32> to vector<16x4xf32>
    %c0_140 = arith.constant 0 : index
    %c9 = arith.constant 9 : index
    %c0_141 = arith.constant 0 : index
    %c0_142 = arith.constant 0 : index
    %302 = vector.load %arg3[%c0_140, %c9, %c0_141, %c0_142] : memref<2x16x16x4xf32, #tpu.memory_space<vmem>>, vector<1x1x16x4xf32>
    %303 = vector.shape_cast %302 : vector<1x1x16x4xf32> to vector<16x4xf32>
    %304 = arith.mulf %299, %4 : vector<16x4xf32>
    %305 = arith.mulf %301, %16 : vector<16x4xf32>
    %306 = arith.addf %304, %305 : vector<16x4xf32>
    %307 = arith.mulf %303, %28 : vector<16x4xf32>
    %308 = arith.addf %306, %307 : vector<16x4xf32>
    %309 = arith.mulf %299, %8 : vector<16x4xf32>
    %310 = arith.mulf %301, %20 : vector<16x4xf32>
    %311 = arith.addf %309, %310 : vector<16x4xf32>
    %312 = arith.mulf %303, %32 : vector<16x4xf32>
    %313 = arith.addf %311, %312 : vector<16x4xf32>
    %314 = arith.mulf %299, %12 : vector<16x4xf32>
    %315 = arith.mulf %301, %24 : vector<16x4xf32>
    %316 = arith.addf %314, %315 : vector<16x4xf32>
    %317 = arith.mulf %303, %36 : vector<16x4xf32>
    %318 = arith.addf %316, %317 : vector<16x4xf32>
    %319 = arith.addf %40, %313 : vector<16x4xf32>
    %320 = vector.extract_strided_slice %308 {offsets = [0, 0], sizes = [15, 4], strides = [1, 1]} : vector<16x4xf32> to vector<15x4xf32>
    %321 = tpu.concatenate %41, %320 in 0 : vector<1x4xf32>, vector<15x4xf32> -> vector<16x4xf32>
    %322 = arith.addf %319, %321 : vector<16x4xf32>
    %323 = vector.extract_strided_slice %318 {offsets = [1, 0], sizes = [15, 4], strides = [1, 1]} : vector<16x4xf32> to vector<15x4xf32>
    %324 = tpu.concatenate %323, %41 in 0 : vector<15x4xf32>, vector<1x4xf32> -> vector<16x4xf32>
    %325 = arith.addf %322, %324 : vector<16x4xf32>
    %c0_143 = arith.constant 0 : index
    %c8_144 = arith.constant 8 : index
    %c0_145 = arith.constant 0 : index
    %c0_146 = arith.constant 0 : index
    %326 = vector.load %arg8[%c0_143, %c8_144, %c0_145, %c0_146] : memref<2x16x16x4xf32, #tpu.memory_space<vmem>>, vector<1x1x16x4xf32>
    %327 = vector.shape_cast %326 : vector<1x1x16x4xf32> to vector<16x4xf32>
    %328 = vector.shape_cast %325 : vector<16x4xf32> to vector<1x1x16x4xf32>
    tpu.vector_store %arg8[%c0_143, %c8_144, %c0_145, %c0_146], %328 {strides = array<i32>} : memref<2x16x16x4xf32, #tpu.memory_space<vmem>>, vector<1x1x16x4xf32>,
    %c0_147 = arith.constant 0 : index
    %c8_148 = arith.constant 8 : index
    %c0_149 = arith.constant 0 : index
    %c0_150 = arith.constant 0 : index
    %329 = vector.load %arg3[%c0_147, %c8_148, %c0_149, %c0_150] : memref<2x16x16x4xf32, #tpu.memory_space<vmem>>, vector<1x1x16x4xf32>
    %330 = vector.shape_cast %329 : vector<1x1x16x4xf32> to vector<16x4xf32>
    %c0_151 = arith.constant 0 : index
    %c9_152 = arith.constant 9 : index
    %c0_153 = arith.constant 0 : index
    %c0_154 = arith.constant 0 : index
    %331 = vector.load %arg3[%c0_151, %c9_152, %c0_153, %c0_154] : memref<2x16x16x4xf32, #tpu.memory_space<vmem>>, vector<1x1x16x4xf32>
    %332 = vector.shape_cast %331 : vector<1x1x16x4xf32> to vector<16x4xf32>
    %c0_155 = arith.constant 0 : index
    %c10 = arith.constant 10 : index
    %c0_156 = arith.constant 0 : index
    %c0_157 = arith.constant 0 : index
    %333 = vector.load %arg3[%c0_155, %c10, %c0_156, %c0_157] : memref<2x16x16x4xf32, #tpu.memory_space<vmem>>, vector<1x1x16x4xf32>
    %334 = vector.shape_cast %333 : vector<1x1x16x4xf32> to vector<16x4xf32>
    %335 = arith.mulf %330, %4 : vector<16x4xf32>
    %336 = arith.mulf %332, %16 : vector<16x4xf32>
    %337 = arith.addf %335, %336 : vector<16x4xf32>
    %338 = arith.mulf %334, %28 : vector<16x4xf32>
    %339 = arith.addf %337, %338 : vector<16x4xf32>
    %340 = arith.mulf %330, %8 : vector<16x4xf32>
    %341 = arith.mulf %332, %20 : vector<16x4xf32>
    %342 = arith.addf %340, %341 : vector<16x4xf32>
    %343 = arith.mulf %334, %32 : vector<16x4xf32>
    %344 = arith.addf %342, %343 : vector<16x4xf32>
    %345 = arith.mulf %330, %12 : vector<16x4xf32>
    %346 = arith.mulf %332, %24 : vector<16x4xf32>
    %347 = arith.addf %345, %346 : vector<16x4xf32>
    %348 = arith.mulf %334, %36 : vector<16x4xf32>
    %349 = arith.addf %347, %348 : vector<16x4xf32>
    %350 = arith.addf %40, %344 : vector<16x4xf32>
    %351 = vector.extract_strided_slice %339 {offsets = [0, 0], sizes = [15, 4], strides = [1, 1]} : vector<16x4xf32> to vector<15x4xf32>
    %352 = tpu.concatenate %41, %351 in 0 : vector<1x4xf32>, vector<15x4xf32> -> vector<16x4xf32>
    %353 = arith.addf %350, %352 : vector<16x4xf32>
    %354 = vector.extract_strided_slice %349 {offsets = [1, 0], sizes = [15, 4], strides = [1, 1]} : vector<16x4xf32> to vector<15x4xf32>
    %355 = tpu.concatenate %354, %41 in 0 : vector<15x4xf32>, vector<1x4xf32> -> vector<16x4xf32>
    %356 = arith.addf %353, %355 : vector<16x4xf32>
    %c0_158 = arith.constant 0 : index
    %c9_159 = arith.constant 9 : index
    %c0_160 = arith.constant 0 : index
    %c0_161 = arith.constant 0 : index
    %357 = vector.load %arg8[%c0_158, %c9_159, %c0_160, %c0_161] : memref<2x16x16x4xf32, #tpu.memory_space<vmem>>, vector<1x1x16x4xf32>
    %358 = vector.shape_cast %357 : vector<1x1x16x4xf32> to vector<16x4xf32>
    %359 = vector.shape_cast %356 : vector<16x4xf32> to vector<1x1x16x4xf32>
    tpu.vector_store %arg8[%c0_158, %c9_159, %c0_160, %c0_161], %359 {strides = array<i32>} : memref<2x16x16x4xf32, #tpu.memory_space<vmem>>, vector<1x1x16x4xf32>,
    %c0_162 = arith.constant 0 : index
    %c9_163 = arith.constant 9 : index
    %c0_164 = arith.constant 0 : index
    %c0_165 = arith.constant 0 : index
    %360 = vector.load %arg3[%c0_162, %c9_163, %c0_164, %c0_165] : memref<2x16x16x4xf32, #tpu.memory_space<vmem>>, vector<1x1x16x4xf32>
    %361 = vector.shape_cast %360 : vector<1x1x16x4xf32> to vector<16x4xf32>
    %c0_166 = arith.constant 0 : index
    %c10_167 = arith.constant 10 : index
    %c0_168 = arith.constant 0 : index
    %c0_169 = arith.constant 0 : index
    %362 = vector.load %arg3[%c0_166, %c10_167, %c0_168, %c0_169] : memref<2x16x16x4xf32, #tpu.memory_space<vmem>>, vector<1x1x16x4xf32>
    %363 = vector.shape_cast %362 : vector<1x1x16x4xf32> to vector<16x4xf32>
    %c0_170 = arith.constant 0 : index
    %c11 = arith.constant 11 : index
    %c0_171 = arith.constant 0 : index
    %c0_172 = arith.constant 0 : index
    %364 = vector.load %arg3[%c0_170, %c11, %c0_171, %c0_172] : memref<2x16x16x4xf32, #tpu.memory_space<vmem>>, vector<1x1x16x4xf32>
    %365 = vector.shape_cast %364 : vector<1x1x16x4xf32> to vector<16x4xf32>
    %366 = arith.mulf %361, %4 : vector<16x4xf32>
    %367 = arith.mulf %363, %16 : vector<16x4xf32>
    %368 = arith.addf %366, %367 : vector<16x4xf32>
    %369 = arith.mulf %365, %28 : vector<16x4xf32>
    %370 = arith.addf %368, %369 : vector<16x4xf32>
    %371 = arith.mulf %361, %8 : vector<16x4xf32>
    %372 = arith.mulf %363, %20 : vector<16x4xf32>
    %373 = arith.addf %371, %372 : vector<16x4xf32>
    %374 = arith.mulf %365, %32 : vector<16x4xf32>
    %375 = arith.addf %373, %374 : vector<16x4xf32>
    %376 = arith.mulf %361, %12 : vector<16x4xf32>
    %377 = arith.mulf %363, %24 : vector<16x4xf32>
    %378 = arith.addf %376, %377 : vector<16x4xf32>
    %379 = arith.mulf %365, %36 : vector<16x4xf32>
    %380 = arith.addf %378, %379 : vector<16x4xf32>
    %381 = arith.addf %40, %375 : vector<16x4xf32>
    %382 = vector.extract_strided_slice %370 {offsets = [0, 0], sizes = [15, 4], strides = [1, 1]} : vector<16x4xf32> to vector<15x4xf32>
    %383 = tpu.concatenate %41, %382 in 0 : vector<1x4xf32>, vector<15x4xf32> -> vector<16x4xf32>
    %384 = arith.addf %381, %383 : vector<16x4xf32>
    %385 = vector.extract_strided_slice %380 {offsets = [1, 0], sizes = [15, 4], strides = [1, 1]} : vector<16x4xf32> to vector<15x4xf32>
    %386 = tpu.concatenate %385, %41 in 0 : vector<15x4xf32>, vector<1x4xf32> -> vector<16x4xf32>
    %387 = arith.addf %384, %386 : vector<16x4xf32>
    %c0_173 = arith.constant 0 : index
    %c10_174 = arith.constant 10 : index
    %c0_175 = arith.constant 0 : index
    %c0_176 = arith.constant 0 : index
    %388 = vector.load %arg8[%c0_173, %c10_174, %c0_175, %c0_176] : memref<2x16x16x4xf32, #tpu.memory_space<vmem>>, vector<1x1x16x4xf32>
    %389 = vector.shape_cast %388 : vector<1x1x16x4xf32> to vector<16x4xf32>
    %390 = vector.shape_cast %387 : vector<16x4xf32> to vector<1x1x16x4xf32>
    tpu.vector_store %arg8[%c0_173, %c10_174, %c0_175, %c0_176], %390 {strides = array<i32>} : memref<2x16x16x4xf32, #tpu.memory_space<vmem>>, vector<1x1x16x4xf32>,
    %c0_177 = arith.constant 0 : index
    %c10_178 = arith.constant 10 : index
    %c0_179 = arith.constant 0 : index
    %c0_180 = arith.constant 0 : index
    %391 = vector.load %arg3[%c0_177, %c10_178, %c0_179, %c0_180] : memref<2x16x16x4xf32, #tpu.memory_space<vmem>>, vector<1x1x16x4xf32>
    %392 = vector.shape_cast %391 : vector<1x1x16x4xf32> to vector<16x4xf32>
    %c0_181 = arith.constant 0 : index
    %c11_182 = arith.constant 11 : index
    %c0_183 = arith.constant 0 : index
    %c0_184 = arith.constant 0 : index
    %393 = vector.load %arg3[%c0_181, %c11_182, %c0_183, %c0_184] : memref<2x16x16x4xf32, #tpu.memory_space<vmem>>, vector<1x1x16x4xf32>
    %394 = vector.shape_cast %393 : vector<1x1x16x4xf32> to vector<16x4xf32>
    %c0_185 = arith.constant 0 : index
    %c12 = arith.constant 12 : index
    %c0_186 = arith.constant 0 : index
    %c0_187 = arith.constant 0 : index
    %395 = vector.load %arg3[%c0_185, %c12, %c0_186, %c0_187] : memref<2x16x16x4xf32, #tpu.memory_space<vmem>>, vector<1x1x16x4xf32>
    %396 = vector.shape_cast %395 : vector<1x1x16x4xf32> to vector<16x4xf32>
    %397 = arith.mulf %392, %4 : vector<16x4xf32>
    %398 = arith.mulf %394, %16 : vector<16x4xf32>
    %399 = arith.addf %397, %398 : vector<16x4xf32>
    %400 = arith.mulf %396, %28 : vector<16x4xf32>
    %401 = arith.addf %399, %400 : vector<16x4xf32>
    %402 = arith.mulf %392, %8 : vector<16x4xf32>
    %403 = arith.mulf %394, %20 : vector<16x4xf32>
    %404 = arith.addf %402, %403 : vector<16x4xf32>
    %405 = arith.mulf %396, %32 : vector<16x4xf32>
    %406 = arith.addf %404, %405 : vector<16x4xf32>
    %407 = arith.mulf %392, %12 : vector<16x4xf32>
    %408 = arith.mulf %394, %24 : vector<16x4xf32>
    %409 = arith.addf %407, %408 : vector<16x4xf32>
    %410 = arith.mulf %396, %36 : vector<16x4xf32>
    %411 = arith.addf %409, %410 : vector<16x4xf32>
    %412 = arith.addf %40, %406 : vector<16x4xf32>
    %413 = vector.extract_strided_slice %401 {offsets = [0, 0], sizes = [15, 4], strides = [1, 1]} : vector<16x4xf32> to vector<15x4xf32>
    %414 = tpu.concatenate %41, %413 in 0 : vector<1x4xf32>, vector<15x4xf32> -> vector<16x4xf32>
    %415 = arith.addf %412, %414 : vector<16x4xf32>
    %416 = vector.extract_strided_slice %411 {offsets = [1, 0], sizes = [15, 4], strides = [1, 1]} : vector<16x4xf32> to vector<15x4xf32>
    %417 = tpu.concatenate %416, %41 in 0 : vector<15x4xf32>, vector<1x4xf32> -> vector<16x4xf32>
    %418 = arith.addf %415, %417 : vector<16x4xf32>
    %c0_188 = arith.constant 0 : index
    %c11_189 = arith.constant 11 : index
    %c0_190 = arith.constant 0 : index
    %c0_191 = arith.constant 0 : index
    %419 = vector.load %arg8[%c0_188, %c11_189, %c0_190, %c0_191] : memref<2x16x16x4xf32, #tpu.memory_space<vmem>>, vector<1x1x16x4xf32>
    %420 = vector.shape_cast %419 : vector<1x1x16x4xf32> to vector<16x4xf32>
    %421 = vector.shape_cast %418 : vector<16x4xf32> to vector<1x1x16x4xf32>
    tpu.vector_store %arg8[%c0_188, %c11_189, %c0_190, %c0_191], %421 {strides = array<i32>} : memref<2x16x16x4xf32, #tpu.memory_space<vmem>>, vector<1x1x16x4xf32>,
    %c0_192 = arith.constant 0 : index
    %c11_193 = arith.constant 11 : index
    %c0_194 = arith.constant 0 : index
    %c0_195 = arith.constant 0 : index
    %422 = vector.load %arg3[%c0_192, %c11_193, %c0_194, %c0_195] : memref<2x16x16x4xf32, #tpu.memory_space<vmem>>, vector<1x1x16x4xf32>
    %423 = vector.shape_cast %422 : vector<1x1x16x4xf32> to vector<16x4xf32>
    %c0_196 = arith.constant 0 : index
    %c12_197 = arith.constant 12 : index
    %c0_198 = arith.constant 0 : index
    %c0_199 = arith.constant 0 : index
    %424 = vector.load %arg3[%c0_196, %c12_197, %c0_198, %c0_199] : memref<2x16x16x4xf32, #tpu.memory_space<vmem>>, vector<1x1x16x4xf32>
    %425 = vector.shape_cast %424 : vector<1x1x16x4xf32> to vector<16x4xf32>
    %c0_200 = arith.constant 0 : index
    %c13 = arith.constant 13 : index
    %c0_201 = arith.constant 0 : index
    %c0_202 = arith.constant 0 : index
    %426 = vector.load %arg3[%c0_200, %c13, %c0_201, %c0_202] : memref<2x16x16x4xf32, #tpu.memory_space<vmem>>, vector<1x1x16x4xf32>
    %427 = vector.shape_cast %426 : vector<1x1x16x4xf32> to vector<16x4xf32>
    %428 = arith.mulf %423, %4 : vector<16x4xf32>
    %429 = arith.mulf %425, %16 : vector<16x4xf32>
    %430 = arith.addf %428, %429 : vector<16x4xf32>
    %431 = arith.mulf %427, %28 : vector<16x4xf32>
    %432 = arith.addf %430, %431 : vector<16x4xf32>
    %433 = arith.mulf %423, %8 : vector<16x4xf32>
    %434 = arith.mulf %425, %20 : vector<16x4xf32>
    %435 = arith.addf %433, %434 : vector<16x4xf32>
    %436 = arith.mulf %427, %32 : vector<16x4xf32>
    %437 = arith.addf %435, %436 : vector<16x4xf32>
    %438 = arith.mulf %423, %12 : vector<16x4xf32>
    %439 = arith.mulf %425, %24 : vector<16x4xf32>
    %440 = arith.addf %438, %439 : vector<16x4xf32>
    %441 = arith.mulf %427, %36 : vector<16x4xf32>
    %442 = arith.addf %440, %441 : vector<16x4xf32>
    %443 = arith.addf %40, %437 : vector<16x4xf32>
    %444 = vector.extract_strided_slice %432 {offsets = [0, 0], sizes = [15, 4], strides = [1, 1]} : vector<16x4xf32> to vector<15x4xf32>
    %445 = tpu.concatenate %41, %444 in 0 : vector<1x4xf32>, vector<15x4xf32> -> vector<16x4xf32>
    %446 = arith.addf %443, %445 : vector<16x4xf32>
    %447 = vector.extract_strided_slice %442 {offsets = [1, 0], sizes = [15, 4], strides = [1, 1]} : vector<16x4xf32> to vector<15x4xf32>
    %448 = tpu.concatenate %447, %41 in 0 : vector<15x4xf32>, vector<1x4xf32> -> vector<16x4xf32>
    %449 = arith.addf %446, %448 : vector<16x4xf32>
    %c0_203 = arith.constant 0 : index
    %c12_204 = arith.constant 12 : index
    %c0_205 = arith.constant 0 : index
    %c0_206 = arith.constant 0 : index
    %450 = vector.load %arg8[%c0_203, %c12_204, %c0_205, %c0_206] : memref<2x16x16x4xf32, #tpu.memory_space<vmem>>, vector<1x1x16x4xf32>
    %451 = vector.shape_cast %450 : vector<1x1x16x4xf32> to vector<16x4xf32>
    %452 = vector.shape_cast %449 : vector<16x4xf32> to vector<1x1x16x4xf32>
    tpu.vector_store %arg8[%c0_203, %c12_204, %c0_205, %c0_206], %452 {strides = array<i32>} : memref<2x16x16x4xf32, #tpu.memory_space<vmem>>, vector<1x1x16x4xf32>,
    %c0_207 = arith.constant 0 : index
    %c12_208 = arith.constant 12 : index
    %c0_209 = arith.constant 0 : index
    %c0_210 = arith.constant 0 : index
    %453 = vector.load %arg3[%c0_207, %c12_208, %c0_209, %c0_210] : memref<2x16x16x4xf32, #tpu.memory_space<vmem>>, vector<1x1x16x4xf32>
    %454 = vector.shape_cast %453 : vector<1x1x16x4xf32> to vector<16x4xf32>
    %c0_211 = arith.constant 0 : index
    %c13_212 = arith.constant 13 : index
    %c0_213 = arith.constant 0 : index
    %c0_214 = arith.constant 0 : index
    %455 = vector.load %arg3[%c0_211, %c13_212, %c0_213, %c0_214] : memref<2x16x16x4xf32, #tpu.memory_space<vmem>>, vector<1x1x16x4xf32>
    %456 = vector.shape_cast %455 : vector<1x1x16x4xf32> to vector<16x4xf32>
    %c0_215 = arith.constant 0 : index
    %c14 = arith.constant 14 : index
    %c0_216 = arith.constant 0 : index
    %c0_217 = arith.constant 0 : index
    %457 = vector.load %arg3[%c0_215, %c14, %c0_216, %c0_217] : memref<2x16x16x4xf32, #tpu.memory_space<vmem>>, vector<1x1x16x4xf32>
    %458 = vector.shape_cast %457 : vector<1x1x16x4xf32> to vector<16x4xf32>
    %459 = arith.mulf %454, %4 : vector<16x4xf32>
    %460 = arith.mulf %456, %16 : vector<16x4xf32>
    %461 = arith.addf %459, %460 : vector<16x4xf32>
    %462 = arith.mulf %458, %28 : vector<16x4xf32>
    %463 = arith.addf %461, %462 : vector<16x4xf32>
    %464 = arith.mulf %454, %8 : vector<16x4xf32>
    %465 = arith.mulf %456, %20 : vector<16x4xf32>
    %466 = arith.addf %464, %465 : vector<16x4xf32>
    %467 = arith.mulf %458, %32 : vector<16x4xf32>
    %468 = arith.addf %466, %467 : vector<16x4xf32>
    %469 = arith.mulf %454, %12 : vector<16x4xf32>
    %470 = arith.mulf %456, %24 : vector<16x4xf32>
    %471 = arith.addf %469, %470 : vector<16x4xf32>
    %472 = arith.mulf %458, %36 : vector<16x4xf32>
    %473 = arith.addf %471, %472 : vector<16x4xf32>
    %474 = arith.addf %40, %468 : vector<16x4xf32>
    %475 = vector.extract_strided_slice %463 {offsets = [0, 0], sizes = [15, 4], strides = [1, 1]} : vector<16x4xf32> to vector<15x4xf32>
    %476 = tpu.concatenate %41, %475 in 0 : vector<1x4xf32>, vector<15x4xf32> -> vector<16x4xf32>
    %477 = arith.addf %474, %476 : vector<16x4xf32>
    %478 = vector.extract_strided_slice %473 {offsets = [1, 0], sizes = [15, 4], strides = [1, 1]} : vector<16x4xf32> to vector<15x4xf32>
    %479 = tpu.concatenate %478, %41 in 0 : vector<15x4xf32>, vector<1x4xf32> -> vector<16x4xf32>
    %480 = arith.addf %477, %479 : vector<16x4xf32>
    %c0_218 = arith.constant 0 : index
    %c13_219 = arith.constant 13 : index
    %c0_220 = arith.constant 0 : index
    %c0_221 = arith.constant 0 : index
    %481 = vector.load %arg8[%c0_218, %c13_219, %c0_220, %c0_221] : memref<2x16x16x4xf32, #tpu.memory_space<vmem>>, vector<1x1x16x4xf32>
    %482 = vector.shape_cast %481 : vector<1x1x16x4xf32> to vector<16x4xf32>
    %483 = vector.shape_cast %480 : vector<16x4xf32> to vector<1x1x16x4xf32>
    tpu.vector_store %arg8[%c0_218, %c13_219, %c0_220, %c0_221], %483 {strides = array<i32>} : memref<2x16x16x4xf32, #tpu.memory_space<vmem>>, vector<1x1x16x4xf32>,
    %c0_222 = arith.constant 0 : index
    %c13_223 = arith.constant 13 : index
    %c0_224 = arith.constant 0 : index
    %c0_225 = arith.constant 0 : index
    %484 = vector.load %arg3[%c0_222, %c13_223, %c0_224, %c0_225] : memref<2x16x16x4xf32, #tpu.memory_space<vmem>>, vector<1x1x16x4xf32>
    %485 = vector.shape_cast %484 : vector<1x1x16x4xf32> to vector<16x4xf32>
    %c0_226 = arith.constant 0 : index
    %c14_227 = arith.constant 14 : index
    %c0_228 = arith.constant 0 : index
    %c0_229 = arith.constant 0 : index
    %486 = vector.load %arg3[%c0_226, %c14_227, %c0_228, %c0_229] : memref<2x16x16x4xf32, #tpu.memory_space<vmem>>, vector<1x1x16x4xf32>
    %487 = vector.shape_cast %486 : vector<1x1x16x4xf32> to vector<16x4xf32>
    %c0_230 = arith.constant 0 : index
    %c15 = arith.constant 15 : index
    %c0_231 = arith.constant 0 : index
    %c0_232 = arith.constant 0 : index
    %488 = vector.load %arg3[%c0_230, %c15, %c0_231, %c0_232] : memref<2x16x16x4xf32, #tpu.memory_space<vmem>>, vector<1x1x16x4xf32>
    %489 = vector.shape_cast %488 : vector<1x1x16x4xf32> to vector<16x4xf32>
    %490 = arith.mulf %485, %4 : vector<16x4xf32>
    %491 = arith.mulf %487, %16 : vector<16x4xf32>
    %492 = arith.addf %490, %491 : vector<16x4xf32>
    %493 = arith.mulf %489, %28 : vector<16x4xf32>
    %494 = arith.addf %492, %493 : vector<16x4xf32>
    %495 = arith.mulf %485, %8 : vector<16x4xf32>
    %496 = arith.mulf %487, %20 : vector<16x4xf32>
    %497 = arith.addf %495, %496 : vector<16x4xf32>
    %498 = arith.mulf %489, %32 : vector<16x4xf32>
    %499 = arith.addf %497, %498 : vector<16x4xf32>
    %500 = arith.mulf %485, %12 : vector<16x4xf32>
    %501 = arith.mulf %487, %24 : vector<16x4xf32>
    %502 = arith.addf %500, %501 : vector<16x4xf32>
    %503 = arith.mulf %489, %36 : vector<16x4xf32>
    %504 = arith.addf %502, %503 : vector<16x4xf32>
    %505 = arith.addf %40, %499 : vector<16x4xf32>
    %506 = vector.extract_strided_slice %494 {offsets = [0, 0], sizes = [15, 4], strides = [1, 1]} : vector<16x4xf32> to vector<15x4xf32>
    %507 = tpu.concatenate %41, %506 in 0 : vector<1x4xf32>, vector<15x4xf32> -> vector<16x4xf32>
    %508 = arith.addf %505, %507 : vector<16x4xf32>
    %509 = vector.extract_strided_slice %504 {offsets = [1, 0], sizes = [15, 4], strides = [1, 1]} : vector<16x4xf32> to vector<15x4xf32>
    %510 = tpu.concatenate %509, %41 in 0 : vector<15x4xf32>, vector<1x4xf32> -> vector<16x4xf32>
    %511 = arith.addf %508, %510 : vector<16x4xf32>
    %c0_233 = arith.constant 0 : index
    %c14_234 = arith.constant 14 : index
    %c0_235 = arith.constant 0 : index
    %c0_236 = arith.constant 0 : index
    %512 = vector.load %arg8[%c0_233, %c14_234, %c0_235, %c0_236] : memref<2x16x16x4xf32, #tpu.memory_space<vmem>>, vector<1x1x16x4xf32>
    %513 = vector.shape_cast %512 : vector<1x1x16x4xf32> to vector<16x4xf32>
    %514 = vector.shape_cast %511 : vector<16x4xf32> to vector<1x1x16x4xf32>
    tpu.vector_store %arg8[%c0_233, %c14_234, %c0_235, %c0_236], %514 {strides = array<i32>} : memref<2x16x16x4xf32, #tpu.memory_space<vmem>>, vector<1x1x16x4xf32>,
    %c0_237 = arith.constant 0 : index
    %c14_238 = arith.constant 14 : index
    %c0_239 = arith.constant 0 : index
    %c0_240 = arith.constant 0 : index
    %515 = vector.load %arg3[%c0_237, %c14_238, %c0_239, %c0_240] : memref<2x16x16x4xf32, #tpu.memory_space<vmem>>, vector<1x1x16x4xf32>
    %516 = vector.shape_cast %515 : vector<1x1x16x4xf32> to vector<16x4xf32>
    %c0_241 = arith.constant 0 : index
    %c15_242 = arith.constant 15 : index
    %c0_243 = arith.constant 0 : index
    %c0_244 = arith.constant 0 : index
    %517 = vector.load %arg3[%c0_241, %c15_242, %c0_243, %c0_244] : memref<2x16x16x4xf32, #tpu.memory_space<vmem>>, vector<1x1x16x4xf32>
    %518 = vector.shape_cast %517 : vector<1x1x16x4xf32> to vector<16x4xf32>
    %519 = arith.mulf %516, %4 : vector<16x4xf32>
    %520 = arith.mulf %518, %16 : vector<16x4xf32>
    %521 = arith.addf %519, %520 : vector<16x4xf32>
    %522 = arith.mulf %51, %28 : vector<16x4xf32>
    %523 = arith.addf %521, %522 : vector<16x4xf32>
    %524 = arith.mulf %516, %8 : vector<16x4xf32>
    %525 = arith.mulf %518, %20 : vector<16x4xf32>
    %526 = arith.addf %524, %525 : vector<16x4xf32>
    %527 = arith.mulf %51, %32 : vector<16x4xf32>
    %528 = arith.addf %526, %527 : vector<16x4xf32>
    %529 = arith.mulf %516, %12 : vector<16x4xf32>
    %530 = arith.mulf %518, %24 : vector<16x4xf32>
    %531 = arith.addf %529, %530 : vector<16x4xf32>
    %532 = arith.mulf %51, %36 : vector<16x4xf32>
    %533 = arith.addf %531, %532 : vector<16x4xf32>
    %534 = arith.addf %40, %528 : vector<16x4xf32>
    %535 = vector.extract_strided_slice %523 {offsets = [0, 0], sizes = [15, 4], strides = [1, 1]} : vector<16x4xf32> to vector<15x4xf32>
    %536 = tpu.concatenate %41, %535 in 0 : vector<1x4xf32>, vector<15x4xf32> -> vector<16x4xf32>
    %537 = arith.addf %534, %536 : vector<16x4xf32>
    %538 = vector.extract_strided_slice %533 {offsets = [1, 0], sizes = [15, 4], strides = [1, 1]} : vector<16x4xf32> to vector<15x4xf32>
    %539 = tpu.concatenate %538, %41 in 0 : vector<15x4xf32>, vector<1x4xf32> -> vector<16x4xf32>
    %540 = arith.addf %537, %539 : vector<16x4xf32>
    %c0_245 = arith.constant 0 : index
    %c15_246 = arith.constant 15 : index
    %c0_247 = arith.constant 0 : index
    %c0_248 = arith.constant 0 : index
    %541 = vector.load %arg8[%c0_245, %c15_246, %c0_247, %c0_248] : memref<2x16x16x4xf32, #tpu.memory_space<vmem>>, vector<1x1x16x4xf32>
    %542 = vector.shape_cast %541 : vector<1x1x16x4xf32> to vector<16x4xf32>
    %543 = vector.shape_cast %540 : vector<16x4xf32> to vector<1x1x16x4xf32>
    tpu.vector_store %arg8[%c0_245, %c15_246, %c0_247, %c0_248], %543 {strides = array<i32>} : memref<2x16x16x4xf32, #tpu.memory_space<vmem>>, vector<1x1x16x4xf32>,
    %c1_249 = arith.constant 1 : index
    %c0_250 = arith.constant 0 : index
    %c0_251 = arith.constant 0 : index
    %c0_252 = arith.constant 0 : index
    %544 = vector.load %arg4[%c1_249, %c0_250, %c0_251, %c0_252] : memref<2x1x16x4xf32, #tpu.memory_space<vmem>>, vector<1x1x16x4xf32>
    %545 = vector.shape_cast %544 : vector<1x1x16x4xf32> to vector<16x4xf32>
    %c1_253 = arith.constant 1 : index
    %c0_254 = arith.constant 0 : index
    %c0_255 = arith.constant 0 : index
    %c0_256 = arith.constant 0 : index
    %546 = vector.load %arg5[%c1_253, %c0_254, %c0_255, %c0_256] : memref<2x1x16x4xf32, #tpu.memory_space<vmem>>, vector<1x1x16x4xf32>
    %547 = vector.shape_cast %546 : vector<1x1x16x4xf32> to vector<16x4xf32>
    %cst_257 = arith.constant 0.000000e+00 : f32
    %548 = vector.broadcast %cst_257 : f32 to vector<16x4xf32>
    %549 = arith.select %42, %548, %545 : vector<16x4xf32>
    %cst_258 = arith.constant 0.000000e+00 : f32
    %550 = vector.broadcast %cst_258 : f32 to vector<16x4xf32>
    %551 = arith.select %43, %550, %547 : vector<16x4xf32>
    %c1_259 = arith.constant 1 : index
    %c0_260 = arith.constant 0 : index
    %c0_261 = arith.constant 0 : index
    %c0_262 = arith.constant 0 : index
    %552 = vector.load %arg3[%c1_259, %c0_260, %c0_261, %c0_262] : memref<2x16x16x4xf32, #tpu.memory_space<vmem>>, vector<1x1x16x4xf32>
    %553 = vector.shape_cast %552 : vector<1x1x16x4xf32> to vector<16x4xf32>
    %c1_263 = arith.constant 1 : index
    %c1_264 = arith.constant 1 : index
    %c0_265 = arith.constant 0 : index
    %c0_266 = arith.constant 0 : index
    %554 = vector.load %arg3[%c1_263, %c1_264, %c0_265, %c0_266] : memref<2x16x16x4xf32, #tpu.memory_space<vmem>>, vector<1x1x16x4xf32>
    %555 = vector.shape_cast %554 : vector<1x1x16x4xf32> to vector<16x4xf32>
    %556 = arith.mulf %549, %4 : vector<16x4xf32>
    %557 = arith.mulf %553, %16 : vector<16x4xf32>
    %558 = arith.addf %556, %557 : vector<16x4xf32>
    %559 = arith.mulf %555, %28 : vector<16x4xf32>
    %560 = arith.addf %558, %559 : vector<16x4xf32>
    %561 = arith.mulf %549, %8 : vector<16x4xf32>
    %562 = arith.mulf %553, %20 : vector<16x4xf32>
    %563 = arith.addf %561, %562 : vector<16x4xf32>
    %564 = arith.mulf %555, %32 : vector<16x4xf32>
    %565 = arith.addf %563, %564 : vector<16x4xf32>
    %566 = arith.mulf %549, %12 : vector<16x4xf32>
    %567 = arith.mulf %553, %24 : vector<16x4xf32>
    %568 = arith.addf %566, %567 : vector<16x4xf32>
    %569 = arith.mulf %555, %36 : vector<16x4xf32>
    %570 = arith.addf %568, %569 : vector<16x4xf32>
    %571 = arith.addf %40, %565 : vector<16x4xf32>
    %572 = vector.extract_strided_slice %560 {offsets = [0, 0], sizes = [15, 4], strides = [1, 1]} : vector<16x4xf32> to vector<15x4xf32>
    %573 = tpu.concatenate %41, %572 in 0 : vector<1x4xf32>, vector<15x4xf32> -> vector<16x4xf32>
    %574 = arith.addf %571, %573 : vector<16x4xf32>
    %575 = vector.extract_strided_slice %570 {offsets = [1, 0], sizes = [15, 4], strides = [1, 1]} : vector<16x4xf32> to vector<15x4xf32>
    %576 = tpu.concatenate %575, %41 in 0 : vector<15x4xf32>, vector<1x4xf32> -> vector<16x4xf32>
    %577 = arith.addf %574, %576 : vector<16x4xf32>
    %c1_267 = arith.constant 1 : index
    %c0_268 = arith.constant 0 : index
    %c0_269 = arith.constant 0 : index
    %c0_270 = arith.constant 0 : index
    %578 = vector.load %arg8[%c1_267, %c0_268, %c0_269, %c0_270] : memref<2x16x16x4xf32, #tpu.memory_space<vmem>>, vector<1x1x16x4xf32>
    %579 = vector.shape_cast %578 : vector<1x1x16x4xf32> to vector<16x4xf32>
    %580 = vector.shape_cast %577 : vector<16x4xf32> to vector<1x1x16x4xf32>
    tpu.vector_store %arg8[%c1_267, %c0_268, %c0_269, %c0_270], %580 {strides = array<i32>} : memref<2x16x16x4xf32, #tpu.memory_space<vmem>>, vector<1x1x16x4xf32>,
    %c1_271 = arith.constant 1 : index
    %c0_272 = arith.constant 0 : index
    %c0_273 = arith.constant 0 : index
    %c0_274 = arith.constant 0 : index
    %581 = vector.load %arg3[%c1_271, %c0_272, %c0_273, %c0_274] : memref<2x16x16x4xf32, #tpu.memory_space<vmem>>, vector<1x1x16x4xf32>
    %582 = vector.shape_cast %581 : vector<1x1x16x4xf32> to vector<16x4xf32>
    %c1_275 = arith.constant 1 : index
    %c1_276 = arith.constant 1 : index
    %c0_277 = arith.constant 0 : index
    %c0_278 = arith.constant 0 : index
    %583 = vector.load %arg3[%c1_275, %c1_276, %c0_277, %c0_278] : memref<2x16x16x4xf32, #tpu.memory_space<vmem>>, vector<1x1x16x4xf32>
    %584 = vector.shape_cast %583 : vector<1x1x16x4xf32> to vector<16x4xf32>
    %c1_279 = arith.constant 1 : index
    %c2_280 = arith.constant 2 : index
    %c0_281 = arith.constant 0 : index
    %c0_282 = arith.constant 0 : index
    %585 = vector.load %arg3[%c1_279, %c2_280, %c0_281, %c0_282] : memref<2x16x16x4xf32, #tpu.memory_space<vmem>>, vector<1x1x16x4xf32>
    %586 = vector.shape_cast %585 : vector<1x1x16x4xf32> to vector<16x4xf32>
    %587 = arith.mulf %582, %4 : vector<16x4xf32>
    %588 = arith.mulf %584, %16 : vector<16x4xf32>
    %589 = arith.addf %587, %588 : vector<16x4xf32>
    %590 = arith.mulf %586, %28 : vector<16x4xf32>
    %591 = arith.addf %589, %590 : vector<16x4xf32>
    %592 = arith.mulf %582, %8 : vector<16x4xf32>
    %593 = arith.mulf %584, %20 : vector<16x4xf32>
    %594 = arith.addf %592, %593 : vector<16x4xf32>
    %595 = arith.mulf %586, %32 : vector<16x4xf32>
    %596 = arith.addf %594, %595 : vector<16x4xf32>
    %597 = arith.mulf %582, %12 : vector<16x4xf32>
    %598 = arith.mulf %584, %24 : vector<16x4xf32>
    %599 = arith.addf %597, %598 : vector<16x4xf32>
    %600 = arith.mulf %586, %36 : vector<16x4xf32>
    %601 = arith.addf %599, %600 : vector<16x4xf32>
    %602 = arith.addf %40, %596 : vector<16x4xf32>
    %603 = vector.extract_strided_slice %591 {offsets = [0, 0], sizes = [15, 4], strides = [1, 1]} : vector<16x4xf32> to vector<15x4xf32>
    %604 = tpu.concatenate %41, %603 in 0 : vector<1x4xf32>, vector<15x4xf32> -> vector<16x4xf32>
    %605 = arith.addf %602, %604 : vector<16x4xf32>
    %606 = vector.extract_strided_slice %601 {offsets = [1, 0], sizes = [15, 4], strides = [1, 1]} : vector<16x4xf32> to vector<15x4xf32>
    %607 = tpu.concatenate %606, %41 in 0 : vector<15x4xf32>, vector<1x4xf32> -> vector<16x4xf32>
    %608 = arith.addf %605, %607 : vector<16x4xf32>
    %c1_283 = arith.constant 1 : index
    %c1_284 = arith.constant 1 : index
    %c0_285 = arith.constant 0 : index
    %c0_286 = arith.constant 0 : index
    %609 = vector.load %arg8[%c1_283, %c1_284, %c0_285, %c0_286] : memref<2x16x16x4xf32, #tpu.memory_space<vmem>>, vector<1x1x16x4xf32>
    %610 = vector.shape_cast %609 : vector<1x1x16x4xf32> to vector<16x4xf32>
    %611 = vector.shape_cast %608 : vector<16x4xf32> to vector<1x1x16x4xf32>
    tpu.vector_store %arg8[%c1_283, %c1_284, %c0_285, %c0_286], %611 {strides = array<i32>} : memref<2x16x16x4xf32, #tpu.memory_space<vmem>>, vector<1x1x16x4xf32>,
    %c1_287 = arith.constant 1 : index
    %c1_288 = arith.constant 1 : index
    %c0_289 = arith.constant 0 : index
    %c0_290 = arith.constant 0 : index
    %612 = vector.load %arg3[%c1_287, %c1_288, %c0_289, %c0_290] : memref<2x16x16x4xf32, #tpu.memory_space<vmem>>, vector<1x1x16x4xf32>
    %613 = vector.shape_cast %612 : vector<1x1x16x4xf32> to vector<16x4xf32>
    %c1_291 = arith.constant 1 : index
    %c2_292 = arith.constant 2 : index
    %c0_293 = arith.constant 0 : index
    %c0_294 = arith.constant 0 : index
    %614 = vector.load %arg3[%c1_291, %c2_292, %c0_293, %c0_294] : memref<2x16x16x4xf32, #tpu.memory_space<vmem>>, vector<1x1x16x4xf32>
    %615 = vector.shape_cast %614 : vector<1x1x16x4xf32> to vector<16x4xf32>
    %c1_295 = arith.constant 1 : index
    %c3_296 = arith.constant 3 : index
    %c0_297 = arith.constant 0 : index
    %c0_298 = arith.constant 0 : index
    %616 = vector.load %arg3[%c1_295, %c3_296, %c0_297, %c0_298] : memref<2x16x16x4xf32, #tpu.memory_space<vmem>>, vector<1x1x16x4xf32>
    %617 = vector.shape_cast %616 : vector<1x1x16x4xf32> to vector<16x4xf32>
    %618 = arith.mulf %613, %4 : vector<16x4xf32>
    %619 = arith.mulf %615, %16 : vector<16x4xf32>
    %620 = arith.addf %618, %619 : vector<16x4xf32>
    %621 = arith.mulf %617, %28 : vector<16x4xf32>
    %622 = arith.addf %620, %621 : vector<16x4xf32>
    %623 = arith.mulf %613, %8 : vector<16x4xf32>
    %624 = arith.mulf %615, %20 : vector<16x4xf32>
    %625 = arith.addf %623, %624 : vector<16x4xf32>
    %626 = arith.mulf %617, %32 : vector<16x4xf32>
    %627 = arith.addf %625, %626 : vector<16x4xf32>
    %628 = arith.mulf %613, %12 : vector<16x4xf32>
    %629 = arith.mulf %615, %24 : vector<16x4xf32>
    %630 = arith.addf %628, %629 : vector<16x4xf32>
    %631 = arith.mulf %617, %36 : vector<16x4xf32>
    %632 = arith.addf %630, %631 : vector<16x4xf32>
    %633 = arith.addf %40, %627 : vector<16x4xf32>
    %634 = vector.extract_strided_slice %622 {offsets = [0, 0], sizes = [15, 4], strides = [1, 1]} : vector<16x4xf32> to vector<15x4xf32>
    %635 = tpu.concatenate %41, %634 in 0 : vector<1x4xf32>, vector<15x4xf32> -> vector<16x4xf32>
    %636 = arith.addf %633, %635 : vector<16x4xf32>
    %637 = vector.extract_strided_slice %632 {offsets = [1, 0], sizes = [15, 4], strides = [1, 1]} : vector<16x4xf32> to vector<15x4xf32>
    %638 = tpu.concatenate %637, %41 in 0 : vector<15x4xf32>, vector<1x4xf32> -> vector<16x4xf32>
    %639 = arith.addf %636, %638 : vector<16x4xf32>
    %c1_299 = arith.constant 1 : index
    %c2_300 = arith.constant 2 : index
    %c0_301 = arith.constant 0 : index
    %c0_302 = arith.constant 0 : index
    %640 = vector.load %arg8[%c1_299, %c2_300, %c0_301, %c0_302] : memref<2x16x16x4xf32, #tpu.memory_space<vmem>>, vector<1x1x16x4xf32>
    %641 = vector.shape_cast %640 : vector<1x1x16x4xf32> to vector<16x4xf32>
    %642 = vector.shape_cast %639 : vector<16x4xf32> to vector<1x1x16x4xf32>
    tpu.vector_store %arg8[%c1_299, %c2_300, %c0_301, %c0_302], %642 {strides = array<i32>} : memref<2x16x16x4xf32, #tpu.memory_space<vmem>>, vector<1x1x16x4xf32>,
    %c1_303 = arith.constant 1 : index
    %c2_304 = arith.constant 2 : index
    %c0_305 = arith.constant 0 : index
    %c0_306 = arith.constant 0 : index
    %643 = vector.load %arg3[%c1_303, %c2_304, %c0_305, %c0_306] : memref<2x16x16x4xf32, #tpu.memory_space<vmem>>, vector<1x1x16x4xf32>
    %644 = vector.shape_cast %643 : vector<1x1x16x4xf32> to vector<16x4xf32>
    %c1_307 = arith.constant 1 : index
    %c3_308 = arith.constant 3 : index
    %c0_309 = arith.constant 0 : index
    %c0_310 = arith.constant 0 : index
    %645 = vector.load %arg3[%c1_307, %c3_308, %c0_309, %c0_310] : memref<2x16x16x4xf32, #tpu.memory_space<vmem>>, vector<1x1x16x4xf32>
    %646 = vector.shape_cast %645 : vector<1x1x16x4xf32> to vector<16x4xf32>
    %c1_311 = arith.constant 1 : index
    %c4_312 = arith.constant 4 : index
    %c0_313 = arith.constant 0 : index
    %c0_314 = arith.constant 0 : index
    %647 = vector.load %arg3[%c1_311, %c4_312, %c0_313, %c0_314] : memref<2x16x16x4xf32, #tpu.memory_space<vmem>>, vector<1x1x16x4xf32>
    %648 = vector.shape_cast %647 : vector<1x1x16x4xf32> to vector<16x4xf32>
    %649 = arith.mulf %644, %4 : vector<16x4xf32>
    %650 = arith.mulf %646, %16 : vector<16x4xf32>
    %651 = arith.addf %649, %650 : vector<16x4xf32>
    %652 = arith.mulf %648, %28 : vector<16x4xf32>
    %653 = arith.addf %651, %652 : vector<16x4xf32>
    %654 = arith.mulf %644, %8 : vector<16x4xf32>
    %655 = arith.mulf %646, %20 : vector<16x4xf32>
    %656 = arith.addf %654, %655 : vector<16x4xf32>
    %657 = arith.mulf %648, %32 : vector<16x4xf32>
    %658 = arith.addf %656, %657 : vector<16x4xf32>
    %659 = arith.mulf %644, %12 : vector<16x4xf32>
    %660 = arith.mulf %646, %24 : vector<16x4xf32>
    %661 = arith.addf %659, %660 : vector<16x4xf32>
    %662 = arith.mulf %648, %36 : vector<16x4xf32>
    %663 = arith.addf %661, %662 : vector<16x4xf32>
    %664 = arith.addf %40, %658 : vector<16x4xf32>
    %665 = vector.extract_strided_slice %653 {offsets = [0, 0], sizes = [15, 4], strides = [1, 1]} : vector<16x4xf32> to vector<15x4xf32>
    %666 = tpu.concatenate %41, %665 in 0 : vector<1x4xf32>, vector<15x4xf32> -> vector<16x4xf32>
    %667 = arith.addf %664, %666 : vector<16x4xf32>
    %668 = vector.extract_strided_slice %663 {offsets = [1, 0], sizes = [15, 4], strides = [1, 1]} : vector<16x4xf32> to vector<15x4xf32>
    %669 = tpu.concatenate %668, %41 in 0 : vector<15x4xf32>, vector<1x4xf32> -> vector<16x4xf32>
    %670 = arith.addf %667, %669 : vector<16x4xf32>
    %c1_315 = arith.constant 1 : index
    %c3_316 = arith.constant 3 : index
    %c0_317 = arith.constant 0 : index
    %c0_318 = arith.constant 0 : index
    %671 = vector.load %arg8[%c1_315, %c3_316, %c0_317, %c0_318] : memref<2x16x16x4xf32, #tpu.memory_space<vmem>>, vector<1x1x16x4xf32>
    %672 = vector.shape_cast %671 : vector<1x1x16x4xf32> to vector<16x4xf32>
    %673 = vector.shape_cast %670 : vector<16x4xf32> to vector<1x1x16x4xf32>
    tpu.vector_store %arg8[%c1_315, %c3_316, %c0_317, %c0_318], %673 {strides = array<i32>} : memref<2x16x16x4xf32, #tpu.memory_space<vmem>>, vector<1x1x16x4xf32>,
    %c1_319 = arith.constant 1 : index
    %c3_320 = arith.constant 3 : index
    %c0_321 = arith.constant 0 : index
    %c0_322 = arith.constant 0 : index
    %674 = vector.load %arg3[%c1_319, %c3_320, %c0_321, %c0_322] : memref<2x16x16x4xf32, #tpu.memory_space<vmem>>, vector<1x1x16x4xf32>
    %675 = vector.shape_cast %674 : vector<1x1x16x4xf32> to vector<16x4xf32>
    %c1_323 = arith.constant 1 : index
    %c4_324 = arith.constant 4 : index
    %c0_325 = arith.constant 0 : index
    %c0_326 = arith.constant 0 : index
    %676 = vector.load %arg3[%c1_323, %c4_324, %c0_325, %c0_326] : memref<2x16x16x4xf32, #tpu.memory_space<vmem>>, vector<1x1x16x4xf32>
    %677 = vector.shape_cast %676 : vector<1x1x16x4xf32> to vector<16x4xf32>
    %c1_327 = arith.constant 1 : index
    %c5_328 = arith.constant 5 : index
    %c0_329 = arith.constant 0 : index
    %c0_330 = arith.constant 0 : index
    %678 = vector.load %arg3[%c1_327, %c5_328, %c0_329, %c0_330] : memref<2x16x16x4xf32, #tpu.memory_space<vmem>>, vector<1x1x16x4xf32>
    %679 = vector.shape_cast %678 : vector<1x1x16x4xf32> to vector<16x4xf32>
    %680 = arith.mulf %675, %4 : vector<16x4xf32>
    %681 = arith.mulf %677, %16 : vector<16x4xf32>
    %682 = arith.addf %680, %681 : vector<16x4xf32>
    %683 = arith.mulf %679, %28 : vector<16x4xf32>
    %684 = arith.addf %682, %683 : vector<16x4xf32>
    %685 = arith.mulf %675, %8 : vector<16x4xf32>
    %686 = arith.mulf %677, %20 : vector<16x4xf32>
    %687 = arith.addf %685, %686 : vector<16x4xf32>
    %688 = arith.mulf %679, %32 : vector<16x4xf32>
    %689 = arith.addf %687, %688 : vector<16x4xf32>
    %690 = arith.mulf %675, %12 : vector<16x4xf32>
    %691 = arith.mulf %677, %24 : vector<16x4xf32>
    %692 = arith.addf %690, %691 : vector<16x4xf32>
    %693 = arith.mulf %679, %36 : vector<16x4xf32>
    %694 = arith.addf %692, %693 : vector<16x4xf32>
    %695 = arith.addf %40, %689 : vector<16x4xf32>
    %696 = vector.extract_strided_slice %684 {offsets = [0, 0], sizes = [15, 4], strides = [1, 1]} : vector<16x4xf32> to vector<15x4xf32>
    %697 = tpu.concatenate %41, %696 in 0 : vector<1x4xf32>, vector<15x4xf32> -> vector<16x4xf32>
    %698 = arith.addf %695, %697 : vector<16x4xf32>
    %699 = vector.extract_strided_slice %694 {offsets = [1, 0], sizes = [15, 4], strides = [1, 1]} : vector<16x4xf32> to vector<15x4xf32>
    %700 = tpu.concatenate %699, %41 in 0 : vector<15x4xf32>, vector<1x4xf32> -> vector<16x4xf32>
    %701 = arith.addf %698, %700 : vector<16x4xf32>
    %c1_331 = arith.constant 1 : index
    %c4_332 = arith.constant 4 : index
    %c0_333 = arith.constant 0 : index
    %c0_334 = arith.constant 0 : index
    %702 = vector.load %arg8[%c1_331, %c4_332, %c0_333, %c0_334] : memref<2x16x16x4xf32, #tpu.memory_space<vmem>>, vector<1x1x16x4xf32>
    %703 = vector.shape_cast %702 : vector<1x1x16x4xf32> to vector<16x4xf32>
    %704 = vector.shape_cast %701 : vector<16x4xf32> to vector<1x1x16x4xf32>
    tpu.vector_store %arg8[%c1_331, %c4_332, %c0_333, %c0_334], %704 {strides = array<i32>} : memref<2x16x16x4xf32, #tpu.memory_space<vmem>>, vector<1x1x16x4xf32>,
    %c1_335 = arith.constant 1 : index
    %c4_336 = arith.constant 4 : index
    %c0_337 = arith.constant 0 : index
    %c0_338 = arith.constant 0 : index
    %705 = vector.load %arg3[%c1_335, %c4_336, %c0_337, %c0_338] : memref<2x16x16x4xf32, #tpu.memory_space<vmem>>, vector<1x1x16x4xf32>
    %706 = vector.shape_cast %705 : vector<1x1x16x4xf32> to vector<16x4xf32>
    %c1_339 = arith.constant 1 : index
    %c5_340 = arith.constant 5 : index
    %c0_341 = arith.constant 0 : index
    %c0_342 = arith.constant 0 : index
    %707 = vector.load %arg3[%c1_339, %c5_340, %c0_341, %c0_342] : memref<2x16x16x4xf32, #tpu.memory_space<vmem>>, vector<1x1x16x4xf32>
    %708 = vector.shape_cast %707 : vector<1x1x16x4xf32> to vector<16x4xf32>
    %c1_343 = arith.constant 1 : index
    %c6_344 = arith.constant 6 : index
    %c0_345 = arith.constant 0 : index
    %c0_346 = arith.constant 0 : index
    %709 = vector.load %arg3[%c1_343, %c6_344, %c0_345, %c0_346] : memref<2x16x16x4xf32, #tpu.memory_space<vmem>>, vector<1x1x16x4xf32>
    %710 = vector.shape_cast %709 : vector<1x1x16x4xf32> to vector<16x4xf32>
    %711 = arith.mulf %706, %4 : vector<16x4xf32>
    %712 = arith.mulf %708, %16 : vector<16x4xf32>
    %713 = arith.addf %711, %712 : vector<16x4xf32>
    %714 = arith.mulf %710, %28 : vector<16x4xf32>
    %715 = arith.addf %713, %714 : vector<16x4xf32>
    %716 = arith.mulf %706, %8 : vector<16x4xf32>
    %717 = arith.mulf %708, %20 : vector<16x4xf32>
    %718 = arith.addf %716, %717 : vector<16x4xf32>
    %719 = arith.mulf %710, %32 : vector<16x4xf32>
    %720 = arith.addf %718, %719 : vector<16x4xf32>
    %721 = arith.mulf %706, %12 : vector<16x4xf32>
    %722 = arith.mulf %708, %24 : vector<16x4xf32>
    %723 = arith.addf %721, %722 : vector<16x4xf32>
    %724 = arith.mulf %710, %36 : vector<16x4xf32>
    %725 = arith.addf %723, %724 : vector<16x4xf32>
    %726 = arith.addf %40, %720 : vector<16x4xf32>
    %727 = vector.extract_strided_slice %715 {offsets = [0, 0], sizes = [15, 4], strides = [1, 1]} : vector<16x4xf32> to vector<15x4xf32>
    %728 = tpu.concatenate %41, %727 in 0 : vector<1x4xf32>, vector<15x4xf32> -> vector<16x4xf32>
    %729 = arith.addf %726, %728 : vector<16x4xf32>
    %730 = vector.extract_strided_slice %725 {offsets = [1, 0], sizes = [15, 4], strides = [1, 1]} : vector<16x4xf32> to vector<15x4xf32>
    %731 = tpu.concatenate %730, %41 in 0 : vector<15x4xf32>, vector<1x4xf32> -> vector<16x4xf32>
    %732 = arith.addf %729, %731 : vector<16x4xf32>
    %c1_347 = arith.constant 1 : index
    %c5_348 = arith.constant 5 : index
    %c0_349 = arith.constant 0 : index
    %c0_350 = arith.constant 0 : index
    %733 = vector.load %arg8[%c1_347, %c5_348, %c0_349, %c0_350] : memref<2x16x16x4xf32, #tpu.memory_space<vmem>>, vector<1x1x16x4xf32>
    %734 = vector.shape_cast %733 : vector<1x1x16x4xf32> to vector<16x4xf32>
    %735 = vector.shape_cast %732 : vector<16x4xf32> to vector<1x1x16x4xf32>
    tpu.vector_store %arg8[%c1_347, %c5_348, %c0_349, %c0_350], %735 {strides = array<i32>} : memref<2x16x16x4xf32, #tpu.memory_space<vmem>>, vector<1x1x16x4xf32>,
    %c1_351 = arith.constant 1 : index
    %c5_352 = arith.constant 5 : index
    %c0_353 = arith.constant 0 : index
    %c0_354 = arith.constant 0 : index
    %736 = vector.load %arg3[%c1_351, %c5_352, %c0_353, %c0_354] : memref<2x16x16x4xf32, #tpu.memory_space<vmem>>, vector<1x1x16x4xf32>
    %737 = vector.shape_cast %736 : vector<1x1x16x4xf32> to vector<16x4xf32>
    %c1_355 = arith.constant 1 : index
    %c6_356 = arith.constant 6 : index
    %c0_357 = arith.constant 0 : index
    %c0_358 = arith.constant 0 : index
    %738 = vector.load %arg3[%c1_355, %c6_356, %c0_357, %c0_358] : memref<2x16x16x4xf32, #tpu.memory_space<vmem>>, vector<1x1x16x4xf32>
    %739 = vector.shape_cast %738 : vector<1x1x16x4xf32> to vector<16x4xf32>
    %c1_359 = arith.constant 1 : index
    %c7_360 = arith.constant 7 : index
    %c0_361 = arith.constant 0 : index
    %c0_362 = arith.constant 0 : index
    %740 = vector.load %arg3[%c1_359, %c7_360, %c0_361, %c0_362] : memref<2x16x16x4xf32, #tpu.memory_space<vmem>>, vector<1x1x16x4xf32>
    %741 = vector.shape_cast %740 : vector<1x1x16x4xf32> to vector<16x4xf32>
    %742 = arith.mulf %737, %4 : vector<16x4xf32>
    %743 = arith.mulf %739, %16 : vector<16x4xf32>
    %744 = arith.addf %742, %743 : vector<16x4xf32>
    %745 = arith.mulf %741, %28 : vector<16x4xf32>
    %746 = arith.addf %744, %745 : vector<16x4xf32>
    %747 = arith.mulf %737, %8 : vector<16x4xf32>
    %748 = arith.mulf %739, %20 : vector<16x4xf32>
    %749 = arith.addf %747, %748 : vector<16x4xf32>
    %750 = arith.mulf %741, %32 : vector<16x4xf32>
    %751 = arith.addf %749, %750 : vector<16x4xf32>
    %752 = arith.mulf %737, %12 : vector<16x4xf32>
    %753 = arith.mulf %739, %24 : vector<16x4xf32>
    %754 = arith.addf %752, %753 : vector<16x4xf32>
    %755 = arith.mulf %741, %36 : vector<16x4xf32>
    %756 = arith.addf %754, %755 : vector<16x4xf32>
    %757 = arith.addf %40, %751 : vector<16x4xf32>
    %758 = vector.extract_strided_slice %746 {offsets = [0, 0], sizes = [15, 4], strides = [1, 1]} : vector<16x4xf32> to vector<15x4xf32>
    %759 = tpu.concatenate %41, %758 in 0 : vector<1x4xf32>, vector<15x4xf32> -> vector<16x4xf32>
    %760 = arith.addf %757, %759 : vector<16x4xf32>
    %761 = vector.extract_strided_slice %756 {offsets = [1, 0], sizes = [15, 4], strides = [1, 1]} : vector<16x4xf32> to vector<15x4xf32>
    %762 = tpu.concatenate %761, %41 in 0 : vector<15x4xf32>, vector<1x4xf32> -> vector<16x4xf32>
    %763 = arith.addf %760, %762 : vector<16x4xf32>
    %c1_363 = arith.constant 1 : index
    %c6_364 = arith.constant 6 : index
    %c0_365 = arith.constant 0 : index
    %c0_366 = arith.constant 0 : index
    %764 = vector.load %arg8[%c1_363, %c6_364, %c0_365, %c0_366] : memref<2x16x16x4xf32, #tpu.memory_space<vmem>>, vector<1x1x16x4xf32>
    %765 = vector.shape_cast %764 : vector<1x1x16x4xf32> to vector<16x4xf32>
    %766 = vector.shape_cast %763 : vector<16x4xf32> to vector<1x1x16x4xf32>
    tpu.vector_store %arg8[%c1_363, %c6_364, %c0_365, %c0_366], %766 {strides = array<i32>} : memref<2x16x16x4xf32, #tpu.memory_space<vmem>>, vector<1x1x16x4xf32>,
    %c1_367 = arith.constant 1 : index
    %c6_368 = arith.constant 6 : index
    %c0_369 = arith.constant 0 : index
    %c0_370 = arith.constant 0 : index
    %767 = vector.load %arg3[%c1_367, %c6_368, %c0_369, %c0_370] : memref<2x16x16x4xf32, #tpu.memory_space<vmem>>, vector<1x1x16x4xf32>
    %768 = vector.shape_cast %767 : vector<1x1x16x4xf32> to vector<16x4xf32>
    %c1_371 = arith.constant 1 : index
    %c7_372 = arith.constant 7 : index
    %c0_373 = arith.constant 0 : index
    %c0_374 = arith.constant 0 : index
    %769 = vector.load %arg3[%c1_371, %c7_372, %c0_373, %c0_374] : memref<2x16x16x4xf32, #tpu.memory_space<vmem>>, vector<1x1x16x4xf32>
    %770 = vector.shape_cast %769 : vector<1x1x16x4xf32> to vector<16x4xf32>
    %c1_375 = arith.constant 1 : index
    %c8_376 = arith.constant 8 : index
    %c0_377 = arith.constant 0 : index
    %c0_378 = arith.constant 0 : index
    %771 = vector.load %arg3[%c1_375, %c8_376, %c0_377, %c0_378] : memref<2x16x16x4xf32, #tpu.memory_space<vmem>>, vector<1x1x16x4xf32>
    %772 = vector.shape_cast %771 : vector<1x1x16x4xf32> to vector<16x4xf32>
    %773 = arith.mulf %768, %4 : vector<16x4xf32>
    %774 = arith.mulf %770, %16 : vector<16x4xf32>
    %775 = arith.addf %773, %774 : vector<16x4xf32>
    %776 = arith.mulf %772, %28 : vector<16x4xf32>
    %777 = arith.addf %775, %776 : vector<16x4xf32>
    %778 = arith.mulf %768, %8 : vector<16x4xf32>
    %779 = arith.mulf %770, %20 : vector<16x4xf32>
    %780 = arith.addf %778, %779 : vector<16x4xf32>
    %781 = arith.mulf %772, %32 : vector<16x4xf32>
    %782 = arith.addf %780, %781 : vector<16x4xf32>
    %783 = arith.mulf %768, %12 : vector<16x4xf32>
    %784 = arith.mulf %770, %24 : vector<16x4xf32>
    %785 = arith.addf %783, %784 : vector<16x4xf32>
    %786 = arith.mulf %772, %36 : vector<16x4xf32>
    %787 = arith.addf %785, %786 : vector<16x4xf32>
    %788 = arith.addf %40, %782 : vector<16x4xf32>
    %789 = vector.extract_strided_slice %777 {offsets = [0, 0], sizes = [15, 4], strides = [1, 1]} : vector<16x4xf32> to vector<15x4xf32>
    %790 = tpu.concatenate %41, %789 in 0 : vector<1x4xf32>, vector<15x4xf32> -> vector<16x4xf32>
    %791 = arith.addf %788, %790 : vector<16x4xf32>
    %792 = vector.extract_strided_slice %787 {offsets = [1, 0], sizes = [15, 4], strides = [1, 1]} : vector<16x4xf32> to vector<15x4xf32>
    %793 = tpu.concatenate %792, %41 in 0 : vector<15x4xf32>, vector<1x4xf32> -> vector<16x4xf32>
    %794 = arith.addf %791, %793 : vector<16x4xf32>
    %c1_379 = arith.constant 1 : index
    %c7_380 = arith.constant 7 : index
    %c0_381 = arith.constant 0 : index
    %c0_382 = arith.constant 0 : index
    %795 = vector.load %arg8[%c1_379, %c7_380, %c0_381, %c0_382] : memref<2x16x16x4xf32, #tpu.memory_space<vmem>>, vector<1x1x16x4xf32>
    %796 = vector.shape_cast %795 : vector<1x1x16x4xf32> to vector<16x4xf32>
    %797 = vector.shape_cast %794 : vector<16x4xf32> to vector<1x1x16x4xf32>
    tpu.vector_store %arg8[%c1_379, %c7_380, %c0_381, %c0_382], %797 {strides = array<i32>} : memref<2x16x16x4xf32, #tpu.memory_space<vmem>>, vector<1x1x16x4xf32>,
    %c1_383 = arith.constant 1 : index
    %c7_384 = arith.constant 7 : index
    %c0_385 = arith.constant 0 : index
    %c0_386 = arith.constant 0 : index
    %798 = vector.load %arg3[%c1_383, %c7_384, %c0_385, %c0_386] : memref<2x16x16x4xf32, #tpu.memory_space<vmem>>, vector<1x1x16x4xf32>
    %799 = vector.shape_cast %798 : vector<1x1x16x4xf32> to vector<16x4xf32>
    %c1_387 = arith.constant 1 : index
    %c8_388 = arith.constant 8 : index
    %c0_389 = arith.constant 0 : index
    %c0_390 = arith.constant 0 : index
    %800 = vector.load %arg3[%c1_387, %c8_388, %c0_389, %c0_390] : memref<2x16x16x4xf32, #tpu.memory_space<vmem>>, vector<1x1x16x4xf32>
    %801 = vector.shape_cast %800 : vector<1x1x16x4xf32> to vector<16x4xf32>
    %c1_391 = arith.constant 1 : index
    %c9_392 = arith.constant 9 : index
    %c0_393 = arith.constant 0 : index
    %c0_394 = arith.constant 0 : index
    %802 = vector.load %arg3[%c1_391, %c9_392, %c0_393, %c0_394] : memref<2x16x16x4xf32, #tpu.memory_space<vmem>>, vector<1x1x16x4xf32>
    %803 = vector.shape_cast %802 : vector<1x1x16x4xf32> to vector<16x4xf32>
    %804 = arith.mulf %799, %4 : vector<16x4xf32>
    %805 = arith.mulf %801, %16 : vector<16x4xf32>
    %806 = arith.addf %804, %805 : vector<16x4xf32>
    %807 = arith.mulf %803, %28 : vector<16x4xf32>
    %808 = arith.addf %806, %807 : vector<16x4xf32>
    %809 = arith.mulf %799, %8 : vector<16x4xf32>
    %810 = arith.mulf %801, %20 : vector<16x4xf32>
    %811 = arith.addf %809, %810 : vector<16x4xf32>
    %812 = arith.mulf %803, %32 : vector<16x4xf32>
    %813 = arith.addf %811, %812 : vector<16x4xf32>
    %814 = arith.mulf %799, %12 : vector<16x4xf32>
    %815 = arith.mulf %801, %24 : vector<16x4xf32>
    %816 = arith.addf %814, %815 : vector<16x4xf32>
    %817 = arith.mulf %803, %36 : vector<16x4xf32>
    %818 = arith.addf %816, %817 : vector<16x4xf32>
    %819 = arith.addf %40, %813 : vector<16x4xf32>
    %820 = vector.extract_strided_slice %808 {offsets = [0, 0], sizes = [15, 4], strides = [1, 1]} : vector<16x4xf32> to vector<15x4xf32>
    %821 = tpu.concatenate %41, %820 in 0 : vector<1x4xf32>, vector<15x4xf32> -> vector<16x4xf32>
    %822 = arith.addf %819, %821 : vector<16x4xf32>
    %823 = vector.extract_strided_slice %818 {offsets = [1, 0], sizes = [15, 4], strides = [1, 1]} : vector<16x4xf32> to vector<15x4xf32>
    %824 = tpu.concatenate %823, %41 in 0 : vector<15x4xf32>, vector<1x4xf32> -> vector<16x4xf32>
    %825 = arith.addf %822, %824 : vector<16x4xf32>
    %c1_395 = arith.constant 1 : index
    %c8_396 = arith.constant 8 : index
    %c0_397 = arith.constant 0 : index
    %c0_398 = arith.constant 0 : index
    %826 = vector.load %arg8[%c1_395, %c8_396, %c0_397, %c0_398] : memref<2x16x16x4xf32, #tpu.memory_space<vmem>>, vector<1x1x16x4xf32>
    %827 = vector.shape_cast %826 : vector<1x1x16x4xf32> to vector<16x4xf32>
    %828 = vector.shape_cast %825 : vector<16x4xf32> to vector<1x1x16x4xf32>
    tpu.vector_store %arg8[%c1_395, %c8_396, %c0_397, %c0_398], %828 {strides = array<i32>} : memref<2x16x16x4xf32, #tpu.memory_space<vmem>>, vector<1x1x16x4xf32>,
    %c1_399 = arith.constant 1 : index
    %c8_400 = arith.constant 8 : index
    %c0_401 = arith.constant 0 : index
    %c0_402 = arith.constant 0 : index
    %829 = vector.load %arg3[%c1_399, %c8_400, %c0_401, %c0_402] : memref<2x16x16x4xf32, #tpu.memory_space<vmem>>, vector<1x1x16x4xf32>
    %830 = vector.shape_cast %829 : vector<1x1x16x4xf32> to vector<16x4xf32>
    %c1_403 = arith.constant 1 : index
    %c9_404 = arith.constant 9 : index
    %c0_405 = arith.constant 0 : index
    %c0_406 = arith.constant 0 : index
    %831 = vector.load %arg3[%c1_403, %c9_404, %c0_405, %c0_406] : memref<2x16x16x4xf32, #tpu.memory_space<vmem>>, vector<1x1x16x4xf32>
    %832 = vector.shape_cast %831 : vector<1x1x16x4xf32> to vector<16x4xf32>
    %c1_407 = arith.constant 1 : index
    %c10_408 = arith.constant 10 : index
    %c0_409 = arith.constant 0 : index
    %c0_410 = arith.constant 0 : index
    %833 = vector.load %arg3[%c1_407, %c10_408, %c0_409, %c0_410] : memref<2x16x16x4xf32, #tpu.memory_space<vmem>>, vector<1x1x16x4xf32>
    %834 = vector.shape_cast %833 : vector<1x1x16x4xf32> to vector<16x4xf32>
    %835 = arith.mulf %830, %4 : vector<16x4xf32>
    %836 = arith.mulf %832, %16 : vector<16x4xf32>
    %837 = arith.addf %835, %836 : vector<16x4xf32>
    %838 = arith.mulf %834, %28 : vector<16x4xf32>
    %839 = arith.addf %837, %838 : vector<16x4xf32>
    %840 = arith.mulf %830, %8 : vector<16x4xf32>
    %841 = arith.mulf %832, %20 : vector<16x4xf32>
    %842 = arith.addf %840, %841 : vector<16x4xf32>
    %843 = arith.mulf %834, %32 : vector<16x4xf32>
    %844 = arith.addf %842, %843 : vector<16x4xf32>
    %845 = arith.mulf %830, %12 : vector<16x4xf32>
    %846 = arith.mulf %832, %24 : vector<16x4xf32>
    %847 = arith.addf %845, %846 : vector<16x4xf32>
    %848 = arith.mulf %834, %36 : vector<16x4xf32>
    %849 = arith.addf %847, %848 : vector<16x4xf32>
    %850 = arith.addf %40, %844 : vector<16x4xf32>
    %851 = vector.extract_strided_slice %839 {offsets = [0, 0], sizes = [15, 4], strides = [1, 1]} : vector<16x4xf32> to vector<15x4xf32>
    %852 = tpu.concatenate %41, %851 in 0 : vector<1x4xf32>, vector<15x4xf32> -> vector<16x4xf32>
    %853 = arith.addf %850, %852 : vector<16x4xf32>
    %854 = vector.extract_strided_slice %849 {offsets = [1, 0], sizes = [15, 4], strides = [1, 1]} : vector<16x4xf32> to vector<15x4xf32>
    %855 = tpu.concatenate %854, %41 in 0 : vector<15x4xf32>, vector<1x4xf32> -> vector<16x4xf32>
    %856 = arith.addf %853, %855 : vector<16x4xf32>
    %c1_411 = arith.constant 1 : index
    %c9_412 = arith.constant 9 : index
    %c0_413 = arith.constant 0 : index
    %c0_414 = arith.constant 0 : index
    %857 = vector.load %arg8[%c1_411, %c9_412, %c0_413, %c0_414] : memref<2x16x16x4xf32, #tpu.memory_space<vmem>>, vector<1x1x16x4xf32>
    %858 = vector.shape_cast %857 : vector<1x1x16x4xf32> to vector<16x4xf32>
    %859 = vector.shape_cast %856 : vector<16x4xf32> to vector<1x1x16x4xf32>
    tpu.vector_store %arg8[%c1_411, %c9_412, %c0_413, %c0_414], %859 {strides = array<i32>} : memref<2x16x16x4xf32, #tpu.memory_space<vmem>>, vector<1x1x16x4xf32>,
    %c1_415 = arith.constant 1 : index
    %c9_416 = arith.constant 9 : index
    %c0_417 = arith.constant 0 : index
    %c0_418 = arith.constant 0 : index
    %860 = vector.load %arg3[%c1_415, %c9_416, %c0_417, %c0_418] : memref<2x16x16x4xf32, #tpu.memory_space<vmem>>, vector<1x1x16x4xf32>
    %861 = vector.shape_cast %860 : vector<1x1x16x4xf32> to vector<16x4xf32>
    %c1_419 = arith.constant 1 : index
    %c10_420 = arith.constant 10 : index
    %c0_421 = arith.constant 0 : index
    %c0_422 = arith.constant 0 : index
    %862 = vector.load %arg3[%c1_419, %c10_420, %c0_421, %c0_422] : memref<2x16x16x4xf32, #tpu.memory_space<vmem>>, vector<1x1x16x4xf32>
    %863 = vector.shape_cast %862 : vector<1x1x16x4xf32> to vector<16x4xf32>
    %c1_423 = arith.constant 1 : index
    %c11_424 = arith.constant 11 : index
    %c0_425 = arith.constant 0 : index
    %c0_426 = arith.constant 0 : index
    %864 = vector.load %arg3[%c1_423, %c11_424, %c0_425, %c0_426] : memref<2x16x16x4xf32, #tpu.memory_space<vmem>>, vector<1x1x16x4xf32>
    %865 = vector.shape_cast %864 : vector<1x1x16x4xf32> to vector<16x4xf32>
    %866 = arith.mulf %861, %4 : vector<16x4xf32>
    %867 = arith.mulf %863, %16 : vector<16x4xf32>
    %868 = arith.addf %866, %867 : vector<16x4xf32>
    %869 = arith.mulf %865, %28 : vector<16x4xf32>
    %870 = arith.addf %868, %869 : vector<16x4xf32>
    %871 = arith.mulf %861, %8 : vector<16x4xf32>
    %872 = arith.mulf %863, %20 : vector<16x4xf32>
    %873 = arith.addf %871, %872 : vector<16x4xf32>
    %874 = arith.mulf %865, %32 : vector<16x4xf32>
    %875 = arith.addf %873, %874 : vector<16x4xf32>
    %876 = arith.mulf %861, %12 : vector<16x4xf32>
    %877 = arith.mulf %863, %24 : vector<16x4xf32>
    %878 = arith.addf %876, %877 : vector<16x4xf32>
    %879 = arith.mulf %865, %36 : vector<16x4xf32>
    %880 = arith.addf %878, %879 : vector<16x4xf32>
    %881 = arith.addf %40, %875 : vector<16x4xf32>
    %882 = vector.extract_strided_slice %870 {offsets = [0, 0], sizes = [15, 4], strides = [1, 1]} : vector<16x4xf32> to vector<15x4xf32>
    %883 = tpu.concatenate %41, %882 in 0 : vector<1x4xf32>, vector<15x4xf32> -> vector<16x4xf32>
    %884 = arith.addf %881, %883 : vector<16x4xf32>
    %885 = vector.extract_strided_slice %880 {offsets = [1, 0], sizes = [15, 4], strides = [1, 1]} : vector<16x4xf32> to vector<15x4xf32>
    %886 = tpu.concatenate %885, %41 in 0 : vector<15x4xf32>, vector<1x4xf32> -> vector<16x4xf32>
    %887 = arith.addf %884, %886 : vector<16x4xf32>
    %c1_427 = arith.constant 1 : index
    %c10_428 = arith.constant 10 : index
    %c0_429 = arith.constant 0 : index
    %c0_430 = arith.constant 0 : index
    %888 = vector.load %arg8[%c1_427, %c10_428, %c0_429, %c0_430] : memref<2x16x16x4xf32, #tpu.memory_space<vmem>>, vector<1x1x16x4xf32>
    %889 = vector.shape_cast %888 : vector<1x1x16x4xf32> to vector<16x4xf32>
    %890 = vector.shape_cast %887 : vector<16x4xf32> to vector<1x1x16x4xf32>
    tpu.vector_store %arg8[%c1_427, %c10_428, %c0_429, %c0_430], %890 {strides = array<i32>} : memref<2x16x16x4xf32, #tpu.memory_space<vmem>>, vector<1x1x16x4xf32>,
    %c1_431 = arith.constant 1 : index
    %c10_432 = arith.constant 10 : index
    %c0_433 = arith.constant 0 : index
    %c0_434 = arith.constant 0 : index
    %891 = vector.load %arg3[%c1_431, %c10_432, %c0_433, %c0_434] : memref<2x16x16x4xf32, #tpu.memory_space<vmem>>, vector<1x1x16x4xf32>
    %892 = vector.shape_cast %891 : vector<1x1x16x4xf32> to vector<16x4xf32>
    %c1_435 = arith.constant 1 : index
    %c11_436 = arith.constant 11 : index
    %c0_437 = arith.constant 0 : index
    %c0_438 = arith.constant 0 : index
    %893 = vector.load %arg3[%c1_435, %c11_436, %c0_437, %c0_438] : memref<2x16x16x4xf32, #tpu.memory_space<vmem>>, vector<1x1x16x4xf32>
    %894 = vector.shape_cast %893 : vector<1x1x16x4xf32> to vector<16x4xf32>
    %c1_439 = arith.constant 1 : index
    %c12_440 = arith.constant 12 : index
    %c0_441 = arith.constant 0 : index
    %c0_442 = arith.constant 0 : index
    %895 = vector.load %arg3[%c1_439, %c12_440, %c0_441, %c0_442] : memref<2x16x16x4xf32, #tpu.memory_space<vmem>>, vector<1x1x16x4xf32>
    %896 = vector.shape_cast %895 : vector<1x1x16x4xf32> to vector<16x4xf32>
    %897 = arith.mulf %892, %4 : vector<16x4xf32>
    %898 = arith.mulf %894, %16 : vector<16x4xf32>
    %899 = arith.addf %897, %898 : vector<16x4xf32>
    %900 = arith.mulf %896, %28 : vector<16x4xf32>
    %901 = arith.addf %899, %900 : vector<16x4xf32>
    %902 = arith.mulf %892, %8 : vector<16x4xf32>
    %903 = arith.mulf %894, %20 : vector<16x4xf32>
    %904 = arith.addf %902, %903 : vector<16x4xf32>
    %905 = arith.mulf %896, %32 : vector<16x4xf32>
    %906 = arith.addf %904, %905 : vector<16x4xf32>
    %907 = arith.mulf %892, %12 : vector<16x4xf32>
    %908 = arith.mulf %894, %24 : vector<16x4xf32>
    %909 = arith.addf %907, %908 : vector<16x4xf32>
    %910 = arith.mulf %896, %36 : vector<16x4xf32>
    %911 = arith.addf %909, %910 : vector<16x4xf32>
    %912 = arith.addf %40, %906 : vector<16x4xf32>
    %913 = vector.extract_strided_slice %901 {offsets = [0, 0], sizes = [15, 4], strides = [1, 1]} : vector<16x4xf32> to vector<15x4xf32>
    %914 = tpu.concatenate %41, %913 in 0 : vector<1x4xf32>, vector<15x4xf32> -> vector<16x4xf32>
    %915 = arith.addf %912, %914 : vector<16x4xf32>
    %916 = vector.extract_strided_slice %911 {offsets = [1, 0], sizes = [15, 4], strides = [1, 1]} : vector<16x4xf32> to vector<15x4xf32>
    %917 = tpu.concatenate %916, %41 in 0 : vector<15x4xf32>, vector<1x4xf32> -> vector<16x4xf32>
    %918 = arith.addf %915, %917 : vector<16x4xf32>
    %c1_443 = arith.constant 1 : index
    %c11_444 = arith.constant 11 : index
    %c0_445 = arith.constant 0 : index
    %c0_446 = arith.constant 0 : index
    %919 = vector.load %arg8[%c1_443, %c11_444, %c0_445, %c0_446] : memref<2x16x16x4xf32, #tpu.memory_space<vmem>>, vector<1x1x16x4xf32>
    %920 = vector.shape_cast %919 : vector<1x1x16x4xf32> to vector<16x4xf32>
    %921 = vector.shape_cast %918 : vector<16x4xf32> to vector<1x1x16x4xf32>
    tpu.vector_store %arg8[%c1_443, %c11_444, %c0_445, %c0_446], %921 {strides = array<i32>} : memref<2x16x16x4xf32, #tpu.memory_space<vmem>>, vector<1x1x16x4xf32>,
    %c1_447 = arith.constant 1 : index
    %c11_448 = arith.constant 11 : index
    %c0_449 = arith.constant 0 : index
    %c0_450 = arith.constant 0 : index
    %922 = vector.load %arg3[%c1_447, %c11_448, %c0_449, %c0_450] : memref<2x16x16x4xf32, #tpu.memory_space<vmem>>, vector<1x1x16x4xf32>
    %923 = vector.shape_cast %922 : vector<1x1x16x4xf32> to vector<16x4xf32>
    %c1_451 = arith.constant 1 : index
    %c12_452 = arith.constant 12 : index
    %c0_453 = arith.constant 0 : index
    %c0_454 = arith.constant 0 : index
    %924 = vector.load %arg3[%c1_451, %c12_452, %c0_453, %c0_454] : memref<2x16x16x4xf32, #tpu.memory_space<vmem>>, vector<1x1x16x4xf32>
    %925 = vector.shape_cast %924 : vector<1x1x16x4xf32> to vector<16x4xf32>
    %c1_455 = arith.constant 1 : index
    %c13_456 = arith.constant 13 : index
    %c0_457 = arith.constant 0 : index
    %c0_458 = arith.constant 0 : index
    %926 = vector.load %arg3[%c1_455, %c13_456, %c0_457, %c0_458] : memref<2x16x16x4xf32, #tpu.memory_space<vmem>>, vector<1x1x16x4xf32>
    %927 = vector.shape_cast %926 : vector<1x1x16x4xf32> to vector<16x4xf32>
    %928 = arith.mulf %923, %4 : vector<16x4xf32>
    %929 = arith.mulf %925, %16 : vector<16x4xf32>
    %930 = arith.addf %928, %929 : vector<16x4xf32>
    %931 = arith.mulf %927, %28 : vector<16x4xf32>
    %932 = arith.addf %930, %931 : vector<16x4xf32>
    %933 = arith.mulf %923, %8 : vector<16x4xf32>
    %934 = arith.mulf %925, %20 : vector<16x4xf32>
    %935 = arith.addf %933, %934 : vector<16x4xf32>
    %936 = arith.mulf %927, %32 : vector<16x4xf32>
    %937 = arith.addf %935, %936 : vector<16x4xf32>
    %938 = arith.mulf %923, %12 : vector<16x4xf32>
    %939 = arith.mulf %925, %24 : vector<16x4xf32>
    %940 = arith.addf %938, %939 : vector<16x4xf32>
    %941 = arith.mulf %927, %36 : vector<16x4xf32>
    %942 = arith.addf %940, %941 : vector<16x4xf32>
    %943 = arith.addf %40, %937 : vector<16x4xf32>
    %944 = vector.extract_strided_slice %932 {offsets = [0, 0], sizes = [15, 4], strides = [1, 1]} : vector<16x4xf32> to vector<15x4xf32>
    %945 = tpu.concatenate %41, %944 in 0 : vector<1x4xf32>, vector<15x4xf32> -> vector<16x4xf32>
    %946 = arith.addf %943, %945 : vector<16x4xf32>
    %947 = vector.extract_strided_slice %942 {offsets = [1, 0], sizes = [15, 4], strides = [1, 1]} : vector<16x4xf32> to vector<15x4xf32>
    %948 = tpu.concatenate %947, %41 in 0 : vector<15x4xf32>, vector<1x4xf32> -> vector<16x4xf32>
    %949 = arith.addf %946, %948 : vector<16x4xf32>
    %c1_459 = arith.constant 1 : index
    %c12_460 = arith.constant 12 : index
    %c0_461 = arith.constant 0 : index
    %c0_462 = arith.constant 0 : index
    %950 = vector.load %arg8[%c1_459, %c12_460, %c0_461, %c0_462] : memref<2x16x16x4xf32, #tpu.memory_space<vmem>>, vector<1x1x16x4xf32>
    %951 = vector.shape_cast %950 : vector<1x1x16x4xf32> to vector<16x4xf32>
    %952 = vector.shape_cast %949 : vector<16x4xf32> to vector<1x1x16x4xf32>
    tpu.vector_store %arg8[%c1_459, %c12_460, %c0_461, %c0_462], %952 {strides = array<i32>} : memref<2x16x16x4xf32, #tpu.memory_space<vmem>>, vector<1x1x16x4xf32>,
    %c1_463 = arith.constant 1 : index
    %c12_464 = arith.constant 12 : index
    %c0_465 = arith.constant 0 : index
    %c0_466 = arith.constant 0 : index
    %953 = vector.load %arg3[%c1_463, %c12_464, %c0_465, %c0_466] : memref<2x16x16x4xf32, #tpu.memory_space<vmem>>, vector<1x1x16x4xf32>
    %954 = vector.shape_cast %953 : vector<1x1x16x4xf32> to vector<16x4xf32>
    %c1_467 = arith.constant 1 : index
    %c13_468 = arith.constant 13 : index
    %c0_469 = arith.constant 0 : index
    %c0_470 = arith.constant 0 : index
    %955 = vector.load %arg3[%c1_467, %c13_468, %c0_469, %c0_470] : memref<2x16x16x4xf32, #tpu.memory_space<vmem>>, vector<1x1x16x4xf32>
    %956 = vector.shape_cast %955 : vector<1x1x16x4xf32> to vector<16x4xf32>
    %c1_471 = arith.constant 1 : index
    %c14_472 = arith.constant 14 : index
    %c0_473 = arith.constant 0 : index
    %c0_474 = arith.constant 0 : index
    %957 = vector.load %arg3[%c1_471, %c14_472, %c0_473, %c0_474] : memref<2x16x16x4xf32, #tpu.memory_space<vmem>>, vector<1x1x16x4xf32>
    %958 = vector.shape_cast %957 : vector<1x1x16x4xf32> to vector<16x4xf32>
    %959 = arith.mulf %954, %4 : vector<16x4xf32>
    %960 = arith.mulf %956, %16 : vector<16x4xf32>
    %961 = arith.addf %959, %960 : vector<16x4xf32>
    %962 = arith.mulf %958, %28 : vector<16x4xf32>
    %963 = arith.addf %961, %962 : vector<16x4xf32>
    %964 = arith.mulf %954, %8 : vector<16x4xf32>
    %965 = arith.mulf %956, %20 : vector<16x4xf32>
    %966 = arith.addf %964, %965 : vector<16x4xf32>
    %967 = arith.mulf %958, %32 : vector<16x4xf32>
    %968 = arith.addf %966, %967 : vector<16x4xf32>
    %969 = arith.mulf %954, %12 : vector<16x4xf32>
    %970 = arith.mulf %956, %24 : vector<16x4xf32>
    %971 = arith.addf %969, %970 : vector<16x4xf32>
    %972 = arith.mulf %958, %36 : vector<16x4xf32>
    %973 = arith.addf %971, %972 : vector<16x4xf32>
    %974 = arith.addf %40, %968 : vector<16x4xf32>
    %975 = vector.extract_strided_slice %963 {offsets = [0, 0], sizes = [15, 4], strides = [1, 1]} : vector<16x4xf32> to vector<15x4xf32>
    %976 = tpu.concatenate %41, %975 in 0 : vector<1x4xf32>, vector<15x4xf32> -> vector<16x4xf32>
    %977 = arith.addf %974, %976 : vector<16x4xf32>
    %978 = vector.extract_strided_slice %973 {offsets = [1, 0], sizes = [15, 4], strides = [1, 1]} : vector<16x4xf32> to vector<15x4xf32>
    %979 = tpu.concatenate %978, %41 in 0 : vector<15x4xf32>, vector<1x4xf32> -> vector<16x4xf32>
    %980 = arith.addf %977, %979 : vector<16x4xf32>
    %c1_475 = arith.constant 1 : index
    %c13_476 = arith.constant 13 : index
    %c0_477 = arith.constant 0 : index
    %c0_478 = arith.constant 0 : index
    %981 = vector.load %arg8[%c1_475, %c13_476, %c0_477, %c0_478] : memref<2x16x16x4xf32, #tpu.memory_space<vmem>>, vector<1x1x16x4xf32>
    %982 = vector.shape_cast %981 : vector<1x1x16x4xf32> to vector<16x4xf32>
    %983 = vector.shape_cast %980 : vector<16x4xf32> to vector<1x1x16x4xf32>
    tpu.vector_store %arg8[%c1_475, %c13_476, %c0_477, %c0_478], %983 {strides = array<i32>} : memref<2x16x16x4xf32, #tpu.memory_space<vmem>>, vector<1x1x16x4xf32>,
    %c1_479 = arith.constant 1 : index
    %c13_480 = arith.constant 13 : index
    %c0_481 = arith.constant 0 : index
    %c0_482 = arith.constant 0 : index
    %984 = vector.load %arg3[%c1_479, %c13_480, %c0_481, %c0_482] : memref<2x16x16x4xf32, #tpu.memory_space<vmem>>, vector<1x1x16x4xf32>
    %985 = vector.shape_cast %984 : vector<1x1x16x4xf32> to vector<16x4xf32>
    %c1_483 = arith.constant 1 : index
    %c14_484 = arith.constant 14 : index
    %c0_485 = arith.constant 0 : index
    %c0_486 = arith.constant 0 : index
    %986 = vector.load %arg3[%c1_483, %c14_484, %c0_485, %c0_486] : memref<2x16x16x4xf32, #tpu.memory_space<vmem>>, vector<1x1x16x4xf32>
    %987 = vector.shape_cast %986 : vector<1x1x16x4xf32> to vector<16x4xf32>
    %c1_487 = arith.constant 1 : index
    %c15_488 = arith.constant 15 : index
    %c0_489 = arith.constant 0 : index
    %c0_490 = arith.constant 0 : index
    %988 = vector.load %arg3[%c1_487, %c15_488, %c0_489, %c0_490] : memref<2x16x16x4xf32, #tpu.memory_space<vmem>>, vector<1x1x16x4xf32>
    %989 = vector.shape_cast %988 : vector<1x1x16x4xf32> to vector<16x4xf32>
    %990 = arith.mulf %985, %4 : vector<16x4xf32>
    %991 = arith.mulf %987, %16 : vector<16x4xf32>
    %992 = arith.addf %990, %991 : vector<16x4xf32>
    %993 = arith.mulf %989, %28 : vector<16x4xf32>
    %994 = arith.addf %992, %993 : vector<16x4xf32>
    %995 = arith.mulf %985, %8 : vector<16x4xf32>
    %996 = arith.mulf %987, %20 : vector<16x4xf32>
    %997 = arith.addf %995, %996 : vector<16x4xf32>
    %998 = arith.mulf %989, %32 : vector<16x4xf32>
    %999 = arith.addf %997, %998 : vector<16x4xf32>
    %1000 = arith.mulf %985, %12 : vector<16x4xf32>
    %1001 = arith.mulf %987, %24 : vector<16x4xf32>
    %1002 = arith.addf %1000, %1001 : vector<16x4xf32>
    %1003 = arith.mulf %989, %36 : vector<16x4xf32>
    %1004 = arith.addf %1002, %1003 : vector<16x4xf32>
    %1005 = arith.addf %40, %999 : vector<16x4xf32>
    %1006 = vector.extract_strided_slice %994 {offsets = [0, 0], sizes = [15, 4], strides = [1, 1]} : vector<16x4xf32> to vector<15x4xf32>
    %1007 = tpu.concatenate %41, %1006 in 0 : vector<1x4xf32>, vector<15x4xf32> -> vector<16x4xf32>
    %1008 = arith.addf %1005, %1007 : vector<16x4xf32>
    %1009 = vector.extract_strided_slice %1004 {offsets = [1, 0], sizes = [15, 4], strides = [1, 1]} : vector<16x4xf32> to vector<15x4xf32>
    %1010 = tpu.concatenate %1009, %41 in 0 : vector<15x4xf32>, vector<1x4xf32> -> vector<16x4xf32>
    %1011 = arith.addf %1008, %1010 : vector<16x4xf32>
    %c1_491 = arith.constant 1 : index
    %c14_492 = arith.constant 14 : index
    %c0_493 = arith.constant 0 : index
    %c0_494 = arith.constant 0 : index
    %1012 = vector.load %arg8[%c1_491, %c14_492, %c0_493, %c0_494] : memref<2x16x16x4xf32, #tpu.memory_space<vmem>>, vector<1x1x16x4xf32>
    %1013 = vector.shape_cast %1012 : vector<1x1x16x4xf32> to vector<16x4xf32>
    %1014 = vector.shape_cast %1011 : vector<16x4xf32> to vector<1x1x16x4xf32>
    tpu.vector_store %arg8[%c1_491, %c14_492, %c0_493, %c0_494], %1014 {strides = array<i32>} : memref<2x16x16x4xf32, #tpu.memory_space<vmem>>, vector<1x1x16x4xf32>,
    %c1_495 = arith.constant 1 : index
    %c14_496 = arith.constant 14 : index
    %c0_497 = arith.constant 0 : index
    %c0_498 = arith.constant 0 : index
    %1015 = vector.load %arg3[%c1_495, %c14_496, %c0_497, %c0_498] : memref<2x16x16x4xf32, #tpu.memory_space<vmem>>, vector<1x1x16x4xf32>
    %1016 = vector.shape_cast %1015 : vector<1x1x16x4xf32> to vector<16x4xf32>
    %c1_499 = arith.constant 1 : index
    %c15_500 = arith.constant 15 : index
    %c0_501 = arith.constant 0 : index
    %c0_502 = arith.constant 0 : index
    %1017 = vector.load %arg3[%c1_499, %c15_500, %c0_501, %c0_502] : memref<2x16x16x4xf32, #tpu.memory_space<vmem>>, vector<1x1x16x4xf32>
    %1018 = vector.shape_cast %1017 : vector<1x1x16x4xf32> to vector<16x4xf32>
    %1019 = arith.mulf %1016, %4 : vector<16x4xf32>
    %1020 = arith.mulf %1018, %16 : vector<16x4xf32>
    %1021 = arith.addf %1019, %1020 : vector<16x4xf32>
    %1022 = arith.mulf %551, %28 : vector<16x4xf32>
    %1023 = arith.addf %1021, %1022 : vector<16x4xf32>
    %1024 = arith.mulf %1016, %8 : vector<16x4xf32>
    %1025 = arith.mulf %1018, %20 : vector<16x4xf32>
    %1026 = arith.addf %1024, %1025 : vector<16x4xf32>
    %1027 = arith.mulf %551, %32 : vector<16x4xf32>
    %1028 = arith.addf %1026, %1027 : vector<16x4xf32>
    %1029 = arith.mulf %1016, %12 : vector<16x4xf32>
    %1030 = arith.mulf %1018, %24 : vector<16x4xf32>
    %1031 = arith.addf %1029, %1030 : vector<16x4xf32>
    %1032 = arith.mulf %551, %36 : vector<16x4xf32>
    %1033 = arith.addf %1031, %1032 : vector<16x4xf32>
    %1034 = arith.addf %40, %1028 : vector<16x4xf32>
    %1035 = vector.extract_strided_slice %1023 {offsets = [0, 0], sizes = [15, 4], strides = [1, 1]} : vector<16x4xf32> to vector<15x4xf32>
    %1036 = tpu.concatenate %41, %1035 in 0 : vector<1x4xf32>, vector<15x4xf32> -> vector<16x4xf32>
    %1037 = arith.addf %1034, %1036 : vector<16x4xf32>
    %1038 = vector.extract_strided_slice %1033 {offsets = [1, 0], sizes = [15, 4], strides = [1, 1]} : vector<16x4xf32> to vector<15x4xf32>
    %1039 = tpu.concatenate %1038, %41 in 0 : vector<15x4xf32>, vector<1x4xf32> -> vector<16x4xf32>
    %1040 = arith.addf %1037, %1039 : vector<16x4xf32>
    %c1_503 = arith.constant 1 : index
    %c15_504 = arith.constant 15 : index
    %c0_505 = arith.constant 0 : index
    %c0_506 = arith.constant 0 : index
    %1041 = vector.load %arg8[%c1_503, %c15_504, %c0_505, %c0_506] : memref<2x16x16x4xf32, #tpu.memory_space<vmem>>, vector<1x1x16x4xf32>
    %1042 = vector.shape_cast %1041 : vector<1x1x16x4xf32> to vector<16x4xf32>
    %1043 = vector.shape_cast %1040 : vector<16x4xf32> to vector<1x1x16x4xf32>
    tpu.vector_store %arg8[%c1_503, %c15_504, %c0_505, %c0_506], %1043 {strides = array<i32>} : memref<2x16x16x4xf32, #tpu.memory_space<vmem>>, vector<1x1x16x4xf32>,
    return
  }
  func.func @transform_0(%arg0: i32, %arg1: i32, %arg2: i32) -> (i32, i32, i32, i32) {
    %c0_i32 = arith.constant 0 : i32
    %c0_i32_0 = arith.constant 0 : i32
    return %arg0, %arg2, %c0_i32, %arg1 : i32, i32, i32, i32
  }
  func.func @transform_1(%arg0: i32, %arg1: i32, %arg2: i32) -> (i32, i32, i32, i32) {
    %c16_i32 = arith.constant 16 : i32
    %0 = arith.muli %arg2, %c16_i32 : i32
    %c1_i32 = arith.constant 1 : i32
    %1 = arith.subi %0, %c1_i32 : i32
    %c0_i32 = arith.constant 0 : i32
    %2 = arith.maxsi %1, %c0_i32 : i32
    %c0_i32_0 = arith.constant 0 : i32
    %c0_i32_1 = arith.constant 0 : i32
    return %arg0, %2, %c0_i32_0, %arg1 : i32, i32, i32, i32
  }
  func.func @transform_2(%arg0: i32, %arg1: i32, %arg2: i32) -> (i32, i32, i32, i32) {
    %c1_i32 = arith.constant 1 : i32
    %0 = arith.addi %arg2, %c1_i32 : i32
    %c16_i32 = arith.constant 16 : i32
    %1 = arith.muli %0, %c16_i32 : i32
    %c15_i32 = arith.constant 15 : i32
    %2 = arith.minsi %1, %c15_i32 : i32
    %c0_i32 = arith.constant 0 : i32
    %c0_i32_0 = arith.constant 0 : i32
    return %arg0, %2, %c0_i32, %arg1 : i32, i32, i32, i32
  }
  func.func @transform_3(%arg0: i32, %arg1: i32, %arg2: i32) -> (i32, i32, i32) {
    %c0_i32 = arith.constant 0 : i32
    %c0_i32_0 = arith.constant 0 : i32
    %c0_i32_1 = arith.constant 0 : i32
    return %c0_i32, %c0_i32_0, %arg1 : i32, i32, i32
  }
  func.func @transform_4(%arg0: i32, %arg1: i32, %arg2: i32) -> (i32, i32, i32) {
    %c0_i32 = arith.constant 0 : i32
    %c0_i32_0 = arith.constant 0 : i32
    %c0_i32_1 = arith.constant 0 : i32
    return %c0_i32, %c0_i32_0, %arg1 : i32, i32, i32
  }
  func.func @transform_5(%arg0: i32, %arg1: i32, %arg2: i32) -> (i32, i32, i32, i32) {
    %c0_i32 = arith.constant 0 : i32
    %c0_i32_0 = arith.constant 0 : i32
    return %arg0, %arg2, %c0_i32, %arg1 : i32, i32, i32, i32
  }
}

</mosaic_0001>

<bundles_post_ra>
// kernel: tpu_custom_call.1
= control target key start
LH: loop header
LB: loop body
LE: loop exit
PB: predicated region body
PF: predicated region fallthrough
CT: control target
= control target key end

     0   :  { %v137_v0 = vlaneseq  ;;  %vm231_vm0 = vcmask 1040384   ;;  %vm242_vm1 = vcmask 1046528   ;;  %vm251_vm2 = vcmask 31744   ;;  %s4422_s0 = inlined_call_operand.vmem [shape: f32[2,16,16,4], index: 0, kind: input, shape index: {}]   ;;  %s4423_s1 = inlined_call_operand.vmem [shape: f32[2,16,16,4], index: 1, kind: input, shape index: {}]   ;;  %s4424_s2 = inlined_call_operand.vmem [shape: f32[2,16,16,4], index: 2, kind: input, shape index: {}]   ;;  %s4425_s3 = inlined_call_operand.vmem [shape: f32[3,3,4], index: 3, kind: input, shape index: {}]   ;;  %s4426_s4 = inlined_call_operand.vmem [shape: f32[1,1,4], index: 4, kind: input, shape index: {}]   ;;  %s4427_s5 = inlined_call_operand.vmem [shape: f32[2,16,16,4], index: 5, kind: output, shape index: {}]  }
   0x1   :  { %v134_v2 = vld [vmem:[%s4425_s3] sm:$0x7]  ;;  %v135_v3 = vld [vmem:[%s4425_s3 + $0x4] sm:$0x7]  ;;  %v136_v4 = vld [vmem:[%s4425_s3 + $0x8] sm:$0x7] }
   0x2   :  { %v138_v1 = vshrl.u32 %v137_v0, 7  ;;  %v2486_v8 = vld [vmem:[%s4422_s0] sm:$0xff]  ;;  %v2509_v18 = vld [vmem:[%s4422_s0 + $0x8] sm:$0xff]  ;;  %v2514_v19 = vld [vmem:[%s4422_s0 + $0x10] sm:$0xff] }
   0x3   :  { %v2536_v27 = vld [vmem:[%s4422_s0 + $0x18] sm:$0xff]  ;;  %v2555_v36 = vld [vmem:[%s4426_s4] ss:$0 sm:$0xff] }
   0x4   :  { %v139_v5 = vsub.s32 0, %v138_v1  ;;  %v143_v6 = vsub.s32 1, %v138_v1  ;;  %v147_v7 = vsub.s32 2, %v138_v1  ;;  %v2570_v49 = vld [vmem:[%s4422_s0 + $0x20] sm:$0xff] }
   0x6   :  { %v2488_v9 = vrot.slane %v134_v2, %v139_v5  ;;  %v2490_v10 = vrot.slane %v134_v2, %v143_v6  ;;  %v2492_v11 = vrot.slane %v134_v2, %v147_v7  ;;  %v2494_v12 = vrot.slane %v135_v3, %v139_v5 }
   0x7   :  { %v2496_v13 = vrot.slane %v135_v3, %v143_v6  ;;  %v2498_v14 = vrot.slane %v135_v3, %v147_v7  ;;  %v2500_v15 = vrot.slane %v136_v4, %v139_v5  ;;  %v2502_v16 = vrot.slane %v136_v4, %v143_v6 }
   0x8   :  { %v2504_v17 = vrot.slane %v136_v4, %v147_v7  ;;  %v2517_v20 = vmul.f32 0.0, %v2488_v9  ;;  %v199_v21 = vmul.f32 %v2486_v8, %v2494_v12  ;;  %v2522_v22 = vmul.f32 0.0, %v2490_v10  ;;  %v2591_v7 = vld [vmem:[%s4422_s0 + $0x28] sm:$0xff] }
   0x9   :  { %v203_v23 = vmul.f32 %v2514_v19, %v2500_v15  ;;  %v209_v24 = vmul.f32 %v2486_v8, %v2496_v13  ;;  %v213_v25 = vmul.f32 %v2514_v19, %v2502_v16  ;;  %v2531_v26 = vmul.f32 0.0, %v2492_v11 }
   0xa   :  { %v201_v28 = vadd.f32 %v199_v21, %v2517_v20  ;;  %v219_v29 = vmul.f32 %v2486_v8, %v2498_v14  ;;  %v220_v30 = vmul.f32 %v2509_v18, %v2498_v14  ;;  %v223_v31 = vmul.f32 %v2514_v19, %v2504_v17 }
   0xb   :  { %v211_v32 = vadd.f32 %v209_v24, %v2522_v22  ;;  %v224_v33 = vmul.f32 %v2536_v27, %v2504_v17  ;;  %v200_v34 = vmul.f32 %v2509_v18, %v2494_v12  ;;  %v204_v35 = vmul.f32 %v2536_v27, %v2500_v15 }
   0xc   :  { %v205_v37 = vadd.f32 %v203_v23, %v201_v28  ;;  %v221_v38 = vadd.f32 %v219_v29, %v2531_v26  ;;  %v222_v39 = vadd.f32 %v220_v30, %v2531_v26  ;;  %v210_v40 = vmul.f32 %v2509_v18, %v2496_v13 }
   0xd   :  { %v215_v41 = vadd.f32 %v213_v25, %v211_v32  ;;  %v202_v42 = vadd.f32 %v200_v34, %v2517_v20  ;;  %v214_v43 = vmul.f32 %v2536_v27, %v2502_v16  ;;  %v261_v44 = vmul.f32 %v2486_v8, %v2488_v9 }
   0xe   :  { %v225_v45 = vadd.f32 %v223_v31, %v221_v38  ;;  %v226_v46 = vadd.f32 %v224_v33, %v222_v39  ;;  %v232_v47 = vrot.slane %v205_v37, 7  ;;  %v212_v48 = vadd.f32 %v210_v40, %v2522_v22 }
   0xf   :  { %v227_v50 = vadd.f32 %v2555_v36, %v215_v41  ;;  %v206_v51 = vadd.f32 %v204_v35, %v202_v42  ;;  %v263_v52 = vmul.f32 %v2514_v19, %v2494_v12  ;;  %v267_v53 = vmul.f32 %v2570_v49, %v2500_v15 }
  0x10   :  { %v237_v54 = vsel %vm231_vm0, 0.0, %v232_v47  ;;  %v243_v55 = vrot.slane %v225_v45, 1  ;;  %v244_v56 = vrot.slane %v226_v46, 1  ;;  %v216_v57 = vadd.f32 %v214_v43, %v212_v48 }
  0x11   :  { %v238_v58 = vadd.f32 %v237_v54, %v227_v50  ;;  %v233_v59 = vrot.slane %v206_v51, 7  ;;  %v265_v60 = vadd.f32 %v263_v52, %v261_v44  ;;  %v271_v61 = vmul.f32 %v2486_v8, %v2490_v10  ;;  %v2630_v50 = vld [vmem:[%s4422_s0 + $0x30] sm:$0xff] }
  0x12   :  { %v245_v62 = vsel %vm242_vm1, %v243_v55, %v244_v56  ;;  %v228_v63 = vadd.f32 %v2555_v36, %v216_v57  ;;  %v248_v0 = vsel %vm242_vm1, %v244_v56, 0.0  ;;  %v273_v1 = vmul.f32 %v2514_v19, %v2496_v13 }
  0x13   :  { %v249_v2 = vadd.f32 %v245_v62, %v238_v58  ;;  %v234_v3 = vsel %vm231_vm0, %v232_v47, %v233_v59  ;;  %v269_v4 = vadd.f32 %v267_v53, %v265_v60  ;;  %v277_v5 = vmul.f32 %v2570_v49, %v2502_v16 }
  0x14   :  { %v239_v6 = vadd.f32 %v234_v3, %v228_v63  ;;  %v275_v21 = vadd.f32 %v273_v1, %v271_v61  ;;  %v281_v23 = vmul.f32 %v2486_v8, %v2492_v11  ;;  %v282_v24 = vmul.f32 %v2509_v18, %v2492_v11 }
  0x15   :  { %252 = vst.msk [vmem:[%s4427_s5] sm:$0xff] %vm251_vm2, %v249_v2  ;;  %v283_v25 = vmul.f32 %v2514_v19, %v2498_v14  ;;  %v284_v28 = vmul.f32 %v2536_v27, %v2498_v14  ;;  %v287_v29 = vmul.f32 %v2570_v49, %v2504_v17  ;;  %v288_v8 = vmul.f32 %v2591_v7, %v2504_v17 }
  0x16   :  { %v250_v30 = vadd.f32 %v248_v0, %v239_v6  ;;  %v279_v31 = vadd.f32 %v277_v5, %v275_v21  ;;  %v295_v32 = vrot.slane %v269_v4, 7  ;;  %v262_v33 = vmul.f32 %v2509_v18, %v2488_v9 }
  0x17   :  { %v285_v34 = vadd.f32 %v283_v25, %v281_v23  ;;  %v286_v35 = vadd.f32 %v284_v28, %v282_v24  ;;  %v264_v37 = vmul.f32 %v2536_v27, %v2494_v12  ;;  %v268_v38 = vmul.f32 %v2591_v7, %v2500_v15  ;;  %v2661_v24 = vld [vmem:[%s4422_s0 + $0x38] sm:$0xff] }
  0x18   :  { %253 = vst.msk [vmem:[%s4427_s5 + $0x8] sm:$0xff] %vm251_vm2, %v250_v30  ;;  %v291_v39 = vadd.f32 %v2555_v36, %v279_v31  ;;  %v300_v40 = vsel %vm231_vm0, 0.0, %v295_v32  ;;  %v272_v41 = vmul.f32 %v2509_v18, %v2490_v10  ;;  %v274_v42 = vmul.f32 %v2536_v27, %v2496_v13 }
  0x19   :  { %v289_v43 = vadd.f32 %v287_v29, %v285_v34  ;;  %v290_v44 = vadd.f32 %v288_v8, %v286_v35  ;;  %v266_v45 = vadd.f32 %v264_v37, %v262_v33  ;;  %v278_v46 = vmul.f32 %v2591_v7, %v2502_v16 }
  0x1a   :  { %v301_v47 = vadd.f32 %v300_v40, %v291_v39  ;;  %v276_v48 = vadd.f32 %v274_v42, %v272_v41  ;;  %v323_v51 = vmul.f32 %v2514_v19, %v2488_v9  ;;  %v325_v18 = vmul.f32 %v2570_v49, %v2494_v12 }
  0x1b   :  { %v305_v52 = vrot.slane %v289_v43, 1  ;;  %v306_v53 = vrot.slane %v290_v44, 1  ;;  %v270_v54 = vadd.f32 %v268_v38, %v266_v45  ;;  %v329_v55 = vmul.f32 %v2630_v50, %v2500_v15 }
  0x1c   :  { %v280_v56 = vadd.f32 %v278_v46, %v276_v48  ;;  %v327_v57 = vadd.f32 %v325_v18, %v323_v51  ;;  %v333_v58 = vmul.f32 %v2514_v19, %v2490_v10  ;;  %v335_v59 = vmul.f32 %v2570_v49, %v2496_v13 }
  0x1d   :  { %v307_v60 = vsel %vm242_vm1, %v305_v52, %v306_v53  ;;  %v296_v61 = vrot.slane %v270_v54, 7  ;;  %v310_v62 = vsel %vm242_vm1, %v306_v53, 0.0  ;;  %v339_v63 = vmul.f32 %v2630_v50, %v2502_v16 }
  0x1e   :  { %v311_v0 = vadd.f32 %v307_v60, %v301_v47  ;;  %v292_v1 = vadd.f32 %v2555_v36, %v280_v56  ;;  %v331_v2 = vadd.f32 %v329_v55, %v327_v57  ;;  %v337_v3 = vadd.f32 %v335_v59, %v333_v58  ;;  %v2690_v47 = vld [vmem:[%s4422_s0 + $0x40] sm:$0xff] }
  0x1f   :  { %v297_v4 = vsel %vm231_vm0, %v295_v32, %v296_v61  ;;  %v343_v5 = vmul.f32 %v2514_v19, %v2492_v11  ;;  %v344_v6 = vmul.f32 %v2536_v27, %v2492_v11  ;;  %v345_v21 = vmul.f32 %v2570_v49, %v2498_v14 }
  0x20   :  { %2206 = vst.msk [vmem:[%s4427_s5 + $0x10] sm:$0xff] %vm251_vm2, %v311_v0  ;;  %v302_v23 = vadd.f32 %v297_v4, %v292_v1  ;;  %v341_v25 = vadd.f32 %v339_v63, %v337_v3  ;;  %v346_v19 = vmul.f32 %v2591_v7, %v2498_v14  ;;  %v349_v28 = vmul.f32 %v2630_v50, %v2504_v17  ;;  %v2713_v4 = vld [vmem:[%s4422_s0 + $0x48] sm:$0xff] }
  0x21   :  { %v347_v29 = vadd.f32 %v345_v21, %v343_v5  ;;  %v350_v8 = vmul.f32 %v2661_v24, %v2504_v17  ;;  %v357_v30 = vrot.slane %v331_v2, 7  ;;  %v324_v31 = vmul.f32 %v2536_v27, %v2488_v9 }
  0x22   :  { %v312_v32 = vadd.f32 %v310_v62, %v302_v23  ;;  %v348_v33 = vadd.f32 %v346_v19, %v344_v6  ;;  %v353_v34 = vadd.f32 %v2555_v36, %v341_v25  ;;  %v326_v35 = vmul.f32 %v2591_v7, %v2494_v12 }
  0x23   :  { %v351_v37 = vadd.f32 %v349_v28, %v347_v29  ;;  %v362_v38 = vsel %vm231_vm0, 0.0, %v357_v30  ;;  %v330_v39 = vmul.f32 %v2661_v24, %v2500_v15  ;;  %v334_v40 = vmul.f32 %v2536_v27, %v2490_v10 }
  0x24   :  { %2207 = vst.msk [vmem:[%s4427_s5 + $0x18] sm:$0xff] %vm251_vm2, %v312_v32  ;;  %v352_v41 = vadd.f32 %v350_v8, %v348_v33  ;;  %v363_v42 = vadd.f32 %v362_v38, %v353_v34  ;;  %v328_v43 = vadd.f32 %v326_v35, %v324_v31  ;;  %v336_v44 = vmul.f32 %v2591_v7, %v2496_v13 }
  0x25   :  { %v367_v45 = vrot.slane %v351_v37, 1  ;;  %v340_v46 = vmul.f32 %v2661_v24, %v2502_v16  ;;  %v385_v27 = vmul.f32 %v2570_v49, %v2488_v9  ;;  %v387_v48 = vmul.f32 %v2630_v50, %v2494_v12 }
  0x26   :  { %v368_v51 = vrot.slane %v352_v41, 1  ;;  %v332_v18 = vadd.f32 %v330_v39, %v328_v43  ;;  %v338_v52 = vadd.f32 %v336_v44, %v334_v40  ;;  %v391_v53 = vmul.f32 %v2690_v47, %v2500_v15 }
  0x27   :  { %v389_v54 = vadd.f32 %v387_v48, %v385_v27  ;;  %v395_v55 = vmul.f32 %v2570_v49, %v2490_v10  ;;  %v397_v56 = vmul.f32 %v2630_v50, %v2496_v13  ;;  %v401_v57 = vmul.f32 %v2690_v47, %v2502_v16 }
  0x28   :  { %v369_v58 = vsel %vm242_vm1, %v367_v45, %v368_v51  ;;  %v342_v59 = vadd.f32 %v340_v46, %v338_v52  ;;  %v358_v60 = vrot.slane %v332_v18, 7  ;;  %v372_v61 = vsel %vm242_vm1, %v368_v51, 0.0  ;;  %v2750_v45 = vld [vmem:[%s4422_s0 + $0x50] sm:$0xff] }
  0x29   :  { %v373_v62 = vadd.f32 %v369_v58, %v363_v42  ;;  %v393_v63 = vadd.f32 %v391_v53, %v389_v54  ;;  %v399_v0 = vadd.f32 %v397_v56, %v395_v55  ;;  %v405_v1 = vmul.f32 %v2570_v49, %v2492_v11 }
  0x2a   :  { %v354_v2 = vadd.f32 %v2555_v36, %v342_v59  ;;  %v359_v3 = vsel %vm231_vm0, %v357_v30, %v358_v60  ;;  %v406_v5 = vmul.f32 %v2591_v7, %v2492_v11  ;;  %v407_v6 = vmul.f32 %v2630_v50, %v2498_v14 }
  0x2b   :  { %2214 = vst.msk [vmem:[%s4427_s5 + $0x20] sm:$0xff] %vm251_vm2, %v373_v62  ;;  %v403_v49 = vadd.f32 %v401_v57, %v399_v0  ;;  %v408_v21 = vmul.f32 %v2661_v24, %v2498_v14  ;;  %v411_v23 = vmul.f32 %v2690_v47, %v2504_v17  ;;  %v412_v25 = vmul.f32 %v2713_v4, %v2504_v17 }
  0x2c   :  { %v364_v19 = vadd.f32 %v359_v3, %v354_v2  ;;  %v409_v28 = vadd.f32 %v407_v6, %v405_v1  ;;  %v419_v29 = vrot.slane %v393_v63, 7  ;;  %v386_v8 = vmul.f32 %v2591_v7, %v2488_v9  ;;  %v2773_v2 = vld [vmem:[%s4422_s0 + $0x58] sm:$0xff] }
  0x2d   :  { %v410_v30 = vadd.f32 %v408_v21, %v406_v5  ;;  %v415_v31 = vadd.f32 %v2555_v36, %v403_v49  ;;  %v388_v32 = vmul.f32 %v2661_v24, %v2494_v12  ;;  %v392_v33 = vmul.f32 %v2713_v4, %v2500_v15 }
  0x2e   :  { %v374_v34 = vadd.f32 %v372_v61, %v364_v19  ;;  %v413_v35 = vadd.f32 %v411_v23, %v409_v28  ;;  %v424_v37 = vsel %vm231_vm0, 0.0, %v419_v29  ;;  %v396_v38 = vmul.f32 %v2591_v7, %v2490_v10 }
  0x2f   :  { %v414_v39 = vadd.f32 %v412_v25, %v410_v30  ;;  %v425_v40 = vadd.f32 %v424_v37, %v415_v31  ;;  %v390_v41 = vadd.f32 %v388_v32, %v386_v8  ;;  %v398_v42 = vmul.f32 %v2661_v24, %v2496_v13 }
  0x30   :  { %2215 = vst.msk [vmem:[%s4427_s5 + $0x28] sm:$0xff] %vm251_vm2, %v374_v34  ;;  %v429_v43 = vrot.slane %v413_v35, 1  ;;  %v402_v44 = vmul.f32 %v2713_v4, %v2502_v16  ;;  %v447_v7 = vmul.f32 %v2630_v50, %v2488_v9  ;;  %v449_v46 = vmul.f32 %v2690_v47, %v2494_v12 }
  0x31   :  { %v430_v27 = vrot.slane %v414_v39, 1  ;;  %v394_v48 = vadd.f32 %v392_v33, %v390_v41  ;;  %v400_v51 = vadd.f32 %v398_v42, %v396_v38  ;;  %v453_v18 = vmul.f32 %v2750_v45, %v2500_v15 }
  0x32   :  { %v451_v52 = vadd.f32 %v449_v46, %v447_v7  ;;  %v457_v53 = vmul.f32 %v2630_v50, %v2490_v10  ;;  %v459_v54 = vmul.f32 %v2690_v47, %v2496_v13  ;;  %v463_v55 = vmul.f32 %v2750_v45, %v2502_v16 }
  0x33   :  { %v431_v56 = vsel %vm242_vm1, %v429_v43, %v430_v27  ;;  %v404_v57 = vadd.f32 %v402_v44, %v400_v51  ;;  %v420_v58 = vrot.slane %v394_v48, 7  ;;  %v434_v59 = vsel %vm242_vm1, %v430_v27, 0.0  ;;  %v2810_v43 = vld [vmem:[%s4422_s0 + $0x60] sm:$0xff] }
  0x34   :  { %v435_v60 = vadd.f32 %v431_v56, %v425_v40  ;;  %v455_v61 = vadd.f32 %v453_v18, %v451_v52  ;;  %v461_v62 = vadd.f32 %v459_v54, %v457_v53  ;;  %v467_v63 = vmul.f32 %v2630_v50, %v2492_v11 }
  0x35   :  { %v416_v0 = vadd.f32 %v2555_v36, %v404_v57  ;;  %v421_v1 = vsel %vm231_vm0, %v419_v29, %v420_v58  ;;  %v468_v3 = vmul.f32 %v2661_v24, %v2492_v11  ;;  %v469_v5 = vmul.f32 %v2690_v47, %v2498_v14 }
  0x36   :  { %2222 = vst.msk [vmem:[%s4427_s5 + $0x30] sm:$0xff] %vm251_vm2, %v435_v60  ;;  %v465_v50 = vadd.f32 %v463_v55, %v461_v62  ;;  %v470_v6 = vmul.f32 %v2713_v4, %v2498_v14  ;;  %v473_v49 = vmul.f32 %v2750_v45, %v2504_v17  ;;  %v474_v21 = vmul.f32 %v2773_v2, %v2504_v17 }
  0x37   :  { %v426_v23 = vadd.f32 %v421_v1, %v416_v0  ;;  %v471_v25 = vadd.f32 %v469_v5, %v467_v63  ;;  %v481_v19 = vrot.slane %v455_v61, 7  ;;  %v448_v28 = vmul.f32 %v2661_v24, %v2488_v9  ;;  %v2833_v0 = vld [vmem:[%s4422_s0 + $0x68] sm:$0xff] }
  0x38   :  { %v472_v29 = vadd.f32 %v470_v6, %v468_v3  ;;  %v477_v8 = vadd.f32 %v2555_v36, %v465_v50  ;;  %v450_v30 = vmul.f32 %v2713_v4, %v2494_v12  ;;  %v454_v31 = vmul.f32 %v2773_v2, %v2500_v15 }
  0x39   :  { %v436_v32 = vadd.f32 %v434_v59, %v426_v23  ;;  %v475_v33 = vadd.f32 %v473_v49, %v471_v25  ;;  %v486_v34 = vsel %vm231_vm0, 0.0, %v481_v19  ;;  %v458_v35 = vmul.f32 %v2661_v24, %v2490_v10 }
  0x3a   :  { %v476_v37 = vadd.f32 %v474_v21, %v472_v29  ;;  %v487_v38 = vadd.f32 %v486_v34, %v477_v8  ;;  %v452_v39 = vadd.f32 %v450_v30, %v448_v28  ;;  %v460_v40 = vmul.f32 %v2713_v4, %v2496_v13 }
  0x3b   :  { %2223 = vst.msk [vmem:[%s4427_s5 + $0x38] sm:$0xff] %vm251_vm2, %v436_v32  ;;  %v491_v41 = vrot.slane %v475_v33, 1  ;;  %v464_v42 = vmul.f32 %v2773_v2, %v2502_v16  ;;  %v509_v24 = vmul.f32 %v2690_v47, %v2488_v9  ;;  %v511_v44 = vmul.f32 %v2750_v45, %v2494_v12 }
  0x3c   :  { %v492_v7 = vrot.slane %v476_v37, 1  ;;  %v456_v46 = vadd.f32 %v454_v31, %v452_v39  ;;  %v462_v27 = vadd.f32 %v460_v40, %v458_v35  ;;  %v515_v48 = vmul.f32 %v2810_v43, %v2500_v15 }
  0x3d   :  { %v513_v51 = vadd.f32 %v511_v44, %v509_v24  ;;  %v519_v18 = vmul.f32 %v2690_v47, %v2490_v10  ;;  %v521_v52 = vmul.f32 %v2750_v45, %v2496_v13  ;;  %v525_v53 = vmul.f32 %v2810_v43, %v2502_v16 }
  0x3e   :  { %v493_v54 = vsel %vm242_vm1, %v491_v41, %v492_v7  ;;  %v466_v55 = vadd.f32 %v464_v42, %v462_v27  ;;  %v482_v56 = vrot.slane %v456_v46, 7  ;;  %v496_v57 = vsel %vm242_vm1, %v492_v7, 0.0  ;;  %v2870_v41 = vld [vmem:[%s4422_s0 + $0x70] sm:$0xff] }
  0x3f   :  { %v497_v58 = vadd.f32 %v493_v54, %v487_v38  ;;  %v517_v59 = vadd.f32 %v515_v48, %v513_v51  ;;  %v523_v60 = vadd.f32 %v521_v52, %v519_v18  ;;  %v529_v61 = vmul.f32 %v2690_v47, %v2492_v11 }
  0x40   :  { %v478_v62 = vadd.f32 %v2555_v36, %v466_v55  ;;  %v483_v63 = vsel %vm231_vm0, %v481_v19, %v482_v56  ;;  %v530_v1 = vmul.f32 %v2713_v4, %v2492_v11  ;;  %v531_v3 = vmul.f32 %v2750_v45, %v2498_v14 }
  0x41   :  { %2230 = vst.msk [vmem:[%s4427_s5 + $0x40] sm:$0xff] %vm251_vm2, %v497_v58  ;;  %v527_v47 = vadd.f32 %v525_v53, %v523_v60  ;;  %v532_v5 = vmul.f32 %v2773_v2, %v2498_v14  ;;  %v535_v50 = vmul.f32 %v2810_v43, %v2504_v17  ;;  %v536_v6 = vmul.f32 %v2833_v0, %v2504_v17 }
  0x42   :  { %v488_v49 = vadd.f32 %v483_v63, %v478_v62  ;;  %v533_v21 = vadd.f32 %v531_v3, %v529_v61  ;;  %v543_v23 = vrot.slane %v517_v59, 7  ;;  %v510_v25 = vmul.f32 %v2713_v4, %v2488_v9  ;;  %v2893_v62 = vld [vmem:[%s4422_s0 + $0x78] sm:$0xff] }
  0x43   :  { %v534_v19 = vadd.f32 %v532_v5, %v530_v1  ;;  %v539_v28 = vadd.f32 %v2555_v36, %v527_v47  ;;  %v512_v29 = vmul.f32 %v2773_v2, %v2494_v12  ;;  %v516_v8 = vmul.f32 %v2833_v0, %v2500_v15 }
  0x44   :  { %v498_v30 = vadd.f32 %v496_v57, %v488_v49  ;;  %v537_v31 = vadd.f32 %v535_v50, %v533_v21  ;;  %v548_v32 = vsel %vm231_vm0, 0.0, %v543_v23  ;;  %v520_v33 = vmul.f32 %v2713_v4, %v2490_v10 }
  0x45   :  { %v538_v34 = vadd.f32 %v536_v6, %v534_v19  ;;  %v549_v35 = vadd.f32 %v548_v32, %v539_v28  ;;  %v514_v37 = vadd.f32 %v512_v29, %v510_v25  ;;  %v522_v38 = vmul.f32 %v2773_v2, %v2496_v13 }
  0x46   :  { %2231 = vst.msk [vmem:[%s4427_s5 + $0x48] sm:$0xff] %vm251_vm2, %v498_v30  ;;  %v553_v39 = vrot.slane %v537_v31, 1  ;;  %v526_v40 = vmul.f32 %v2833_v0, %v2502_v16  ;;  %v571_v4 = vmul.f32 %v2750_v45, %v2488_v9  ;;  %v573_v42 = vmul.f32 %v2810_v43, %v2494_v12 }
  0x47   :  { %v554_v24 = vrot.slane %v538_v34, 1  ;;  %v518_v44 = vadd.f32 %v516_v8, %v514_v37  ;;  %v524_v7 = vadd.f32 %v522_v38, %v520_v33  ;;  %v577_v46 = vmul.f32 %v2870_v41, %v2500_v15 }
  0x48   :  { %v575_v27 = vadd.f32 %v573_v42, %v571_v4  ;;  %v581_v48 = vmul.f32 %v2750_v45, %v2490_v10  ;;  %v583_v51 = vmul.f32 %v2810_v43, %v2496_v13  ;;  %v587_v18 = vmul.f32 %v2870_v41, %v2502_v16 }
  0x49   :  { %v555_v52 = vsel %vm242_vm1, %v553_v39, %v554_v24  ;;  %v528_v53 = vadd.f32 %v526_v40, %v524_v7  ;;  %v544_v54 = vrot.slane %v518_v44, 7  ;;  %v558_v55 = vsel %vm242_vm1, %v554_v24, 0.0  ;;  %v2930_v39 = vld [vmem:[%s4422_s0 + $0x80] sm:$0xff] }
  0x4a   :  { %v559_v56 = vadd.f32 %v555_v52, %v549_v35  ;;  %v579_v57 = vadd.f32 %v577_v46, %v575_v27  ;;  %v585_v58 = vadd.f32 %v583_v51, %v581_v48  ;;  %v591_v59 = vmul.f32 %v2750_v45, %v2492_v11 }
  0x4b   :  { %v540_v60 = vadd.f32 %v2555_v36, %v528_v53  ;;  %v545_v61 = vsel %vm231_vm0, %v543_v23, %v544_v54  ;;  %v592_v63 = vmul.f32 %v2773_v2, %v2492_v11  ;;  %v593_v1 = vmul.f32 %v2810_v43, %v2498_v14 }
  0x4c   :  { %2238 = vst.msk [vmem:[%s4427_s5 + $0x50] sm:$0xff] %vm251_vm2, %v559_v56  ;;  %v589_v45 = vadd.f32 %v587_v18, %v585_v58  ;;  %v594_v3 = vmul.f32 %v2833_v0, %v2498_v14  ;;  %v597_v47 = vmul.f32 %v2870_v41, %v2504_v17  ;;  %v598_v5 = vmul.f32 %v2893_v62, %v2504_v17 }
  0x4d   :  { %v550_v50 = vadd.f32 %v545_v61, %v540_v60  ;;  %v595_v6 = vadd.f32 %v593_v1, %v591_v59  ;;  %v605_v49 = vrot.slane %v579_v57, 7  ;;  %v572_v21 = vmul.f32 %v2773_v2, %v2488_v9  ;;  %v2953_v60 = vld [vmem:[%s4422_s0 + $0x88] sm:$0xff] }
  0x4e   :  { %v596_v23 = vadd.f32 %v594_v3, %v592_v63  ;;  %v601_v25 = vadd.f32 %v2555_v36, %v589_v45  ;;  %v574_v19 = vmul.f32 %v2833_v0, %v2494_v12  ;;  %v578_v28 = vmul.f32 %v2893_v62, %v2500_v15 }
  0x4f   :  { %v560_v29 = vadd.f32 %v558_v55, %v550_v50  ;;  %v599_v8 = vadd.f32 %v597_v47, %v595_v6  ;;  %v610_v30 = vsel %vm231_vm0, 0.0, %v605_v49  ;;  %v582_v31 = vmul.f32 %v2773_v2, %v2490_v10 }
  0x50   :  { %v600_v32 = vadd.f32 %v598_v5, %v596_v23  ;;  %v611_v33 = vadd.f32 %v610_v30, %v601_v25  ;;  %v576_v34 = vadd.f32 %v574_v19, %v572_v21  ;;  %v584_v35 = vmul.f32 %v2833_v0, %v2496_v13 }
  0x51   :  { %2239 = vst.msk [vmem:[%s4427_s5 + $0x58] sm:$0xff] %vm251_vm2, %v560_v29  ;;  %v615_v37 = vrot.slane %v599_v8, 1  ;;  %v588_v38 = vmul.f32 %v2893_v62, %v2502_v16  ;;  %v633_v2 = vmul.f32 %v2810_v43, %v2488_v9  ;;  %v635_v40 = vmul.f32 %v2870_v41, %v2494_v12 }
  0x52   :  { %v616_v4 = vrot.slane %v600_v32, 1  ;;  %v580_v42 = vadd.f32 %v578_v28, %v576_v34  ;;  %v586_v24 = vadd.f32 %v584_v35, %v582_v31  ;;  %v639_v44 = vmul.f32 %v2930_v39, %v2500_v15 }
  0x53   :  { %v637_v7 = vadd.f32 %v635_v40, %v633_v2  ;;  %v643_v46 = vmul.f32 %v2810_v43, %v2490_v10  ;;  %v645_v27 = vmul.f32 %v2870_v41, %v2496_v13  ;;  %v649_v48 = vmul.f32 %v2930_v39, %v2502_v16 }
  0x54   :  { %v617_v51 = vsel %vm242_vm1, %v615_v37, %v616_v4  ;;  %v590_v18 = vadd.f32 %v588_v38, %v586_v24  ;;  %v606_v52 = vrot.slane %v580_v42, 7  ;;  %v620_v53 = vsel %vm242_vm1, %v616_v4, 0.0  ;;  %v2990_v37 = vld [vmem:[%s4422_s0 + $0x90] sm:$0xff] }
  0x55   :  { %v621_v54 = vadd.f32 %v617_v51, %v611_v33  ;;  %v641_v55 = vadd.f32 %v639_v44, %v637_v7  ;;  %v647_v56 = vadd.f32 %v645_v27, %v643_v46  ;;  %v653_v57 = vmul.f32 %v2810_v43, %v2492_v11 }
  0x56   :  { %v602_v58 = vadd.f32 %v2555_v36, %v590_v18  ;;  %v607_v59 = vsel %vm231_vm0, %v605_v49, %v606_v52  ;;  %v654_v61 = vmul.f32 %v2833_v0, %v2492_v11  ;;  %v655_v63 = vmul.f32 %v2870_v41, %v2498_v14 }
  0x57   :  { %2246 = vst.msk [vmem:[%s4427_s5 + $0x60] sm:$0xff] %vm251_vm2, %v621_v54  ;;  %v651_v43 = vadd.f32 %v649_v48, %v647_v56  ;;  %v656_v1 = vmul.f32 %v2893_v62, %v2498_v14  ;;  %v659_v45 = vmul.f32 %v2930_v39, %v2504_v17  ;;  %v660_v3 = vmul.f32 %v2953_v60, %v2504_v17 }
  0x58   :  { %v612_v47 = vadd.f32 %v607_v59, %v602_v58  ;;  %v657_v5 = vadd.f32 %v655_v63, %v653_v57  ;;  %v667_v50 = vrot.slane %v641_v55, 7  ;;  %v634_v6 = vmul.f32 %v2833_v0, %v2488_v9  ;;  %v3013_v58 = vld [vmem:[%s4422_s0 + $0x98] sm:$0xff] }
  0x59   :  { %v658_v49 = vadd.f32 %v656_v1, %v654_v61  ;;  %v663_v21 = vadd.f32 %v2555_v36, %v651_v43  ;;  %v636_v23 = vmul.f32 %v2893_v62, %v2494_v12  ;;  %v640_v25 = vmul.f32 %v2953_v60, %v2500_v15 }
  0x5a   :  { %v622_v19 = vadd.f32 %v620_v53, %v612_v47  ;;  %v661_v28 = vadd.f32 %v659_v45, %v657_v5  ;;  %v672_v29 = vsel %vm231_vm0, 0.0, %v667_v50  ;;  %v644_v8 = vmul.f32 %v2833_v0, %v2490_v10 }
  0x5b   :  { %v662_v30 = vadd.f32 %v660_v3, %v658_v49  ;;  %v673_v31 = vadd.f32 %v672_v29, %v663_v21  ;;  %v638_v32 = vadd.f32 %v636_v23, %v634_v6  ;;  %v646_v33 = vmul.f32 %v2893_v62, %v2496_v13 }
  0x5c   :  { %2247 = vst.msk [vmem:[%s4427_s5 + $0x68] sm:$0xff] %vm251_vm2, %v622_v19  ;;  %v677_v34 = vrot.slane %v661_v28, 1  ;;  %v650_v35 = vmul.f32 %v2953_v60, %v2502_v16  ;;  %v695_v0 = vmul.f32 %v2870_v41, %v2488_v9  ;;  %v697_v38 = vmul.f32 %v2930_v39, %v2494_v12 }
  0x5d   :  { %v678_v2 = vrot.slane %v662_v30, 1  ;;  %v642_v40 = vadd.f32 %v640_v25, %v638_v32  ;;  %v648_v4 = vadd.f32 %v646_v33, %v644_v8  ;;  %v701_v42 = vmul.f32 %v2990_v37, %v2500_v15 }
  0x5e   :  { %v699_v24 = vadd.f32 %v697_v38, %v695_v0  ;;  %v705_v44 = vmul.f32 %v2870_v41, %v2490_v10  ;;  %v707_v7 = vmul.f32 %v2930_v39, %v2496_v13  ;;  %v711_v46 = vmul.f32 %v2990_v37, %v2502_v16 }
  0x5f   :  { %v679_v27 = vsel %vm242_vm1, %v677_v34, %v678_v2  ;;  %v652_v48 = vadd.f32 %v650_v35, %v648_v4  ;;  %v668_v51 = vrot.slane %v642_v40, 7  ;;  %v682_v18 = vsel %vm242_vm1, %v678_v2, 0.0  ;;  %v3050_v34 = vld [vmem:[%s4422_s0 + $0xa0] sm:$0xff] }
  0x60   :  { %v683_v52 = vadd.f32 %v679_v27, %v673_v31  ;;  %v703_v53 = vadd.f32 %v701_v42, %v699_v24  ;;  %v709_v54 = vadd.f32 %v707_v7, %v705_v44  ;;  %v715_v55 = vmul.f32 %v2870_v41, %v2492_v11 }
  0x61   :  { %v664_v56 = vadd.f32 %v2555_v36, %v652_v48  ;;  %v669_v57 = vsel %vm231_vm0, %v667_v50, %v668_v51  ;;  %v716_v59 = vmul.f32 %v2893_v62, %v2492_v11  ;;  %v717_v61 = vmul.f32 %v2930_v39, %v2498_v14 }
  0x62   :  { %2254 = vst.msk [vmem:[%s4427_s5 + $0x70] sm:$0xff] %vm251_vm2, %v683_v52  ;;  %v713_v41 = vadd.f32 %v711_v46, %v709_v54  ;;  %v718_v63 = vmul.f32 %v2953_v60, %v2498_v14  ;;  %v721_v43 = vmul.f32 %v2990_v37, %v2504_v17  ;;  %v722_v1 = vmul.f32 %v3013_v58, %v2504_v17 }
  0x63   :  { %v674_v45 = vadd.f32 %v669_v57, %v664_v56  ;;  %v719_v3 = vadd.f32 %v717_v61, %v715_v55  ;;  %v729_v47 = vrot.slane %v703_v53, 7  ;;  %v696_v5 = vmul.f32 %v2893_v62, %v2488_v9  ;;  %v3073_v56 = vld [vmem:[%s4422_s0 + $0xa8] sm:$0xff] }
  0x64   :  { %v720_v50 = vadd.f32 %v718_v63, %v716_v59  ;;  %v725_v6 = vadd.f32 %v2555_v36, %v713_v41  ;;  %v698_v49 = vmul.f32 %v2953_v60, %v2494_v12  ;;  %v702_v21 = vmul.f32 %v3013_v58, %v2500_v15 }
  0x65   :  { %v684_v23 = vadd.f32 %v682_v18, %v674_v45  ;;  %v723_v25 = vadd.f32 %v721_v43, %v719_v3  ;;  %v734_v19 = vsel %vm231_vm0, 0.0, %v729_v47  ;;  %v706_v28 = vmul.f32 %v2893_v62, %v2490_v10 }
  0x66   :  { %v724_v29 = vadd.f32 %v722_v1, %v720_v50  ;;  %v735_v8 = vadd.f32 %v734_v19, %v725_v6  ;;  %v700_v30 = vadd.f32 %v698_v49, %v696_v5  ;;  %v708_v31 = vmul.f32 %v2953_v60, %v2496_v13 }
  0x67   :  { %2255 = vst.msk [vmem:[%s4427_s5 + $0x78] sm:$0xff] %vm251_vm2, %v684_v23  ;;  %v739_v32 = vrot.slane %v723_v25, 1  ;;  %v712_v33 = vmul.f32 %v3013_v58, %v2502_v16  ;;  %v757_v62 = vmul.f32 %v2930_v39, %v2488_v9  ;;  %v759_v35 = vmul.f32 %v2990_v37, %v2494_v12 }
  0x68   :  { %v740_v0 = vrot.slane %v724_v29, 1  ;;  %v704_v38 = vadd.f32 %v702_v21, %v700_v30  ;;  %v710_v2 = vadd.f32 %v708_v31, %v706_v28  ;;  %v763_v40 = vmul.f32 %v3050_v34, %v2500_v15 }
  0x69   :  { %v761_v4 = vadd.f32 %v759_v35, %v757_v62  ;;  %v767_v42 = vmul.f32 %v2930_v39, %v2490_v10  ;;  %v769_v24 = vmul.f32 %v2990_v37, %v2496_v13  ;;  %v773_v44 = vmul.f32 %v3050_v34, %v2502_v16 }
  0x6a   :  { %v741_v7 = vsel %vm242_vm1, %v739_v32, %v740_v0  ;;  %v714_v46 = vadd.f32 %v712_v33, %v710_v2  ;;  %v730_v27 = vrot.slane %v704_v38, 7  ;;  %v744_v48 = vsel %vm242_vm1, %v740_v0, 0.0  ;;  %v3110_v32 = vld [vmem:[%s4422_s0 + $0xb0] sm:$0xff] }
  0x6b   :  { %v745_v51 = vadd.f32 %v741_v7, %v735_v8  ;;  %v765_v18 = vadd.f32 %v763_v40, %v761_v4  ;;  %v771_v52 = vadd.f32 %v769_v24, %v767_v42  ;;  %v777_v53 = vmul.f32 %v2930_v39, %v2492_v11 }
  0x6c   :  { %v726_v54 = vadd.f32 %v2555_v36, %v714_v46  ;;  %v731_v55 = vsel %vm231_vm0, %v729_v47, %v730_v27  ;;  %v778_v57 = vmul.f32 %v2953_v60, %v2492_v11  ;;  %v779_v59 = vmul.f32 %v2990_v37, %v2498_v14 }
  0x6d   :  { %2262 = vst.msk [vmem:[%s4427_s5 + $0x80] sm:$0xff] %vm251_vm2, %v745_v51  ;;  %v775_v39 = vadd.f32 %v773_v44, %v771_v52  ;;  %v780_v61 = vmul.f32 %v3013_v58, %v2498_v14  ;;  %v783_v41 = vmul.f32 %v3050_v34, %v2504_v17  ;;  %v784_v63 = vmul.f32 %v3073_v56, %v2504_v17 }
  0x6e   :  { %v736_v43 = vadd.f32 %v731_v55, %v726_v54  ;;  %v781_v1 = vadd.f32 %v779_v59, %v777_v53  ;;  %v791_v45 = vrot.slane %v765_v18, 7  ;;  %v758_v3 = vmul.f32 %v2953_v60, %v2488_v9  ;;  %v3133_v54 = vld [vmem:[%s4422_s0 + $0xb8] sm:$0xff] }
  0x6f   :  { %v782_v47 = vadd.f32 %v780_v61, %v778_v57  ;;  %v787_v5 = vadd.f32 %v2555_v36, %v775_v39  ;;  %v760_v50 = vmul.f32 %v3013_v58, %v2494_v12  ;;  %v764_v6 = vmul.f32 %v3073_v56, %v2500_v15 }
  0x70   :  { %v746_v49 = vadd.f32 %v744_v48, %v736_v43  ;;  %v785_v21 = vadd.f32 %v783_v41, %v781_v1  ;;  %v796_v23 = vsel %vm231_vm0, 0.0, %v791_v45  ;;  %v768_v25 = vmul.f32 %v2953_v60, %v2490_v10 }
  0x71   :  { %v786_v19 = vadd.f32 %v784_v63, %v782_v47  ;;  %v797_v28 = vadd.f32 %v796_v23, %v787_v5  ;;  %v762_v29 = vadd.f32 %v760_v50, %v758_v3  ;;  %v770_v8 = vmul.f32 %v3013_v58, %v2496_v13 }
  0x72   :  { %2263 = vst.msk [vmem:[%s4427_s5 + $0x88] sm:$0xff] %vm251_vm2, %v746_v49  ;;  %v801_v30 = vrot.slane %v785_v21, 1  ;;  %v774_v31 = vmul.f32 %v3073_v56, %v2502_v16  ;;  %v819_v60 = vmul.f32 %v2990_v37, %v2488_v9  ;;  %v821_v33 = vmul.f32 %v3050_v34, %v2494_v12 }
  0x73   :  { %v802_v62 = vrot.slane %v786_v19, 1  ;;  %v766_v35 = vadd.f32 %v764_v6, %v762_v29  ;;  %v772_v0 = vadd.f32 %v770_v8, %v768_v25  ;;  %v825_v38 = vmul.f32 %v3110_v32, %v2500_v15  ;;  %v3170_v8 = vld [vmem:[%s4422_s0 + $0xc0] sm:$0xff] }
  0x74   :  { %v823_v2 = vadd.f32 %v821_v33, %v819_v60  ;;  %v829_v40 = vmul.f32 %v2990_v37, %v2490_v10  ;;  %v831_v4 = vmul.f32 %v3050_v34, %v2496_v13  ;;  %v835_v42 = vmul.f32 %v3110_v32, %v2502_v16 }
  0x75   :  { %v803_v24 = vsel %vm242_vm1, %v801_v30, %v802_v62  ;;  %v776_v44 = vadd.f32 %v774_v31, %v772_v0  ;;  %v792_v7 = vrot.slane %v766_v35, 7  ;;  %v806_v46 = vsel %vm242_vm1, %v802_v62, 0.0 }
  0x76   :  { %v807_v27 = vadd.f32 %v803_v24, %v797_v28  ;;  %v827_v48 = vadd.f32 %v825_v38, %v823_v2  ;;  %v833_v51 = vadd.f32 %v831_v4, %v829_v40  ;;  %v839_v18 = vmul.f32 %v2990_v37, %v2492_v11 }
  0x77   :  { %v788_v52 = vadd.f32 %v2555_v36, %v776_v44  ;;  %v793_v53 = vsel %vm231_vm0, %v791_v45, %v792_v7  ;;  %v840_v55 = vmul.f32 %v3013_v58, %v2492_v11  ;;  %v841_v57 = vmul.f32 %v3050_v34, %v2498_v14 }
  0x78   :  { %2270 = vst.msk [vmem:[%s4427_s5 + $0x90] sm:$0xff] %vm251_vm2, %v807_v27  ;;  %v837_v37 = vadd.f32 %v835_v42, %v833_v51  ;;  %v842_v59 = vmul.f32 %v3073_v56, %v2498_v14  ;;  %v845_v39 = vmul.f32 %v3110_v32, %v2504_v17  ;;  %v846_v61 = vmul.f32 %v3133_v54, %v2504_v17 }
  0x79   :  { %v798_v41 = vadd.f32 %v793_v53, %v788_v52  ;;  %v843_v63 = vadd.f32 %v841_v57, %v839_v18  ;;  %v853_v43 = vrot.slane %v827_v48, 7  ;;  %v820_v1 = vmul.f32 %v3013_v58, %v2488_v9  ;;  %v3191_v48 = vld [vmem:[%s4426_s4] ss:$0 sm:$0xff]  ;;  %v3198_v52 = vld [vmem:[%s4422_s0 + $0xc8] sm:$0xff] }
  0x7a   :  { %v844_v45 = vadd.f32 %v842_v59, %v840_v55  ;;  %v849_v3 = vadd.f32 %v2555_v36, %v837_v37  ;;  %v822_v47 = vmul.f32 %v3073_v56, %v2494_v12  ;;  %v826_v5 = vmul.f32 %v3133_v54, %v2500_v15 }
  0x7b   :  { %v808_v50 = vadd.f32 %v806_v46, %v798_v41  ;;  %v847_v6 = vadd.f32 %v845_v39, %v843_v63  ;;  %v858_v49 = vsel %vm231_vm0, 0.0, %v853_v43  ;;  %v830_v21 = vmul.f32 %v3013_v58, %v2490_v10 }
  0x7c   :  { %v848_v23 = vadd.f32 %v846_v61, %v844_v45  ;;  %v859_v25 = vadd.f32 %v858_v49, %v849_v3  ;;  %v824_v19 = vadd.f32 %v822_v47, %v820_v1  ;;  %v832_v28 = vmul.f32 %v3073_v56, %v2496_v13 }
  0x7d   :  { %2271 = vst.msk [vmem:[%s4427_s5 + $0x98] sm:$0xff] %vm251_vm2, %v808_v50  ;;  %v863_v36 = vrot.slane %v847_v6, 1  ;;  %v836_v29 = vmul.f32 %v3133_v54, %v2502_v16  ;;  %v881_v58 = vmul.f32 %v3050_v34, %v2488_v9  ;;  %v883_v30 = vmul.f32 %v3110_v32, %v2494_v12 }
  0x7e   :  { %v864_v31 = vrot.slane %v848_v23, 1  ;;  %v828_v60 = vadd.f32 %v826_v5, %v824_v19  ;;  %v834_v33 = vadd.f32 %v832_v28, %v830_v21  ;;  %v887_v62 = vmul.f32 %v3170_v8, %v2500_v15 }
  0x7f   :  { %v885_v35 = vadd.f32 %v883_v30, %v881_v58  ;;  %v891_v0 = vmul.f32 %v3050_v34, %v2490_v10  ;;  %v893_v38 = vmul.f32 %v3110_v32, %v2496_v13  ;;  %v897_v2 = vmul.f32 %v3170_v8, %v2502_v16 }
  0x80   :  { %v865_v40 = vsel %vm242_vm1, %v863_v36, %v864_v31  ;;  %v838_v4 = vadd.f32 %v836_v29, %v834_v33  ;;  %v854_v42 = vrot.slane %v828_v60, 7  ;;  %v868_v24 = vsel %vm242_vm1, %v864_v31, 0.0  ;;  %v3235_v36 = vld [vmem:[%s4422_s0 + $0xd0] sm:$0xff] }
  0x81   :  { %v869_v44 = vadd.f32 %v865_v40, %v859_v25  ;;  %v889_v7 = vadd.f32 %v887_v62, %v885_v35  ;;  %v895_v46 = vadd.f32 %v893_v38, %v891_v0  ;;  %v901_v27 = vmul.f32 %v3050_v34, %v2492_v11 }
  0x82   :  { %v850_v51 = vadd.f32 %v3191_v48, %v838_v4  ;;  %v855_v18 = vsel %vm231_vm0, %v853_v43, %v854_v42  ;;  %v902_v53 = vmul.f32 %v3073_v56, %v2492_v11  ;;  %v903_v34 = vmul.f32 %v3110_v32, %v2498_v14 }
  0x83   :  { %2278 = vst.msk [vmem:[%s4427_s5 + $0xa0] sm:$0xff] %vm251_vm2, %v869_v44  ;;  %v899_v55 = vadd.f32 %v897_v2, %v895_v46  ;;  %v904_v57 = vmul.f32 %v3133_v54, %v2498_v14  ;;  %v907_v37 = vmul.f32 %v3170_v8, %v2504_v17  ;;  %v908_v59 = vmul.f32 %v3198_v52, %v2504_v17 }
  0x84   :  { %v860_v39 = vadd.f32 %v855_v18, %v850_v51  ;;  %v905_v61 = vadd.f32 %v903_v34, %v901_v27  ;;  %v915_v41 = vrot.slane %v889_v7, 7  ;;  %v882_v63 = vmul.f32 %v3073_v56, %v2488_v9  ;;  %v3258_v51 = vld [vmem:[%s4422_s0 + $0xd8] sm:$0xff] }
  0x85   :  { %v906_v43 = vadd.f32 %v904_v57, %v902_v53  ;;  %v911_v1 = vadd.f32 %v3191_v48, %v899_v55  ;;  %v884_v45 = vmul.f32 %v3133_v54, %v2494_v12  ;;  %v888_v3 = vmul.f32 %v3198_v52, %v2500_v15 }
  0x86   :  { %v870_v47 = vadd.f32 %v868_v24, %v860_v39  ;;  %v909_v5 = vadd.f32 %v907_v37, %v905_v61  ;;  %v920_v50 = vsel %vm231_vm0, 0.0, %v915_v41  ;;  %v892_v6 = vmul.f32 %v3073_v56, %v2490_v10 }
  0x87   :  { %v910_v49 = vadd.f32 %v908_v59, %v906_v43  ;;  %v921_v21 = vadd.f32 %v920_v50, %v911_v1  ;;  %v886_v23 = vadd.f32 %v884_v45, %v882_v63  ;;  %v894_v25 = vmul.f32 %v3133_v54, %v2496_v13 }
  0x88   :  { %2279 = vst.msk [vmem:[%s4427_s5 + $0xa8] sm:$0xff] %vm251_vm2, %v870_v47  ;;  %v925_v19 = vrot.slane %v909_v5, 1  ;;  %v898_v28 = vmul.f32 %v3198_v52, %v2502_v16  ;;  %v943_v56 = vmul.f32 %v3110_v32, %v2488_v9  ;;  %v945_v29 = vmul.f32 %v3170_v8, %v2494_v12 }
  0x89   :  { %v926_v58 = vrot.slane %v910_v49, 1  ;;  %v890_v30 = vadd.f32 %v888_v3, %v886_v23  ;;  %v896_v31 = vadd.f32 %v894_v25, %v892_v6  ;;  %v949_v60 = vmul.f32 %v3235_v36, %v2500_v15 }
  0x8a   :  { %v947_v33 = vadd.f32 %v945_v29, %v943_v56  ;;  %v953_v62 = vmul.f32 %v3110_v32, %v2490_v10  ;;  %v955_v35 = vmul.f32 %v3170_v8, %v2496_v13  ;;  %v959_v0 = vmul.f32 %v3235_v36, %v2502_v16 }
  0x8b   :  { %v927_v38 = vsel %vm242_vm1, %v925_v19, %v926_v58  ;;  %v900_v2 = vadd.f32 %v898_v28, %v896_v31  ;;  %v916_v40 = vrot.slane %v890_v30, 7  ;;  %v930_v4 = vsel %vm242_vm1, %v926_v58, 0.0  ;;  %v3295_v19 = vld [vmem:[%s4422_s0 + $0xe0] sm:$0xff] }
  0x8c   :  { %v931_v42 = vadd.f32 %v927_v38, %v921_v21  ;;  %v951_v24 = vadd.f32 %v949_v60, %v947_v33  ;;  %v957_v44 = vadd.f32 %v955_v35, %v953_v62  ;;  %v963_v7 = vmul.f32 %v3110_v32, %v2492_v11 }
  0x8d   :  { %v912_v46 = vadd.f32 %v3191_v48, %v900_v2  ;;  %v917_v27 = vsel %vm231_vm0, %v915_v41, %v916_v40  ;;  %v964_v18 = vmul.f32 %v3133_v54, %v2492_v11  ;;  %v965_v53 = vmul.f32 %v3170_v8, %v2498_v14 }
  0x8e   :  { %2286 = vst.msk [vmem:[%s4427_s5 + $0xb0] sm:$0xff] %vm251_vm2, %v931_v42  ;;  %v961_v32 = vadd.f32 %v959_v0, %v957_v44  ;;  %v966_v34 = vmul.f32 %v3198_v52, %v2498_v14  ;;  %v969_v55 = vmul.f32 %v3235_v36, %v2504_v17  ;;  %v970_v57 = vmul.f32 %v3258_v51, %v2504_v17 }
  0x8f   :  { %v922_v37 = vadd.f32 %v917_v27, %v912_v46  ;;  %v967_v59 = vadd.f32 %v965_v53, %v963_v7  ;;  %v977_v39 = vrot.slane %v951_v24, 7  ;;  %v944_v61 = vmul.f32 %v3133_v54, %v2488_v9  ;;  %v3318_v46 = vld [vmem:[%s4422_s0 + $0xe8] sm:$0xff] }
  0x90   :  { %v968_v41 = vadd.f32 %v966_v34, %v964_v18  ;;  %v973_v63 = vadd.f32 %v3191_v48, %v961_v32  ;;  %v946_v43 = vmul.f32 %v3198_v52, %v2494_v12  ;;  %v950_v1 = vmul.f32 %v3258_v51, %v2500_v15 }
  0x91   :  { %v932_v45 = vadd.f32 %v930_v4, %v922_v37  ;;  %v971_v3 = vadd.f32 %v969_v55, %v967_v59  ;;  %v982_v47 = vsel %vm231_vm0, 0.0, %v977_v39  ;;  %v954_v5 = vmul.f32 %v3133_v54, %v2490_v10 }
  0x92   :  { %v972_v50 = vadd.f32 %v970_v57, %v968_v41  ;;  %v983_v6 = vadd.f32 %v982_v47, %v973_v63  ;;  %v948_v49 = vadd.f32 %v946_v43, %v944_v61  ;;  %v956_v21 = vmul.f32 %v3198_v52, %v2496_v13 }
  0x93   :  { %2287 = vst.msk [vmem:[%s4427_s5 + $0xb8] sm:$0xff] %vm251_vm2, %v932_v45  ;;  %v987_v23 = vrot.slane %v971_v3, 1  ;;  %v960_v25 = vmul.f32 %v3258_v51, %v2502_v16  ;;  %v1005_v54 = vmul.f32 %v3170_v8, %v2488_v9  ;;  %v1007_v28 = vmul.f32 %v3235_v36, %v2494_v12 }
  0x94   :  { %v988_v56 = vrot.slane %v972_v50, 1  ;;  %v952_v29 = vadd.f32 %v950_v1, %v948_v49  ;;  %v958_v58 = vadd.f32 %v956_v21, %v954_v5  ;;  %v1011_v30 = vmul.f32 %v3295_v19, %v2500_v15 }
  0x95   :  { %v1009_v31 = vadd.f32 %v1007_v28, %v1005_v54  ;;  %v1015_v60 = vmul.f32 %v3170_v8, %v2490_v10  ;;  %v1017_v33 = vmul.f32 %v3235_v36, %v2496_v13  ;;  %v1021_v62 = vmul.f32 %v3295_v19, %v2502_v16 }
  0x96   :  { %v989_v35 = vsel %vm242_vm1, %v987_v23, %v988_v56  ;;  %v962_v0 = vadd.f32 %v960_v25, %v958_v58  ;;  %v978_v38 = vrot.slane %v952_v29, 7  ;;  %v992_v2 = vsel %vm242_vm1, %v988_v56, 0.0  ;;  %v3355_v23 = vld [vmem:[%s4422_s0 + $0xf0] sm:$0xff] }
  0x97   :  { %v993_v40 = vadd.f32 %v989_v35, %v983_v6  ;;  %v1013_v4 = vadd.f32 %v1011_v30, %v1009_v31  ;;  %v1019_v42 = vadd.f32 %v1017_v33, %v1015_v60  ;;  %v1025_v24 = vmul.f32 %v3170_v8, %v2492_v11 }
  0x98   :  { %v974_v44 = vadd.f32 %v3191_v48, %v962_v0  ;;  %v979_v7 = vsel %vm231_vm0, %v977_v39, %v978_v38  ;;  %v1026_v27 = vmul.f32 %v3198_v52, %v2492_v11  ;;  %v1027_v18 = vmul.f32 %v3235_v36, %v2498_v14 }
  0x99   :  { %2294 = vst.msk [vmem:[%s4427_s5 + $0xc0] sm:$0xff] %vm251_vm2, %v993_v40  ;;  %v1023_v8 = vadd.f32 %v1021_v62, %v1019_v42  ;;  %v1028_v53 = vmul.f32 %v3258_v51, %v2498_v14  ;;  %v1031_v32 = vmul.f32 %v3295_v19, %v2504_v17  ;;  %v1032_v34 = vmul.f32 %v3318_v46, %v2504_v17 }
  0x9a   :  { %v984_v55 = vadd.f32 %v979_v7, %v974_v44  ;;  %v1029_v57 = vadd.f32 %v1027_v18, %v1025_v24  ;;  %v1039_v37 = vrot.slane %v1013_v4, 7  ;;  %v1006_v59 = vmul.f32 %v3198_v52, %v2488_v9  ;;  %v3378_v44 = vld [vmem:[%s4422_s0 + $0xf8] sm:$0xff] }
  0x9b   :  { %v1030_v39 = vadd.f32 %v1028_v53, %v1026_v27  ;;  %v1035_v61 = vadd.f32 %v3191_v48, %v1023_v8  ;;  %v1008_v41 = vmul.f32 %v3258_v51, %v2494_v12  ;;  %v1012_v63 = vmul.f32 %v3318_v46, %v2500_v15 }
  0x9c   :  { %v994_v43 = vadd.f32 %v992_v2, %v984_v55  ;;  %v1033_v1 = vadd.f32 %v1031_v32, %v1029_v57  ;;  %v1044_v45 = vsel %vm231_vm0, 0.0, %v1039_v37  ;;  %v1016_v3 = vmul.f32 %v3198_v52, %v2490_v10 }
  0x9d   :  { %v1034_v47 = vadd.f32 %v1032_v34, %v1030_v39  ;;  %v1045_v5 = vadd.f32 %v1044_v45, %v1035_v61  ;;  %v1010_v50 = vadd.f32 %v1008_v41, %v1006_v59  ;;  %v1018_v6 = vmul.f32 %v3258_v51, %v2496_v13 }
  0x9e   :  { %2295 = vst.msk [vmem:[%s4427_s5 + $0xc8] sm:$0xff] %vm251_vm2, %v994_v43  ;;  %v1049_v49 = vrot.slane %v1033_v1, 1  ;;  %v1022_v21 = vmul.f32 %v3318_v46, %v2502_v16  ;;  %v1067_v52 = vmul.f32 %v3235_v36, %v2488_v9  ;;  %v1069_v25 = vmul.f32 %v3295_v19, %v2494_v12 }
  0x9f   :  { %v1050_v54 = vrot.slane %v1034_v47, 1  ;;  %v1014_v28 = vadd.f32 %v1012_v63, %v1010_v50  ;;  %v1020_v56 = vadd.f32 %v1018_v6, %v1016_v3  ;;  %v1073_v29 = vmul.f32 %v3355_v23, %v2500_v15 }
  0xa0   :  { %v1071_v58 = vadd.f32 %v1069_v25, %v1067_v52  ;;  %v1077_v30 = vmul.f32 %v3235_v36, %v2490_v10  ;;  %v1079_v31 = vmul.f32 %v3295_v19, %v2496_v13  ;;  %v1083_v60 = vmul.f32 %v3355_v23, %v2502_v16 }
  0xa1   :  { %v1051_v33 = vsel %vm242_vm1, %v1049_v49, %v1050_v54  ;;  %v1024_v62 = vadd.f32 %v1022_v21, %v1020_v56  ;;  %v1040_v35 = vrot.slane %v1014_v28, 7  ;;  %v1054_v0 = vsel %vm242_vm1, %v1050_v54, 0.0 }
  0xa2   :  { %v1055_v38 = vadd.f32 %v1051_v33, %v1045_v5  ;;  %v1075_v2 = vadd.f32 %v1073_v29, %v1071_v58  ;;  %v1081_v40 = vadd.f32 %v1079_v31, %v1077_v30  ;;  %v1087_v4 = vmul.f32 %v3235_v36, %v2492_v11 }
  0xa3   :  { %v1036_v42 = vadd.f32 %v3191_v48, %v1024_v62  ;;  %v1041_v24 = vsel %vm231_vm0, %v1039_v37, %v1040_v35  ;;  %v1088_v7 = vmul.f32 %v3258_v51, %v2492_v11  ;;  %v1089_v27 = vmul.f32 %v3295_v19, %v2498_v14 }
  0xa4   :  { %2302 = vst.msk [vmem:[%s4427_s5 + $0xd0] sm:$0xff] %vm251_vm2, %v1055_v38  ;;  %v1085_v36 = vadd.f32 %v1083_v60, %v1081_v40  ;;  %v1090_v18 = vmul.f32 %v3318_v46, %v2498_v14  ;;  %v1093_v8 = vmul.f32 %v3355_v23, %v2504_v17  ;;  %v1094_v53 = vmul.f32 %v3378_v44, %v2504_v17 }
  0xa5   :  { %v1046_v32 = vadd.f32 %v1041_v24, %v1036_v42  ;;  %v1091_v34 = vadd.f32 %v1089_v27, %v1087_v4  ;;  %v1101_v55 = vrot.slane %v1075_v2, 7  ;;  %v1068_v57 = vmul.f32 %v3258_v51, %v2488_v9 }
  0xa6   :  { %v1092_v37 = vadd.f32 %v1090_v18, %v1088_v7  ;;  %v1097_v59 = vadd.f32 %v3191_v48, %v1085_v36  ;;  %v1070_v39 = vmul.f32 %v3318_v46, %v2494_v12  ;;  %v1074_v61 = vmul.f32 %v3378_v44, %v2500_v15 }
  0xa7   :  { %v1056_v41 = vadd.f32 %v1054_v0, %v1046_v32  ;;  %v1095_v63 = vadd.f32 %v1093_v8, %v1091_v34  ;;  %v1106_v43 = vsel %vm231_vm0, 0.0, %v1101_v55  ;;  %v1078_v1 = vmul.f32 %v3258_v51, %v2490_v10 }
  0xa8   :  { %v1096_v45 = vadd.f32 %v1094_v53, %v1092_v37  ;;  %v1107_v3 = vadd.f32 %v1106_v43, %v1097_v59  ;;  %v1072_v47 = vadd.f32 %v1070_v39, %v1068_v57  ;;  %v1080_v5 = vmul.f32 %v3318_v46, %v2496_v13  ;;  %v3454_v53 = vld [vmem:[%s4422_s0 + $0x100] sm:$0xff] }
  0xa9   :  { %2303 = vst.msk [vmem:[%s4427_s5 + $0xd8] sm:$0xff] %vm251_vm2, %v1056_v41  ;;  %v1111_v50 = vrot.slane %v1095_v63, 1  ;;  %v1084_v6 = vmul.f32 %v3378_v44, %v2502_v16  ;;  %v1126_v49 = vmul.f32 %v3295_v19, %v2488_v9  ;;  %v1128_v51 = vmul.f32 %v3355_v23, %v2494_v12  ;;  %v3466_v41 = vld [vmem:[%s4422_s0 + $0x110] sm:$0xff] }
  0xaa   :  { %v1112_v21 = vrot.slane %v1096_v45, 1  ;;  %v1076_v52 = vadd.f32 %v1074_v61, %v1072_v47  ;;  %v1082_v25 = vadd.f32 %v1080_v5, %v1078_v1  ;;  %v3417_v54 = vmul.f32 0.0, %v2500_v15 }
  0xab   :  { %v1130_v28 = vadd.f32 %v1128_v51, %v1126_v49  ;;  %v1136_v56 = vmul.f32 %v3295_v19, %v2490_v10  ;;  %v1138_v29 = vmul.f32 %v3355_v23, %v2496_v13  ;;  %v3424_v58 = vmul.f32 0.0, %v2502_v16 }
  0xac   :  { %v1113_v30 = vsel %vm242_vm1, %v1111_v50, %v1112_v21  ;;  %v1086_v31 = vadd.f32 %v1084_v6, %v1082_v25  ;;  %v1102_v60 = vrot.slane %v1076_v52, 7  ;;  %v1116_v33 = vsel %vm242_vm1, %v1112_v21, 0.0  ;;  %v3483_v50 = vld [vmem:[%s4422_s0 + $0x108] sm:$0xff] }
  0xad   :  { %v1117_v62 = vadd.f32 %v1113_v30, %v1107_v3  ;;  %v1134_v35 = vadd.f32 %v3417_v54, %v1130_v28  ;;  %v1140_v0 = vadd.f32 %v1138_v29, %v1136_v56  ;;  %v1146_v38 = vmul.f32 %v3295_v19, %v2492_v11 }
  0xae   :  { %v1098_v2 = vadd.f32 %v3191_v48, %v1086_v31  ;;  %v1103_v40 = vsel %vm231_vm0, %v1101_v55, %v1102_v60  ;;  %v1147_v4 = vmul.f32 %v3318_v46, %v2492_v11  ;;  %v1148_v42 = vmul.f32 %v3355_v23, %v2498_v14 }
  0xaf   :  { %2310 = vst.msk [vmem:[%s4427_s5 + $0xe0] sm:$0xff] %vm251_vm2, %v1117_v62  ;;  %v1144_v24 = vadd.f32 %v3424_v58, %v1140_v0  ;;  %v1149_v19 = vmul.f32 %v3378_v44, %v2498_v14  ;;  %v3445_v7 = vmul.f32 0.0, %v2504_v17  ;;  %v1160_v27 = vrot.slane %v1134_v35, 7  ;;  %v3502_v35 = vld [vmem:[%s4422_s0 + $0x118] sm:$0xff] }
  0xb0   :  { %v1108_v36 = vadd.f32 %v1103_v40, %v1098_v2  ;;  %v1150_v18 = vadd.f32 %v1148_v42, %v1146_v38  ;;  %v1127_v8 = vmul.f32 %v3318_v46, %v2488_v9  ;;  %v1129_v23 = vmul.f32 %v3378_v44, %v2494_v12 }
  0xb1   :  { %v1151_v32 = vadd.f32 %v1149_v19, %v1147_v4  ;;  %v1156_v34 = vadd.f32 %v3191_v48, %v1144_v24  ;;  %v1165_v55 = vsel %vm231_vm0, 0.0, %v1160_v27  ;;  %v1137_v57 = vmul.f32 %v3318_v46, %v2490_v10 }
  0xb2   :  { %v1118_v37 = vadd.f32 %v1116_v33, %v1108_v36  ;;  %v1154_v59 = vadd.f32 %v3445_v7, %v1150_v18  ;;  %v1131_v39 = vadd.f32 %v1129_v23, %v1127_v8  ;;  %v1139_v61 = vmul.f32 %v3378_v44, %v2496_v13 }
  0xb3   :  { %v1155_v63 = vadd.f32 %v3445_v7, %v1151_v32  ;;  %v1166_v43 = vadd.f32 %v1165_v55, %v1156_v34  ;;  %v1199_v1 = vmul.f32 %v3454_v53, %v2494_v12  ;;  %v1203_v46 = vmul.f32 %v3466_v41, %v2500_v15 }
  0xb4   :  { %2311 = vst.msk [vmem:[%s4427_s5 + $0xe8] sm:$0xff] %vm251_vm2, %v1118_v37  ;;  %v1170_v44 = vrot.slane %v1154_v59, 1  ;;  %v1135_v45 = vadd.f32 %v3417_v54, %v1131_v39  ;;  %v1141_v3 = vadd.f32 %v1139_v61, %v1137_v57  ;;  %v1209_v47 = vmul.f32 %v3454_v53, %v2496_v13  ;;  %v3528_v39 = vld [vmem:[%s4422_s0 + $0x120] sm:$0xff] }
  0xb5   :  { %v1171_v5 = vrot.slane %v1155_v63, 1  ;;  %v1201_v6 = vadd.f32 %v1199_v1, %v2517_v20  ;;  %v1213_v49 = vmul.f32 %v3466_v41, %v2502_v16  ;;  %v1219_v51 = vmul.f32 %v3454_v53, %v2498_v14 }
  0xb6   :  { %v1145_v21 = vadd.f32 %v3424_v58, %v1141_v3  ;;  %v1161_v52 = vrot.slane %v1135_v45, 7  ;;  %v1211_v25 = vadd.f32 %v1209_v47, %v2522_v22  ;;  %v1220_v28 = vmul.f32 %v3483_v50, %v2498_v14 }
  0xb7   :  { %v1172_v56 = vsel %vm242_vm1, %v1170_v44, %v1171_v5  ;;  %v1175_v29 = vsel %vm242_vm1, %v1171_v5, 0.0  ;;  %v1205_v30 = vadd.f32 %v1203_v46, %v1201_v6  ;;  %v1221_v31 = vadd.f32 %v1219_v51, %v2531_v26 }
  0xb8   :  { %v1176_v60 = vadd.f32 %v1172_v56, %v1166_v43  ;;  %v1157_v33 = vadd.f32 %v3191_v48, %v1145_v21  ;;  %v1162_v62 = vsel %vm231_vm0, %v1160_v27, %v1161_v52  ;;  %v1215_v0 = vadd.f32 %v1213_v49, %v1211_v25 }
  0xb9   :  { %v1222_v38 = vadd.f32 %v1220_v28, %v2531_v26  ;;  %v1223_v2 = vmul.f32 %v3466_v41, %v2504_v17  ;;  %v1224_v40 = vmul.f32 %v3502_v35, %v2504_v17  ;;  %v1231_v4 = vrot.slane %v1205_v30, 7  ;;  %v3561_v28 = vld [vmem:[%s4422_s0 + $0x128] sm:$0xff] }
  0xba   :  { %2316 = vst.msk [vmem:[%s4427_s5 + $0xf0] sm:$0xff] %vm251_vm2, %v1176_v60  ;;  %v1167_v42 = vadd.f32 %v1162_v62, %v1157_v33  ;;  %v1227_v24 = vadd.f32 %v3191_v48, %v1215_v0  ;;  %v1200_v19 = vmul.f32 %v3483_v50, %v2494_v12  ;;  %v1204_v26 = vmul.f32 %v3502_v35, %v2500_v15 }
  0xbb   :  { %v1225_v27 = vadd.f32 %v1223_v2, %v1221_v31  ;;  %v1226_v36 = vadd.f32 %v1224_v40, %v1222_v38  ;;  %v1236_v18 = vsel %vm231_vm0, 0.0, %v1231_v4  ;;  %v1210_v8 = vmul.f32 %v3483_v50, %v2496_v13 }
  0xbc   :  { %v1177_v23 = vadd.f32 %v1175_v29, %v1167_v42  ;;  %v1237_v32 = vadd.f32 %v1236_v18, %v1227_v24  ;;  %v1202_v34 = vadd.f32 %v1200_v19, %v2517_v20  ;;  %v1214_v55 = vmul.f32 %v3502_v35, %v2502_v16 }
  0xbd   :  { %v1241_v57 = vrot.slane %v1225_v27, 1  ;;  %v1242_v37 = vrot.slane %v1226_v36, 1  ;;  %v1212_v59 = vadd.f32 %v1210_v8, %v2522_v22  ;;  %v1259_v61 = vmul.f32 %v3454_v53, %v2488_v9 }
  0xbe   :  { %2317 = vst.msk [vmem:[%s4427_s5 + $0xf8] sm:$0xff] %vm251_vm2, %v1177_v23  ;;  %v1206_v20 = vadd.f32 %v1204_v26, %v1202_v34  ;;  %v1261_v63 = vmul.f32 %v3466_v41, %v2494_v12  ;;  %v1265_v22 = vmul.f32 %v3528_v39, %v2500_v15  ;;  %v1269_v43 = vmul.f32 %v3454_v53, %v2490_v10 }
  0xbf   :  { %v1243_v1 = vsel %vm242_vm1, %v1241_v57, %v1242_v37  ;;  %v1216_v46 = vadd.f32 %v1214_v55, %v1212_v59  ;;  %v1246_v44 = vsel %vm242_vm1, %v1242_v37, 0.0  ;;  %v1271_v45 = vmul.f32 %v3466_v41, %v2496_v13  ;;  %v3592_v57 = vld [vmem:[%s4422_s0 + $0x130] sm:$0xff] }
  0xc0   :  { %v1247_v3 = vadd.f32 %v1243_v1, %v1237_v32  ;;  %v1232_v47 = vrot.slane %v1206_v20, 7  ;;  %v1263_v5 = vadd.f32 %v1261_v63, %v1259_v61  ;;  %v1275_v6 = vmul.f32 %v3528_v39, %v2502_v16 }
  0xc1   :  { %v1228_v49 = vadd.f32 %v3191_v48, %v1216_v46  ;;  %v1273_v51 = vadd.f32 %v1271_v45, %v1269_v43  ;;  %v1279_v21 = vmul.f32 %v3454_v53, %v2492_v11  ;;  %v1280_v52 = vmul.f32 %v3483_v50, %v2492_v11 }
  0xc2   :  { %2322 = vst.msk [vmem:[%s4427_s5 + $0x100] sm:$0xff] %vm251_vm2, %v1247_v3  ;;  %v1233_v25 = vsel %vm231_vm0, %v1231_v4, %v1232_v47  ;;  %v1267_v56 = vadd.f32 %v1265_v22, %v1263_v5  ;;  %v1281_v29 = vmul.f32 %v3466_v41, %v2498_v14  ;;  %v1282_v53 = vmul.f32 %v3502_v35, %v2498_v14 }
  0xc3   :  { %v1238_v30 = vadd.f32 %v1233_v25, %v1228_v49  ;;  %v1277_v31 = vadd.f32 %v1275_v6, %v1273_v51  ;;  %v1285_v60 = vmul.f32 %v3528_v39, %v2504_v17  ;;  %v1286_v33 = vmul.f32 %v3561_v28, %v2504_v17  ;;  %v3621_v25 = vld [vmem:[%s4422_s0 + $0x138] sm:$0xff] }
  0xc4   :  { %v1283_v62 = vadd.f32 %v1281_v29, %v1279_v21  ;;  %v1284_v0 = vadd.f32 %v1282_v53, %v1280_v52  ;;  %v1293_v38 = vrot.slane %v1267_v56, 7  ;;  %v1260_v2 = vmul.f32 %v3483_v50, %v2488_v9 }
  0xc5   :  { %v1248_v40 = vadd.f32 %v1246_v44, %v1238_v30  ;;  %v1289_v4 = vadd.f32 %v3191_v48, %v1277_v31  ;;  %v1262_v42 = vmul.f32 %v3502_v35, %v2494_v12  ;;  %v1266_v24 = vmul.f32 %v3561_v28, %v2500_v15 }
  0xc6   :  { %v1287_v19 = vadd.f32 %v1285_v60, %v1283_v62  ;;  %v1288_v26 = vadd.f32 %v1286_v33, %v1284_v0  ;;  %v1298_v27 = vsel %vm231_vm0, 0.0, %v1293_v38  ;;  %v1270_v36 = vmul.f32 %v3483_v50, %v2490_v10 }
  0xc7   :  { %2323 = vst.msk [vmem:[%s4427_s5 + $0x108] sm:$0xff] %vm251_vm2, %v1248_v40  ;;  %v1299_v18 = vadd.f32 %v1298_v27, %v1289_v4  ;;  %v1264_v8 = vadd.f32 %v1262_v42, %v1260_v2  ;;  %v1272_v23 = vmul.f32 %v3502_v35, %v2496_v13  ;;  %v1276_v32 = vmul.f32 %v3561_v28, %v2502_v16 }
  0xc8   :  { %v1303_v34 = vrot.slane %v1287_v19, 1  ;;  %v1304_v55 = vrot.slane %v1288_v26, 1  ;;  %v1321_v50 = vmul.f32 %v3466_v41, %v2488_v9  ;;  %v1323_v37 = vmul.f32 %v3528_v39, %v2494_v12 }
  0xc9   :  { %v1268_v59 = vadd.f32 %v1266_v24, %v1264_v8  ;;  %v1274_v61 = vadd.f32 %v1272_v23, %v1270_v36  ;;  %v1327_v20 = vmul.f32 %v3592_v57, %v2500_v15  ;;  %v1331_v63 = vmul.f32 %v3466_v41, %v2490_v10 }
  0xca   :  { %v1305_v22 = vsel %vm242_vm1, %v1303_v34, %v1304_v55  ;;  %v1308_v43 = vsel %vm242_vm1, %v1304_v55, 0.0  ;;  %v1325_v1 = vadd.f32 %v1323_v37, %v1321_v50  ;;  %v1333_v46 = vmul.f32 %v3528_v39, %v2496_v13  ;;  %v3652_v34 = vld [vmem:[%s4422_s0 + $0x140] sm:$0xff] }
  0xcb   :  { %v1309_v44 = vadd.f32 %v1305_v22, %v1299_v18  ;;  %v1278_v45 = vadd.f32 %v1276_v32, %v1274_v61  ;;  %v1294_v3 = vrot.slane %v1268_v59, 7  ;;  %v1337_v47 = vmul.f32 %v3592_v57, %v2502_v16 }
  0xcc   :  { %v1329_v5 = vadd.f32 %v1327_v20, %v1325_v1  ;;  %v1335_v6 = vadd.f32 %v1333_v46, %v1331_v63  ;;  %v1341_v49 = vmul.f32 %v3466_v41, %v2492_v11  ;;  %v1342_v51 = vmul.f32 %v3502_v35, %v2492_v11 }
  0xcd   :  { %2330 = vst.msk [vmem:[%s4427_s5 + $0x110] sm:$0xff] %vm251_vm2, %v1309_v44  ;;  %v1290_v21 = vadd.f32 %v3191_v48, %v1278_v45  ;;  %v1295_v52 = vsel %vm231_vm0, %v1293_v38, %v1294_v3  ;;  %v1343_v41 = vmul.f32 %v3528_v39, %v2498_v14  ;;  %v1344_v56 = vmul.f32 %v3561_v28, %v2498_v14 }
  0xce   :  { %v1339_v29 = vadd.f32 %v1337_v47, %v1335_v6  ;;  %v1347_v53 = vmul.f32 %v3592_v57, %v2504_v17  ;;  %v1348_v30 = vmul.f32 %v3621_v25, %v2504_v17  ;;  %v1355_v31 = vrot.slane %v1329_v5, 7 }
  0xcf   :  { %v1300_v60 = vadd.f32 %v1295_v52, %v1290_v21  ;;  %v1345_v33 = vadd.f32 %v1343_v41, %v1341_v49  ;;  %v1346_v62 = vadd.f32 %v1344_v56, %v1342_v51  ;;  %v1322_v0 = vmul.f32 %v3502_v35, %v2488_v9  ;;  %v3681_v21 = vld [vmem:[%s4422_s0 + $0x148] sm:$0xff] }
  0xd0   :  { %v1351_v38 = vadd.f32 %v3191_v48, %v1339_v29  ;;  %v1360_v2 = vsel %vm231_vm0, 0.0, %v1355_v31  ;;  %v1324_v40 = vmul.f32 %v3561_v28, %v2494_v12  ;;  %v1328_v4 = vmul.f32 %v3621_v25, %v2500_v15 }
  0xd1   :  { %v1310_v42 = vadd.f32 %v1308_v43, %v1300_v60  ;;  %v1349_v24 = vadd.f32 %v1347_v53, %v1345_v33  ;;  %v1350_v19 = vadd.f32 %v1348_v30, %v1346_v62  ;;  %v1332_v26 = vmul.f32 %v3502_v35, %v2490_v10 }
  0xd2   :  { %v1361_v27 = vadd.f32 %v1360_v2, %v1351_v38  ;;  %v1326_v36 = vadd.f32 %v1324_v40, %v1322_v0  ;;  %v1334_v18 = vmul.f32 %v3561_v28, %v2496_v13  ;;  %v1338_v8 = vmul.f32 %v3621_v25, %v2502_v16 }
  0xd3   :  { %2331 = vst.msk [vmem:[%s4427_s5 + $0x118] sm:$0xff] %vm251_vm2, %v1310_v42  ;;  %v1365_v23 = vrot.slane %v1349_v24, 1  ;;  %v1366_v32 = vrot.slane %v1350_v19, 1  ;;  %v1383_v35 = vmul.f32 %v3528_v39, %v2488_v9  ;;  %v1385_v55 = vmul.f32 %v3592_v57, %v2494_v12 }
  0xd4   :  { %v1330_v50 = vadd.f32 %v1328_v4, %v1326_v36  ;;  %v1336_v37 = vadd.f32 %v1334_v18, %v1332_v26  ;;  %v1389_v59 = vmul.f32 %v3652_v34, %v2500_v15  ;;  %v1393_v61 = vmul.f32 %v3528_v39, %v2490_v10 }
  0xd5   :  { %v1367_v20 = vsel %vm242_vm1, %v1365_v23, %v1366_v32  ;;  %v1370_v63 = vsel %vm242_vm1, %v1366_v32, 0.0  ;;  %v1387_v22 = vadd.f32 %v1385_v55, %v1383_v35  ;;  %v1395_v43 = vmul.f32 %v3592_v57, %v2496_v13  ;;  %v3712_v23 = vld [vmem:[%s4422_s0 + $0x150] sm:$0xff] }
  0xd6   :  { %v1371_v1 = vadd.f32 %v1367_v20, %v1361_v27  ;;  %v1340_v46 = vadd.f32 %v1338_v8, %v1336_v37  ;;  %v1356_v44 = vrot.slane %v1330_v50, 7  ;;  %v1399_v45 = vmul.f32 %v3652_v34, %v2502_v16 }
  0xd7   :  { %v1391_v3 = vadd.f32 %v1389_v59, %v1387_v22  ;;  %v1397_v47 = vadd.f32 %v1395_v43, %v1393_v61  ;;  %v1403_v5 = vmul.f32 %v3528_v39, %v2492_v11  ;;  %v1404_v6 = vmul.f32 %v3561_v28, %v2492_v11 }
  0xd8   :  { %2338 = vst.msk [vmem:[%s4427_s5 + $0x120] sm:$0xff] %vm251_vm2, %v1371_v1  ;;  %v1352_v49 = vadd.f32 %v3191_v48, %v1340_v46  ;;  %v1357_v51 = vsel %vm231_vm0, %v1355_v31, %v1356_v44  ;;  %v1405_v39 = vmul.f32 %v3592_v57, %v2498_v14  ;;  %v1406_v52 = vmul.f32 %v3621_v25, %v2498_v14 }
  0xd9   :  { %v1401_v41 = vadd.f32 %v1399_v45, %v1397_v47  ;;  %v1409_v56 = vmul.f32 %v3652_v34, %v2504_v17  ;;  %v1410_v29 = vmul.f32 %v3681_v21, %v2504_v17  ;;  %v1417_v53 = vrot.slane %v1391_v3, 7 }
  0xda   :  { %v1362_v30 = vadd.f32 %v1357_v51, %v1352_v49  ;;  %v1407_v31 = vadd.f32 %v1405_v39, %v1403_v5  ;;  %v1408_v60 = vadd.f32 %v1406_v52, %v1404_v6  ;;  %v1384_v33 = vmul.f32 %v3561_v28, %v2488_v9  ;;  %v3741_v49 = vld [vmem:[%s4422_s0 + $0x158] sm:$0xff] }
  0xdb   :  { %v1413_v62 = vadd.f32 %v3191_v48, %v1401_v41  ;;  %v1422_v0 = vsel %vm231_vm0, 0.0, %v1417_v53  ;;  %v1386_v38 = vmul.f32 %v3621_v25, %v2494_v12  ;;  %v1390_v2 = vmul.f32 %v3681_v21, %v2500_v15 }
  0xdc   :  { %v1372_v40 = vadd.f32 %v1370_v63, %v1362_v30  ;;  %v1411_v4 = vadd.f32 %v1409_v56, %v1407_v31  ;;  %v1412_v42 = vadd.f32 %v1410_v29, %v1408_v60  ;;  %v1394_v24 = vmul.f32 %v3561_v28, %v2490_v10 }
  0xdd   :  { %v1423_v19 = vadd.f32 %v1422_v0, %v1413_v62  ;;  %v1388_v26 = vadd.f32 %v1386_v38, %v1384_v33  ;;  %v1396_v27 = vmul.f32 %v3621_v25, %v2496_v13  ;;  %v1400_v36 = vmul.f32 %v3681_v21, %v2502_v16 }
  0xde   :  { %2339 = vst.msk [vmem:[%s4427_s5 + $0x128] sm:$0xff] %vm251_vm2, %v1372_v40  ;;  %v1427_v18 = vrot.slane %v1411_v4, 1  ;;  %v1428_v8 = vrot.slane %v1412_v42, 1  ;;  %v1445_v28 = vmul.f32 %v3592_v57, %v2488_v9  ;;  %v1447_v32 = vmul.f32 %v3652_v34, %v2494_v12 }
  0xdf   :  { %v1392_v35 = vadd.f32 %v1390_v2, %v1388_v26  ;;  %v1398_v55 = vadd.f32 %v1396_v27, %v1394_v24  ;;  %v1451_v50 = vmul.f32 %v3712_v23, %v2500_v15  ;;  %v1455_v37 = vmul.f32 %v3592_v57, %v2490_v10 }
  0xe0   :  { %v1429_v59 = vsel %vm242_vm1, %v1427_v18, %v1428_v8  ;;  %v1432_v61 = vsel %vm242_vm1, %v1428_v8, 0.0  ;;  %v1449_v20 = vadd.f32 %v1447_v32, %v1445_v28  ;;  %v1457_v63 = vmul.f32 %v3652_v34, %v2496_v13  ;;  %v3772_v18 = vld [vmem:[%s4422_s0 + $0x160] sm:$0xff] }
  0xe1   :  { %v1433_v22 = vadd.f32 %v1429_v59, %v1423_v19  ;;  %v1402_v43 = vadd.f32 %v1400_v36, %v1398_v55  ;;  %v1418_v1 = vrot.slane %v1392_v35, 7  ;;  %v1461_v46 = vmul.f32 %v3712_v23, %v2502_v16 }
  0xe2   :  { %v1453_v44 = vadd.f32 %v1451_v50, %v1449_v20  ;;  %v1459_v45 = vadd.f32 %v1457_v63, %v1455_v37  ;;  %v1465_v3 = vmul.f32 %v3592_v57, %v2492_v11  ;;  %v1466_v47 = vmul.f32 %v3621_v25, %v2492_v11 }
  0xe3   :  { %2346 = vst.msk [vmem:[%s4427_s5 + $0x130] sm:$0xff] %vm251_vm2, %v1433_v22  ;;  %v1414_v5 = vadd.f32 %v3191_v48, %v1402_v43  ;;  %v1419_v6 = vsel %vm231_vm0, %v1417_v53, %v1418_v1  ;;  %v1467_v57 = vmul.f32 %v3652_v34, %v2498_v14  ;;  %v1468_v51 = vmul.f32 %v3681_v21, %v2498_v14 }
  0xe4   :  { %v1463_v39 = vadd.f32 %v1461_v46, %v1459_v45  ;;  %v1471_v52 = vmul.f32 %v3712_v23, %v2504_v17  ;;  %v1472_v41 = vmul.f32 %v3741_v49, %v2504_v17  ;;  %v1479_v56 = vrot.slane %v1453_v44, 7 }
  0xe5   :  { %v1424_v29 = vadd.f32 %v1419_v6, %v1414_v5  ;;  %v1469_v53 = vadd.f32 %v1467_v57, %v1465_v3  ;;  %v1470_v30 = vadd.f32 %v1468_v51, %v1466_v47  ;;  %v1446_v31 = vmul.f32 %v3621_v25, %v2488_v9  ;;  %v3801_v5 = vld [vmem:[%s4422_s0 + $0x168] sm:$0xff] }
  0xe6   :  { %v1475_v60 = vadd.f32 %v3191_v48, %v1463_v39  ;;  %v1484_v33 = vsel %vm231_vm0, 0.0, %v1479_v56  ;;  %v1448_v62 = vmul.f32 %v3681_v21, %v2494_v12  ;;  %v1452_v0 = vmul.f32 %v3741_v49, %v2500_v15 }
  0xe7   :  { %v1434_v38 = vadd.f32 %v1432_v61, %v1424_v29  ;;  %v1473_v2 = vadd.f32 %v1471_v52, %v1469_v53  ;;  %v1474_v40 = vadd.f32 %v1472_v41, %v1470_v30  ;;  %v1456_v4 = vmul.f32 %v3621_v25, %v2490_v10 }
  0xe8   :  { %v1485_v42 = vadd.f32 %v1484_v33, %v1475_v60  ;;  %v1450_v24 = vadd.f32 %v1448_v62, %v1446_v31  ;;  %v1458_v19 = vmul.f32 %v3681_v21, %v2496_v13  ;;  %v1462_v26 = vmul.f32 %v3741_v49, %v2502_v16 }
  0xe9   :  { %2347 = vst.msk [vmem:[%s4427_s5 + $0x138] sm:$0xff] %vm251_vm2, %v1434_v38  ;;  %v1489_v27 = vrot.slane %v1473_v2, 1  ;;  %v1490_v36 = vrot.slane %v1474_v40, 1  ;;  %v1507_v25 = vmul.f32 %v3652_v34, %v2488_v9  ;;  %v1509_v8 = vmul.f32 %v3712_v23, %v2494_v12 }
  0xea   :  { %v1454_v28 = vadd.f32 %v1452_v0, %v1450_v24  ;;  %v1460_v32 = vadd.f32 %v1458_v19, %v1456_v4  ;;  %v1513_v35 = vmul.f32 %v3772_v18, %v2500_v15  ;;  %v1517_v55 = vmul.f32 %v3652_v34, %v2490_v10 }
  0xeb   :  { %v1491_v50 = vsel %vm242_vm1, %v1489_v27, %v1490_v36  ;;  %v1494_v37 = vsel %vm242_vm1, %v1490_v36, 0.0  ;;  %v1511_v59 = vadd.f32 %v1509_v8, %v1507_v25  ;;  %v1519_v61 = vmul.f32 %v3712_v23, %v2496_v13 }
  0xec   :  { %v1495_v20 = vadd.f32 %v1491_v50, %v1485_v42  ;;  %v1464_v63 = vadd.f32 %v1462_v26, %v1460_v32  ;;  %v1480_v22 = vrot.slane %v1454_v28, 7  ;;  %v1523_v43 = vmul.f32 %v3772_v18, %v2502_v16  ;;  %v3832_v26 = vld [vmem:[%s4422_s0 + $0x170] sm:$0xff] }
  0xed   :  { %v1515_v1 = vadd.f32 %v1513_v35, %v1511_v59  ;;  %v1521_v46 = vadd.f32 %v1519_v61, %v1517_v55  ;;  %v1527_v44 = vmul.f32 %v3652_v34, %v2492_v11  ;;  %v1528_v45 = vmul.f32 %v3681_v21, %v2492_v11 }
  0xee   :  { %2354 = vst.msk [vmem:[%s4427_s5 + $0x140] sm:$0xff] %vm251_vm2, %v1495_v20  ;;  %v1476_v3 = vadd.f32 %v3191_v48, %v1464_v63  ;;  %v1481_v47 = vsel %vm231_vm0, %v1479_v56, %v1480_v22  ;;  %v1529_v34 = vmul.f32 %v3712_v23, %v2498_v14  ;;  %v1530_v6 = vmul.f32 %v3741_v49, %v2498_v14 }
  0xef   :  { %v1525_v57 = vadd.f32 %v1523_v43, %v1521_v46  ;;  %v1533_v51 = vmul.f32 %v3772_v18, %v2504_v17  ;;  %v1534_v39 = vmul.f32 %v3801_v5, %v2504_v17  ;;  %v1541_v52 = vrot.slane %v1515_v1, 7  ;;  %v3859_v46 = vld [vmem:[%s4426_s4] ss:$0 sm:$0xff] }
  0xf0   :  { %v1486_v41 = vadd.f32 %v1481_v47, %v1476_v3  ;;  %v1531_v56 = vadd.f32 %v1529_v34, %v1527_v44  ;;  %v1532_v29 = vadd.f32 %v1530_v6, %v1528_v45  ;;  %v1508_v53 = vmul.f32 %v3681_v21, %v2488_v9 }
  0xf1   :  { %v1537_v30 = vadd.f32 %v3191_v48, %v1525_v57  ;;  %v1546_v31 = vsel %vm231_vm0, 0.0, %v1541_v52  ;;  %v1510_v60 = vmul.f32 %v3741_v49, %v2494_v12  ;;  %v1514_v33 = vmul.f32 %v3801_v5, %v2500_v15 }
  0xf2   :  { %v1496_v62 = vadd.f32 %v1494_v37, %v1486_v41  ;;  %v1535_v0 = vadd.f32 %v1533_v51, %v1531_v56  ;;  %v1536_v38 = vadd.f32 %v1534_v39, %v1532_v29  ;;  %v1518_v2 = vmul.f32 %v3681_v21, %v2490_v10 }
  0xf3   :  { %v1547_v40 = vadd.f32 %v1546_v31, %v1537_v30  ;;  %v1512_v4 = vadd.f32 %v1510_v60, %v1508_v53  ;;  %v1520_v42 = vmul.f32 %v3741_v49, %v2496_v13  ;;  %v1524_v48 = vmul.f32 %v3801_v5, %v2502_v16 }
  0xf4   :  { %2355 = vst.msk [vmem:[%s4427_s5 + $0x148] sm:$0xff] %vm251_vm2, %v1496_v62  ;;  %v1551_v24 = vrot.slane %v1535_v0, 1  ;;  %v1552_v19 = vrot.slane %v1536_v38, 1  ;;  %v1569_v21 = vmul.f32 %v3712_v23, %v2488_v9  ;;  %v1571_v27 = vmul.f32 %v3772_v18, %v2494_v12 }
  0xf5   :  { %v1516_v36 = vadd.f32 %v1514_v33, %v1512_v4  ;;  %v1522_v25 = vadd.f32 %v1520_v42, %v1518_v2  ;;  %v1575_v8 = vmul.f32 %v3832_v26, %v2500_v15  ;;  %v1579_v28 = vmul.f32 %v3712_v23, %v2490_v10 }
  0xf6   :  { %v1553_v32 = vsel %vm242_vm1, %v1551_v24, %v1552_v19  ;;  %v1556_v35 = vsel %vm242_vm1, %v1552_v19, 0.0  ;;  %v1573_v55 = vadd.f32 %v1571_v27, %v1569_v21  ;;  %v1581_v50 = vmul.f32 %v3772_v18, %v2496_v13  ;;  %v3897_v24 = vld [vmem:[%s4422_s0 + $0x180] sm:$0xff] }
  0xf7   :  { %v1557_v37 = vadd.f32 %v1553_v32, %v1547_v40  ;;  %v1526_v59 = vadd.f32 %v1524_v48, %v1522_v25  ;;  %v1542_v61 = vrot.slane %v1516_v36, 7  ;;  %v1585_v20 = vmul.f32 %v3832_v26, %v2502_v16 }
  0xf8   :  { %v1577_v63 = vadd.f32 %v1575_v8, %v1573_v55  ;;  %v1583_v22 = vadd.f32 %v1581_v50, %v1579_v28  ;;  %v1589_v43 = vmul.f32 %v3712_v23, %v2492_v11  ;;  %v1590_v1 = vmul.f32 %v3741_v49, %v2492_v11  ;;  %v3866_v23 = vld [vmem:[%s4422_s0 + $0x178] sm:$0xff] }
  0xf9   :  { %2362 = vst.msk [vmem:[%s4427_s5 + $0x150] sm:$0xff] %vm251_vm2, %v1557_v37  ;;  %v1538_v44 = vadd.f32 %v3859_v46, %v1526_v59  ;;  %v1543_v45 = vsel %vm231_vm0, %v1541_v52, %v1542_v61  ;;  %v1591_v3 = vmul.f32 %v3772_v18, %v2498_v14  ;;  %v1592_v47 = vmul.f32 %v3801_v5, %v2498_v14 }
  0xfa   :  { %v1587_v34 = vadd.f32 %v1585_v20, %v1583_v22  ;;  %v1595_v6 = vmul.f32 %v3832_v26, %v2504_v17  ;;  %v1596_v57 = vmul.f32 %v3866_v23, %v2504_v17  ;;  %v1603_v51 = vrot.slane %v1577_v63, 7 }
  0xfb   :  { %v1548_v39 = vadd.f32 %v1543_v45, %v1538_v44  ;;  %v1593_v52 = vadd.f32 %v1591_v3, %v1589_v43  ;;  %v1594_v41 = vadd.f32 %v1592_v47, %v1590_v1  ;;  %v1570_v56 = vmul.f32 %v3741_v49, %v2488_v9  ;;  %v3926_v44 = vld [vmem:[%s4422_s0 + $0x188] sm:$0xff] }
  0xfc   :  { %v1599_v29 = vadd.f32 %v3859_v46, %v1587_v34  ;;  %v1608_v53 = vsel %vm231_vm0, 0.0, %v1603_v51  ;;  %v1572_v30 = vmul.f32 %v3801_v5, %v2494_v12  ;;  %v1576_v31 = vmul.f32 %v3866_v23, %v2500_v15 }
  0xfd   :  { %v1558_v60 = vadd.f32 %v1556_v35, %v1548_v39  ;;  %v1597_v33 = vadd.f32 %v1595_v6, %v1593_v52  ;;  %v1598_v62 = vadd.f32 %v1596_v57, %v1594_v41  ;;  %v1580_v0 = vmul.f32 %v3741_v49, %v2490_v10 }
  0xfe   :  { %v1609_v38 = vadd.f32 %v1608_v53, %v1599_v29  ;;  %v1574_v2 = vadd.f32 %v1572_v30, %v1570_v56  ;;  %v1582_v40 = vmul.f32 %v3801_v5, %v2496_v13  ;;  %v1586_v4 = vmul.f32 %v3866_v23, %v2502_v16 }
  0xff   :  { %2363 = vst.msk [vmem:[%s4427_s5 + $0x158] sm:$0xff] %vm251_vm2, %v1558_v60  ;;  %v1613_v42 = vrot.slane %v1597_v33, 1  ;;  %v1614_v48 = vrot.slane %v1598_v62, 1  ;;  %v1631_v49 = vmul.f32 %v3772_v18, %v2488_v9  ;;  %v1633_v19 = vmul.f32 %v3832_v26, %v2494_v12 }
 0x100   :  { %v1578_v21 = vadd.f32 %v1576_v31, %v1574_v2  ;;  %v1584_v27 = vadd.f32 %v1582_v40, %v1580_v0  ;;  %v1637_v36 = vmul.f32 %v3897_v24, %v2500_v15  ;;  %v1641_v25 = vmul.f32 %v3772_v18, %v2490_v10 }
 0x101   :  { %v1615_v8 = vsel %vm242_vm1, %v1613_v42, %v1614_v48  ;;  %v1618_v28 = vsel %vm242_vm1, %v1614_v48, 0.0  ;;  %v1635_v32 = vadd.f32 %v1633_v19, %v1631_v49  ;;  %v1643_v35 = vmul.f32 %v3832_v26, %v2496_v13  ;;  %v3957_v42 = vld [vmem:[%s4422_s0 + $0x190] sm:$0xff] }
 0x102   :  { %v1619_v55 = vadd.f32 %v1615_v8, %v1609_v38  ;;  %v1588_v50 = vadd.f32 %v1586_v4, %v1584_v27  ;;  %v1604_v37 = vrot.slane %v1578_v21, 7  ;;  %v1647_v59 = vmul.f32 %v3897_v24, %v2502_v16 }
 0x103   :  { %v1639_v61 = vadd.f32 %v1637_v36, %v1635_v32  ;;  %v1645_v20 = vadd.f32 %v1643_v35, %v1641_v25  ;;  %v1651_v63 = vmul.f32 %v3772_v18, %v2492_v11  ;;  %v1652_v22 = vmul.f32 %v3801_v5, %v2492_v11 }
 0x104   :  { %2370 = vst.msk [vmem:[%s4427_s5 + $0x160] sm:$0xff] %vm251_vm2, %v1619_v55  ;;  %v1600_v43 = vadd.f32 %v3859_v46, %v1588_v50  ;;  %v1605_v1 = vsel %vm231_vm0, %v1603_v51, %v1604_v37  ;;  %v1653_v18 = vmul.f32 %v3832_v26, %v2498_v14  ;;  %v1654_v45 = vmul.f32 %v3866_v23, %v2498_v14 }
 0x105   :  { %v1649_v3 = vadd.f32 %v1647_v59, %v1645_v20  ;;  %v1657_v47 = vmul.f32 %v3897_v24, %v2504_v17  ;;  %v1658_v34 = vmul.f32 %v3926_v44, %v2504_v17  ;;  %v1665_v6 = vrot.slane %v1639_v61, 7 }
 0x106   :  { %v1610_v57 = vadd.f32 %v1605_v1, %v1600_v43  ;;  %v1655_v51 = vadd.f32 %v1653_v18, %v1651_v63  ;;  %v1656_v39 = vadd.f32 %v1654_v45, %v1652_v22  ;;  %v1632_v52 = vmul.f32 %v3801_v5, %v2488_v9  ;;  %v3986_v43 = vld [vmem:[%s4422_s0 + $0x198] sm:$0xff] }
 0x107   :  { %v1661_v41 = vadd.f32 %v3859_v46, %v1649_v3  ;;  %v1670_v56 = vsel %vm231_vm0, 0.0, %v1665_v6  ;;  %v1634_v29 = vmul.f32 %v3866_v23, %v2494_v12  ;;  %v1638_v53 = vmul.f32 %v3926_v44, %v2500_v15 }
 0x108   :  { %v1620_v30 = vadd.f32 %v1618_v28, %v1610_v57  ;;  %v1659_v31 = vadd.f32 %v1657_v47, %v1655_v51  ;;  %v1660_v60 = vadd.f32 %v1658_v34, %v1656_v39  ;;  %v1642_v33 = vmul.f32 %v3801_v5, %v2490_v10 }
 0x109   :  { %v1671_v62 = vadd.f32 %v1670_v56, %v1661_v41  ;;  %v1636_v0 = vadd.f32 %v1634_v29, %v1632_v52  ;;  %v1644_v38 = vmul.f32 %v3866_v23, %v2496_v13  ;;  %v1648_v2 = vmul.f32 %v3926_v44, %v2502_v16 }
 0x10a   :  { %2371 = vst.msk [vmem:[%s4427_s5 + $0x168] sm:$0xff] %vm251_vm2, %v1620_v30  ;;  %v1675_v40 = vrot.slane %v1659_v31, 1  ;;  %v1676_v4 = vrot.slane %v1660_v60, 1  ;;  %v1693_v5 = vmul.f32 %v3832_v26, %v2488_v9  ;;  %v1695_v48 = vmul.f32 %v3897_v24, %v2494_v12 }
 0x10b   :  { %v1640_v49 = vadd.f32 %v1638_v53, %v1636_v0  ;;  %v1646_v19 = vadd.f32 %v1644_v38, %v1642_v33  ;;  %v1699_v21 = vmul.f32 %v3957_v42, %v2500_v15  ;;  %v1703_v27 = vmul.f32 %v3832_v26, %v2490_v10 }
 0x10c   :  { %v1677_v36 = vsel %vm242_vm1, %v1675_v40, %v1676_v4  ;;  %v1680_v25 = vsel %vm242_vm1, %v1676_v4, 0.0  ;;  %v1697_v8 = vadd.f32 %v1695_v48, %v1693_v5  ;;  %v1705_v28 = vmul.f32 %v3897_v24, %v2496_v13  ;;  %v4017_v40 = vld [vmem:[%s4422_s0 + $0x1a0] sm:$0xff] }
 0x10d   :  { %v1681_v32 = vadd.f32 %v1677_v36, %v1671_v62  ;;  %v1650_v35 = vadd.f32 %v1648_v2, %v1646_v19  ;;  %v1666_v55 = vrot.slane %v1640_v49, 7  ;;  %v1709_v50 = vmul.f32 %v3957_v42, %v2502_v16 }
 0x10e   :  { %v1701_v37 = vadd.f32 %v1699_v21, %v1697_v8  ;;  %v1707_v59 = vadd.f32 %v1705_v28, %v1703_v27  ;;  %v1713_v61 = vmul.f32 %v3832_v26, %v2492_v11  ;;  %v1714_v20 = vmul.f32 %v3866_v23, %v2492_v11 }
 0x10f   :  { %2378 = vst.msk [vmem:[%s4427_s5 + $0x170] sm:$0xff] %vm251_vm2, %v1681_v32  ;;  %v1662_v63 = vadd.f32 %v3859_v46, %v1650_v35  ;;  %v1667_v22 = vsel %vm231_vm0, %v1665_v6, %v1666_v55  ;;  %v1715_v26 = vmul.f32 %v3897_v24, %v2498_v14  ;;  %v1716_v1 = vmul.f32 %v3926_v44, %v2498_v14 }
 0x110   :  { %v1711_v18 = vadd.f32 %v1709_v50, %v1707_v59  ;;  %v1719_v45 = vmul.f32 %v3957_v42, %v2504_v17  ;;  %v1720_v3 = vmul.f32 %v3986_v43, %v2504_v17  ;;  %v1727_v47 = vrot.slane %v1701_v37, 7 }
 0x111   :  { %v1672_v34 = vadd.f32 %v1667_v22, %v1662_v63  ;;  %v1717_v6 = vadd.f32 %v1715_v26, %v1713_v61  ;;  %v1718_v57 = vadd.f32 %v1716_v1, %v1714_v20  ;;  %v1694_v51 = vmul.f32 %v3866_v23, %v2488_v9  ;;  %v4046_v63 = vld [vmem:[%s4422_s0 + $0x1a8] sm:$0xff] }
 0x112   :  { %v1723_v39 = vadd.f32 %v3859_v46, %v1711_v18  ;;  %v1732_v52 = vsel %vm231_vm0, 0.0, %v1727_v47  ;;  %v1696_v41 = vmul.f32 %v3926_v44, %v2494_v12  ;;  %v1700_v56 = vmul.f32 %v3986_v43, %v2500_v15 }
 0x113   :  { %v1682_v29 = vadd.f32 %v1680_v25, %v1672_v34  ;;  %v1721_v53 = vadd.f32 %v1719_v45, %v1717_v6  ;;  %v1722_v30 = vadd.f32 %v1720_v3, %v1718_v57  ;;  %v1704_v31 = vmul.f32 %v3866_v23, %v2490_v10 }
 0x114   :  { %v1733_v60 = vadd.f32 %v1732_v52, %v1723_v39  ;;  %v1698_v33 = vadd.f32 %v1696_v41, %v1694_v51  ;;  %v1706_v62 = vmul.f32 %v3926_v44, %v2496_v13  ;;  %v1710_v0 = vmul.f32 %v3986_v43, %v2502_v16 }
 0x115   :  { %2379 = vst.msk [vmem:[%s4427_s5 + $0x178] sm:$0xff] %vm251_vm2, %v1682_v29  ;;  %v1737_v38 = vrot.slane %v1721_v53, 1  ;;  %v1738_v2 = vrot.slane %v1722_v30, 1  ;;  %v1755_v23 = vmul.f32 %v3897_v24, %v2488_v9  ;;  %v1757_v4 = vmul.f32 %v3957_v42, %v2494_v12 }
 0x116   :  { %v1702_v5 = vadd.f32 %v1700_v56, %v1698_v33  ;;  %v1708_v48 = vadd.f32 %v1706_v62, %v1704_v31  ;;  %v1761_v49 = vmul.f32 %v4017_v40, %v2500_v15  ;;  %v1765_v19 = vmul.f32 %v3897_v24, %v2490_v10 }
 0x117   :  { %v1739_v21 = vsel %vm242_vm1, %v1737_v38, %v1738_v2  ;;  %v1742_v27 = vsel %vm242_vm1, %v1738_v2, 0.0  ;;  %v1759_v36 = vadd.f32 %v1757_v4, %v1755_v23  ;;  %v1767_v25 = vmul.f32 %v3957_v42, %v2496_v13  ;;  %v4077_v38 = vld [vmem:[%s4422_s0 + $0x1b0] sm:$0xff] }
 0x118   :  { %v1743_v8 = vadd.f32 %v1739_v21, %v1733_v60  ;;  %v1712_v28 = vadd.f32 %v1710_v0, %v1708_v48  ;;  %v1728_v32 = vrot.slane %v1702_v5, 7  ;;  %v1771_v35 = vmul.f32 %v4017_v40, %v2502_v16 }
 0x119   :  { %v1763_v55 = vadd.f32 %v1761_v49, %v1759_v36  ;;  %v1769_v50 = vadd.f32 %v1767_v25, %v1765_v19  ;;  %v1775_v37 = vmul.f32 %v3897_v24, %v2492_v11  ;;  %v1776_v59 = vmul.f32 %v3926_v44, %v2492_v11 }
 0x11a   :  { %2386 = vst.msk [vmem:[%s4427_s5 + $0x180] sm:$0xff] %vm251_vm2, %v1743_v8  ;;  %v1724_v61 = vadd.f32 %v3859_v46, %v1712_v28  ;;  %v1729_v20 = vsel %vm231_vm0, %v1727_v47, %v1728_v32  ;;  %v1777_v24 = vmul.f32 %v3957_v42, %v2498_v14  ;;  %v1778_v22 = vmul.f32 %v3986_v43, %v2498_v14 }
 0x11b   :  { %v1773_v26 = vadd.f32 %v1771_v35, %v1769_v50  ;;  %v1781_v1 = vmul.f32 %v4017_v40, %v2504_v17  ;;  %v1782_v18 = vmul.f32 %v4046_v63, %v2504_v17  ;;  %v1789_v45 = vrot.slane %v1763_v55, 7 }
 0x11c   :  { %v1734_v3 = vadd.f32 %v1729_v20, %v1724_v61  ;;  %v1779_v47 = vadd.f32 %v1777_v24, %v1775_v37  ;;  %v1780_v34 = vadd.f32 %v1778_v22, %v1776_v59  ;;  %v1756_v6 = vmul.f32 %v3926_v44, %v2488_v9  ;;  %v4106_v61 = vld [vmem:[%s4422_s0 + $0x1b8] sm:$0xff] }
 0x11d   :  { %v1785_v57 = vadd.f32 %v3859_v46, %v1773_v26  ;;  %v1794_v51 = vsel %vm231_vm0, 0.0, %v1789_v45  ;;  %v1758_v39 = vmul.f32 %v3986_v43, %v2494_v12  ;;  %v1762_v52 = vmul.f32 %v4046_v63, %v2500_v15 }
 0x11e   :  { %v1744_v41 = vadd.f32 %v1742_v27, %v1734_v3  ;;  %v1783_v56 = vadd.f32 %v1781_v1, %v1779_v47  ;;  %v1784_v29 = vadd.f32 %v1782_v18, %v1780_v34  ;;  %v1766_v53 = vmul.f32 %v3926_v44, %v2490_v10 }
 0x11f   :  { %v1795_v30 = vadd.f32 %v1794_v51, %v1785_v57  ;;  %v1760_v31 = vadd.f32 %v1758_v39, %v1756_v6  ;;  %v1768_v60 = vmul.f32 %v3986_v43, %v2496_v13  ;;  %v1772_v33 = vmul.f32 %v4046_v63, %v2502_v16 }
 0x120   :  { %2387 = vst.msk [vmem:[%s4427_s5 + $0x188] sm:$0xff] %vm251_vm2, %v1744_v41  ;;  %v1799_v62 = vrot.slane %v1783_v56, 1  ;;  %v1800_v0 = vrot.slane %v1784_v29, 1  ;;  %v1817_v44 = vmul.f32 %v3957_v42, %v2488_v9  ;;  %v1819_v2 = vmul.f32 %v4017_v40, %v2494_v12 }
 0x121   :  { %v1764_v23 = vadd.f32 %v1762_v52, %v1760_v31  ;;  %v1770_v4 = vadd.f32 %v1768_v60, %v1766_v53  ;;  %v1823_v5 = vmul.f32 %v4077_v38, %v2500_v15  ;;  %v1827_v48 = vmul.f32 %v3957_v42, %v2490_v10 }
 0x122   :  { %v1801_v49 = vsel %vm242_vm1, %v1799_v62, %v1800_v0  ;;  %v1804_v19 = vsel %vm242_vm1, %v1800_v0, 0.0  ;;  %v1821_v21 = vadd.f32 %v1819_v2, %v1817_v44  ;;  %v1829_v27 = vmul.f32 %v4017_v40, %v2496_v13  ;;  %v4137_v62 = vld [vmem:[%s4422_s0 + $0x1c0] sm:$0xff] }
 0x123   :  { %v1805_v36 = vadd.f32 %v1801_v49, %v1795_v30  ;;  %v1774_v25 = vadd.f32 %v1772_v33, %v1770_v4  ;;  %v1790_v8 = vrot.slane %v1764_v23, 7  ;;  %v1833_v28 = vmul.f32 %v4077_v38, %v2502_v16 }
 0x124   :  { %v1825_v32 = vadd.f32 %v1823_v5, %v1821_v21  ;;  %v1831_v35 = vadd.f32 %v1829_v27, %v1827_v48  ;;  %v1837_v55 = vmul.f32 %v3957_v42, %v2492_v11  ;;  %v1838_v50 = vmul.f32 %v3986_v43, %v2492_v11 }
 0x125   :  { %2394 = vst.msk [vmem:[%s4427_s5 + $0x190] sm:$0xff] %vm251_vm2, %v1805_v36  ;;  %v1786_v37 = vadd.f32 %v3859_v46, %v1774_v25  ;;  %v1791_v59 = vsel %vm231_vm0, %v1789_v45, %v1790_v8  ;;  %v1839_v42 = vmul.f32 %v4017_v40, %v2498_v14  ;;  %v1840_v20 = vmul.f32 %v4046_v63, %v2498_v14 }
 0x126   :  { %v1835_v24 = vadd.f32 %v1833_v28, %v1831_v35  ;;  %v1843_v22 = vmul.f32 %v4077_v38, %v2504_v17  ;;  %v1844_v26 = vmul.f32 %v4106_v61, %v2504_v17  ;;  %v1851_v1 = vrot.slane %v1825_v32, 7 }
 0x127   :  { %v1796_v18 = vadd.f32 %v1791_v59, %v1786_v37  ;;  %v1841_v45 = vadd.f32 %v1839_v42, %v1837_v55  ;;  %v1842_v3 = vadd.f32 %v1840_v20, %v1838_v50  ;;  %v1818_v47 = vmul.f32 %v3986_v43, %v2488_v9  ;;  %v4166_v37 = vld [vmem:[%s4422_s0 + $0x1c8] sm:$0xff] }
 0x128   :  { %v1847_v34 = vadd.f32 %v3859_v46, %v1835_v24  ;;  %v1856_v6 = vsel %vm231_vm0, 0.0, %v1851_v1  ;;  %v1820_v57 = vmul.f32 %v4046_v63, %v2494_v12  ;;  %v1824_v51 = vmul.f32 %v4106_v61, %v2500_v15 }
 0x129   :  { %v1806_v39 = vadd.f32 %v1804_v19, %v1796_v18  ;;  %v1845_v52 = vadd.f32 %v1843_v22, %v1841_v45  ;;  %v1846_v41 = vadd.f32 %v1844_v26, %v1842_v3  ;;  %v1828_v56 = vmul.f32 %v3986_v43, %v2490_v10 }
 0x12a   :  { %v1857_v29 = vadd.f32 %v1856_v6, %v1847_v34  ;;  %v1822_v53 = vadd.f32 %v1820_v57, %v1818_v47  ;;  %v1830_v30 = vmul.f32 %v4046_v63, %v2496_v13  ;;  %v1834_v31 = vmul.f32 %v4106_v61, %v2502_v16 }
 0x12b   :  { %2395 = vst.msk [vmem:[%s4427_s5 + $0x198] sm:$0xff] %vm251_vm2, %v1806_v39  ;;  %v1861_v60 = vrot.slane %v1845_v52, 1  ;;  %v1862_v33 = vrot.slane %v1846_v41, 1  ;;  %v1879_v43 = vmul.f32 %v4017_v40, %v2488_v9  ;;  %v1881_v0 = vmul.f32 %v4077_v38, %v2494_v12 }
 0x12c   :  { %v1826_v44 = vadd.f32 %v1824_v51, %v1822_v53  ;;  %v1832_v2 = vadd.f32 %v1830_v30, %v1828_v56  ;;  %v1885_v23 = vmul.f32 %v4137_v62, %v2500_v15  ;;  %v1889_v4 = vmul.f32 %v4017_v40, %v2490_v10 }
 0x12d   :  { %v1863_v5 = vsel %vm242_vm1, %v1861_v60, %v1862_v33  ;;  %v1866_v48 = vsel %vm242_vm1, %v1862_v33, 0.0  ;;  %v1883_v49 = vadd.f32 %v1881_v0, %v1879_v43  ;;  %v1891_v19 = vmul.f32 %v4077_v38, %v2496_v13  ;;  %v4197_v60 = vld [vmem:[%s4422_s0 + $0x1d0] sm:$0xff] }
 0x12e   :  { %v1867_v21 = vadd.f32 %v1863_v5, %v1857_v29  ;;  %v1836_v27 = vadd.f32 %v1834_v31, %v1832_v2  ;;  %v1852_v36 = vrot.slane %v1826_v44, 7  ;;  %v1895_v25 = vmul.f32 %v4137_v62, %v2502_v16 }
 0x12f   :  { %v1887_v8 = vadd.f32 %v1885_v23, %v1883_v49  ;;  %v1893_v28 = vadd.f32 %v1891_v19, %v1889_v4  ;;  %v1899_v32 = vmul.f32 %v4017_v40, %v2492_v11  ;;  %v1900_v35 = vmul.f32 %v4046_v63, %v2492_v11 }
 0x130   :  { %2402 = vst.msk [vmem:[%s4427_s5 + $0x1a0] sm:$0xff] %vm251_vm2, %v1867_v21  ;;  %v1848_v55 = vadd.f32 %v3859_v46, %v1836_v27  ;;  %v1853_v50 = vsel %vm231_vm0, %v1851_v1, %v1852_v36  ;;  %v1901_v40 = vmul.f32 %v4077_v38, %v2498_v14  ;;  %v1902_v59 = vmul.f32 %v4106_v61, %v2498_v14 }
 0x131   :  { %v1897_v42 = vadd.f32 %v1895_v25, %v1893_v28  ;;  %v1905_v20 = vmul.f32 %v4137_v62, %v2504_v17  ;;  %v1906_v24 = vmul.f32 %v4166_v37, %v2504_v17  ;;  %v1913_v22 = vrot.slane %v1887_v8, 7 }
 0x132   :  { %v1858_v26 = vadd.f32 %v1853_v50, %v1848_v55  ;;  %v1903_v1 = vadd.f32 %v1901_v40, %v1899_v32  ;;  %v1904_v18 = vadd.f32 %v1902_v59, %v1900_v35  ;;  %v1880_v45 = vmul.f32 %v4046_v63, %v2488_v9  ;;  %v4226_v55 = vld [vmem:[%s4422_s0 + $0x1d8] sm:$0xff] }
 0x133   :  { %v1909_v3 = vadd.f32 %v3859_v46, %v1897_v42  ;;  %v1918_v47 = vsel %vm231_vm0, 0.0, %v1913_v22  ;;  %v1882_v34 = vmul.f32 %v4106_v61, %v2494_v12  ;;  %v1886_v6 = vmul.f32 %v4166_v37, %v2500_v15 }
 0x134   :  { %v1868_v57 = vadd.f32 %v1866_v48, %v1858_v26  ;;  %v1907_v51 = vadd.f32 %v1905_v20, %v1903_v1  ;;  %v1908_v39 = vadd.f32 %v1906_v24, %v1904_v18  ;;  %v1890_v52 = vmul.f32 %v4046_v63, %v2490_v10 }
 0x135   :  { %v1919_v41 = vadd.f32 %v1918_v47, %v1909_v3  ;;  %v1884_v56 = vadd.f32 %v1882_v34, %v1880_v45  ;;  %v1892_v29 = vmul.f32 %v4106_v61, %v2496_v13  ;;  %v1896_v53 = vmul.f32 %v4166_v37, %v2502_v16 }
 0x136   :  { %2403 = vst.msk [vmem:[%s4427_s5 + $0x1a8] sm:$0xff] %vm251_vm2, %v1868_v57  ;;  %v1923_v30 = vrot.slane %v1907_v51, 1  ;;  %v1924_v31 = vrot.slane %v1908_v39, 1  ;;  %v1941_v63 = vmul.f32 %v4077_v38, %v2488_v9  ;;  %v1943_v33 = vmul.f32 %v4137_v62, %v2494_v12 }
 0x137   :  { %v1888_v43 = vadd.f32 %v1886_v6, %v1884_v56  ;;  %v1894_v0 = vadd.f32 %v1892_v29, %v1890_v52  ;;  %v1947_v44 = vmul.f32 %v4197_v60, %v2500_v15  ;;  %v1951_v2 = vmul.f32 %v4077_v38, %v2490_v10 }
 0x138   :  { %v1925_v23 = vsel %vm242_vm1, %v1923_v30, %v1924_v31  ;;  %v1928_v4 = vsel %vm242_vm1, %v1924_v31, 0.0  ;;  %v1945_v5 = vadd.f32 %v1943_v33, %v1941_v63  ;;  %v1953_v48 = vmul.f32 %v4137_v62, %v2496_v13  ;;  %v4257_v30 = vld [vmem:[%s4422_s0 + $0x1e0] sm:$0xff] }
 0x139   :  { %v1929_v49 = vadd.f32 %v1925_v23, %v1919_v41  ;;  %v1898_v19 = vadd.f32 %v1896_v53, %v1894_v0  ;;  %v1914_v21 = vrot.slane %v1888_v43, 7  ;;  %v1957_v27 = vmul.f32 %v4197_v60, %v2502_v16 }
 0x13a   :  { %v1949_v36 = vadd.f32 %v1947_v44, %v1945_v5  ;;  %v1955_v25 = vadd.f32 %v1953_v48, %v1951_v2  ;;  %v1961_v8 = vmul.f32 %v4077_v38, %v2492_v11  ;;  %v1962_v28 = vmul.f32 %v4106_v61, %v2492_v11 }
 0x13b   :  { %2410 = vst.msk [vmem:[%s4427_s5 + $0x1b0] sm:$0xff] %vm251_vm2, %v1929_v49  ;;  %v1910_v32 = vadd.f32 %v3859_v46, %v1898_v19  ;;  %v1915_v35 = vsel %vm231_vm0, %v1913_v22, %v1914_v21  ;;  %v1963_v38 = vmul.f32 %v4137_v62, %v2498_v14  ;;  %v1964_v50 = vmul.f32 %v4166_v37, %v2498_v14 }
 0x13c   :  { %v1959_v40 = vadd.f32 %v1957_v27, %v1955_v25  ;;  %v1967_v59 = vmul.f32 %v4197_v60, %v2504_v17  ;;  %v1968_v42 = vmul.f32 %v4226_v55, %v2504_v17  ;;  %v1975_v20 = vrot.slane %v1949_v36, 7 }
 0x13d   :  { %v1920_v24 = vadd.f32 %v1915_v35, %v1910_v32  ;;  %v1965_v22 = vadd.f32 %v1963_v38, %v1961_v8  ;;  %v1966_v26 = vadd.f32 %v1964_v50, %v1962_v28  ;;  %v1942_v1 = vmul.f32 %v4106_v61, %v2488_v9  ;;  %v4286_v32 = vld [vmem:[%s4422_s0 + $0x1e8] sm:$0xff] }
 0x13e   :  { %v1971_v18 = vadd.f32 %v3859_v46, %v1959_v40  ;;  %v1980_v45 = vsel %vm231_vm0, 0.0, %v1975_v20  ;;  %v1944_v3 = vmul.f32 %v4166_v37, %v2494_v12  ;;  %v1948_v47 = vmul.f32 %v4226_v55, %v2500_v15 }
 0x13f   :  { %v1930_v34 = vadd.f32 %v1928_v4, %v1920_v24  ;;  %v1969_v6 = vadd.f32 %v1967_v59, %v1965_v22  ;;  %v1970_v57 = vadd.f32 %v1968_v42, %v1966_v26  ;;  %v1952_v51 = vmul.f32 %v4106_v61, %v2490_v10 }
 0x140   :  { %v1981_v39 = vadd.f32 %v1980_v45, %v1971_v18  ;;  %v1946_v52 = vadd.f32 %v1944_v3, %v1942_v1  ;;  %v1954_v41 = vmul.f32 %v4166_v37, %v2496_v13  ;;  %v1958_v56 = vmul.f32 %v4226_v55, %v2502_v16 }
 0x141   :  { %2411 = vst.msk [vmem:[%s4427_s5 + $0x1b8] sm:$0xff] %vm251_vm2, %v1930_v34  ;;  %v1985_v29 = vrot.slane %v1969_v6, 1  ;;  %v1986_v53 = vrot.slane %v1970_v57, 1  ;;  %v2003_v61 = vmul.f32 %v4137_v62, %v2488_v9  ;;  %v2005_v31 = vmul.f32 %v4197_v60, %v2494_v12 }
 0x142   :  { %v1950_v63 = vadd.f32 %v1948_v47, %v1946_v52  ;;  %v1956_v33 = vadd.f32 %v1954_v41, %v1952_v51  ;;  %v2009_v43 = vmul.f32 %v4257_v30, %v2500_v15  ;;  %v2013_v0 = vmul.f32 %v4137_v62, %v2490_v10 }
 0x143   :  { %v1987_v44 = vsel %vm242_vm1, %v1985_v29, %v1986_v53  ;;  %v1990_v2 = vsel %vm242_vm1, %v1986_v53, 0.0  ;;  %v2007_v23 = vadd.f32 %v2005_v31, %v2003_v61  ;;  %v2015_v4 = vmul.f32 %v4197_v60, %v2496_v13  ;;  %v4317_v29 = vld [vmem:[%s4422_s0 + $0x1f0] sm:$0xff] }
 0x144   :  { %v1991_v5 = vadd.f32 %v1987_v44, %v1981_v39  ;;  %v1960_v48 = vadd.f32 %v1958_v56, %v1956_v33  ;;  %v1976_v49 = vrot.slane %v1950_v63, 7  ;;  %v2019_v19 = vmul.f32 %v4257_v30, %v2502_v16 }
 0x145   :  { %v2011_v21 = vadd.f32 %v2009_v43, %v2007_v23  ;;  %v2017_v27 = vadd.f32 %v2015_v4, %v2013_v0  ;;  %v2023_v36 = vmul.f32 %v4137_v62, %v2492_v11  ;;  %v2024_v25 = vmul.f32 %v4166_v37, %v2492_v11 }
 0x146   :  { %2418 = vst.msk [vmem:[%s4427_s5 + $0x1c0] sm:$0xff] %vm251_vm2, %v1991_v5  ;;  %v1972_v8 = vadd.f32 %v3859_v46, %v1960_v48  ;;  %v1977_v28 = vsel %vm231_vm0, %v1975_v20, %v1976_v49  ;;  %v2025_v62 = vmul.f32 %v4197_v60, %v2498_v14  ;;  %v2026_v35 = vmul.f32 %v4226_v55, %v2498_v14 }
 0x147   :  { %v2021_v38 = vadd.f32 %v2019_v19, %v2017_v27  ;;  %v2029_v50 = vmul.f32 %v4257_v30, %v2504_v17  ;;  %v2030_v40 = vmul.f32 %v4286_v32, %v2504_v17  ;;  %v2037_v59 = vrot.slane %v2011_v21, 7 }
 0x148   :  { %v1982_v42 = vadd.f32 %v1977_v28, %v1972_v8  ;;  %v2027_v20 = vadd.f32 %v2025_v62, %v2023_v36  ;;  %v2028_v24 = vadd.f32 %v2026_v35, %v2024_v25  ;;  %v2004_v22 = vmul.f32 %v4166_v37, %v2488_v9  ;;  %v2433_v8 = vld [vmem:[%s4422_s0 + $0x1f8] sm:$0xff] }
 0x149   :  { %v2033_v26 = vadd.f32 %v3859_v46, %v2021_v38  ;;  %v2042_v1 = vsel %vm231_vm0, 0.0, %v2037_v59  ;;  %v2006_v18 = vmul.f32 %v4226_v55, %v2494_v12  ;;  %v2010_v45 = vmul.f32 %v4286_v32, %v2500_v15 }
 0x14a   :  { %v1992_v3 = vadd.f32 %v1990_v2, %v1982_v42  ;;  %v2031_v47 = vadd.f32 %v2029_v50, %v2027_v20  ;;  %v2032_v34 = vadd.f32 %v2030_v40, %v2028_v24  ;;  %v2014_v6 = vmul.f32 %v4166_v37, %v2490_v10 }
 0x14b   :  { %v2043_v57 = vadd.f32 %v2042_v1, %v2033_v26  ;;  %v2008_v51 = vadd.f32 %v2006_v18, %v2004_v22  ;;  %v2016_v39 = vmul.f32 %v4226_v55, %v2496_v13  ;;  %v2020_v52 = vmul.f32 %v4286_v32, %v2502_v16 }
 0x14c   :  { %2419 = vst.msk [vmem:[%s4427_s5 + $0x1c8] sm:$0xff] %vm251_vm2, %v1992_v3  ;;  %v2047_v41 = vrot.slane %v2031_v47, 1  ;;  %v2048_v56 = vrot.slane %v2032_v34, 1  ;;  %v2065_v37 = vmul.f32 %v4197_v60, %v2488_v9  ;;  %v2067_v53 = vmul.f32 %v4257_v30, %v2494_v12 }
 0x14d   :  { %v2012_v61 = vadd.f32 %v2010_v45, %v2008_v51  ;;  %v2018_v31 = vadd.f32 %v2016_v39, %v2014_v6  ;;  %v2071_v63 = vmul.f32 %v4317_v29, %v2500_v15  ;;  %v2075_v33 = vmul.f32 %v4197_v60, %v2490_v10 }
 0x14e   :  { %v2049_v43 = vsel %vm242_vm1, %v2047_v41, %v2048_v56  ;;  %v2052_v0 = vsel %vm242_vm1, %v2048_v56, 0.0  ;;  %v2069_v44 = vadd.f32 %v2067_v53, %v2065_v37  ;;  %v2077_v2 = vmul.f32 %v4257_v30, %v2496_v13 }
 0x14f   :  { %v2053_v23 = vadd.f32 %v2049_v43, %v2043_v57  ;;  %v2022_v4 = vadd.f32 %v2020_v52, %v2018_v31  ;;  %v2038_v5 = vrot.slane %v2012_v61, 7  ;;  %v2081_v48 = vmul.f32 %v4317_v29, %v2502_v16 }
 0x150   :  { %v2073_v49 = vadd.f32 %v2071_v63, %v2069_v44  ;;  %v2079_v19 = vadd.f32 %v2077_v2, %v2075_v33  ;;  %v2085_v21 = vmul.f32 %v4197_v60, %v2492_v11  ;;  %v2086_v27 = vmul.f32 %v4226_v55, %v2492_v11 }
 0x151   :  { %2426 = vst.msk [vmem:[%s4427_s5 + $0x1d0] sm:$0xff] %vm251_vm2, %v2053_v23  ;;  %v2034_v36 = vadd.f32 %v3859_v46, %v2022_v4  ;;  %v2039_v25 = vsel %vm231_vm0, %v2037_v59, %v2038_v5  ;;  %v2087_v28 = vmul.f32 %v4257_v30, %v2498_v14  ;;  %v2088_v60 = vmul.f32 %v4286_v32, %v2498_v14 }
 0x152   :  { %v2083_v62 = vadd.f32 %v2081_v48, %v2079_v19  ;;  %v2091_v35 = vmul.f32 %v4317_v29, %v2504_v17  ;;  %v2092_v38 = vmul.f32 %v2433_v8, %v2504_v17  ;;  %v2099_v50 = vrot.slane %v2073_v49, 7 }
 0x153   :  { %v2044_v40 = vadd.f32 %v2039_v25, %v2034_v36  ;;  %v2089_v42 = vadd.f32 %v2087_v28, %v2085_v21  ;;  %v2090_v59 = vadd.f32 %v2088_v60, %v2086_v27  ;;  %v2066_v20 = vmul.f32 %v4226_v55, %v2488_v9 }
 0x154   :  { %v2095_v24 = vadd.f32 %v3859_v46, %v2083_v62  ;;  %v2104_v22 = vsel %vm231_vm0, 0.0, %v2099_v50  ;;  %v2068_v26 = vmul.f32 %v4286_v32, %v2494_v12  ;;  %v2072_v1 = vmul.f32 %v2433_v8, %v2500_v15 }
 0x155   :  { %v2054_v18 = vadd.f32 %v2052_v0, %v2044_v40  ;;  %v2093_v45 = vadd.f32 %v2091_v35, %v2089_v42  ;;  %v2094_v3 = vadd.f32 %v2092_v38, %v2090_v59  ;;  %v2076_v17 = vmul.f32 %v4226_v55, %v2490_v10 }
 0x156   :  { %v2105_v47 = vadd.f32 %v2104_v22, %v2095_v24  ;;  %v2070_v34 = vadd.f32 %v2068_v26, %v2066_v20  ;;  %v2078_v6 = vmul.f32 %v4286_v32, %v2496_v13  ;;  %v2082_v57 = vmul.f32 %v2433_v8, %v2502_v16 }
 0x157   :  { %2427 = vst.msk [vmem:[%s4427_s5 + $0x1d8] sm:$0xff] %vm251_vm2, %v2054_v18  ;;  %v2109_v51 = vrot.slane %v2093_v45, 1  ;;  %v2110_v15 = vrot.slane %v2094_v3, 1  ;;  %v2124_v39 = vmul.f32 %v4257_v30, %v2488_v9  ;;  %v2126_v55 = vmul.f32 %v4317_v29, %v2494_v12 }
 0x158   :  { %v2074_v52 = vadd.f32 %v2072_v1, %v2070_v34  ;;  %v2080_v41 = vadd.f32 %v2078_v6, %v2076_v17  ;;  %v2134_v56 = vmul.f32 %v4257_v30, %v2490_v10  ;;  %v2136_v16 = vmul.f32 %v4317_v29, %v2496_v13 }
 0x159   :  { %v2111_v37 = vsel %vm242_vm1, %v2109_v51, %v2110_v15  ;;  %v2114_v53 = vsel %vm242_vm1, %v2110_v15, 0.0  ;;  %v2128_v61 = vadd.f32 %v2126_v55, %v2124_v39  ;;  %v2144_v31 = vmul.f32 %v4257_v30, %v2492_v11 }
 0x15a   :  { %v2115_v63 = vadd.f32 %v2111_v37, %v2105_v47  ;;  %v2084_v33 = vadd.f32 %v2082_v57, %v2080_v41  ;;  %v2100_v43 = vrot.slane %v2074_v52, 7  ;;  %v2138_v0 = vadd.f32 %v2136_v16, %v2134_v56 }
 0x15b   :  { %v2132_v44 = vadd.f32 %v2128_v61, %v3417_v54  ;;  %v2145_v2 = vmul.f32 %v4286_v32, %v2492_v11  ;;  %v2146_v23 = vmul.f32 %v4317_v29, %v2498_v14  ;;  %v2147_v4 = vmul.f32 %v2433_v8, %v2498_v14 }
 0x15c   :  { %2434 = vst.msk [vmem:[%s4427_s5 + $0x1e0] sm:$0xff] %vm251_vm2, %v2115_v63  ;;  %v2096_v30 = vadd.f32 %v3859_v46, %v2084_v33  ;;  %v2101_v5 = vsel %vm231_vm0, %v2099_v50, %v2100_v43  ;;  %v2142_v48 = vadd.f32 %v2138_v0, %v3424_v58  ;;  %v2125_v49 = vmul.f32 %v4286_v32, %v2488_v9 }
 0x15d   :  { %v2148_v11 = vadd.f32 %v2146_v23, %v2144_v31  ;;  %v2149_v19 = vadd.f32 %v2147_v4, %v2145_v2  ;;  %v2158_v21 = vrot.slane %v2132_v44, 7  ;;  %v2127_v29 = vmul.f32 %v2433_v8, %v2494_v12 }
 0x15e   :  { %v2106_v14 = vadd.f32 %v2101_v5, %v2096_v30  ;;  %v2154_v27 = vadd.f32 %v3859_v46, %v2142_v48  ;;  %v2135_v36 = vmul.f32 %v4286_v32, %v2490_v10  ;;  %v2137_v25 = vmul.f32 %v2433_v8, %v2496_v13 }
 0x15f   :  { %v2152_v28 = vadd.f32 %v2148_v11, %v3445_v7  ;;  %v2153_v60 = vadd.f32 %v2149_v19, %v3445_v7  ;;  %v2163_v62 = vsel %vm231_vm0, 0.0, %v2158_v21  ;;  %v2129_v9 = vadd.f32 %v2127_v29, %v2125_v49 }
 0x160   :  { %v2116_v35 = vadd.f32 %v2114_v53, %v2106_v14  ;;  %v2164_v38 = vadd.f32 %v2163_v62, %v2154_v27  ;;  %v2139_v50 = vadd.f32 %v2137_v25, %v2135_v36 }
 0x161   :  { %v2168_v40 = vrot.slane %v2152_v28, 1  ;;  %v2169_v12 = vrot.slane %v2153_v60, 1  ;;  %v2133_v42 = vadd.f32 %v2129_v9, %v3417_v54 }
 0x162   :  { %2435 = vst.msk [vmem:[%s4427_s5 + $0x1e8] sm:$0xff] %vm251_vm2, %v2116_v35  ;;  %v2143_v10 = vadd.f32 %v2139_v50, %v3424_v58 }
 0x163   :  { %v2170_v13 = vsel %vm242_vm1, %v2168_v40, %v2169_v12  ;;  %v2159_v7 = vrot.slane %v2133_v42, 7  ;;  %v2173_v20 = vsel %vm242_vm1, %v2169_v12, 0.0 }
 0x164   :  { %v2174_v32 = vadd.f32 %v2170_v13, %v2164_v38  ;;  %v2155_v8 = vadd.f32 %v3859_v46, %v2143_v10 }
 0x165   :  { %v2160_v59 = vsel %vm231_vm0, %v2158_v21, %v2159_v7 }
 0x166   :  { %2440 = vst.msk [vmem:[%s4427_s5 + $0x1f0] sm:$0xff] %vm251_vm2, %v2174_v32  ;;  %v2165_v54 = vadd.f32 %v2160_v59, %v2155_v8 }
 0x168   :  { %v2175_v24 = vadd.f32 %v2173_v20, %v2165_v54 }
 0x16a   :  { %2441 = vst.msk [vmem:[%s4427_s5 + $0x1f8] sm:$0xff] %vm251_vm2, %v2175_v24 }

</bundles_post_ra>
